<compile_context>
chip_gen: v5e
topology: v5e:2x2
jax: 0.10.0
libtpu: 0.0.40
codegen_flags: <defaults>
</compile_context>

<pallas_src>
import jax
import jax.numpy as jnp
from jax.experimental import pallas as pl
from jax.experimental.pallas import tpu as pltpu


LEAKY_SLOPE = 0.2
BN_EPS = 1e-5


def _round_up(x, m):
    return ((x + m - 1) // m) * m


# ---------------------------------------------------------------------------
# Pallas kernels
# ---------------------------------------------------------------------------
def _make_matmul_act_kernel(act):
    """[tm, Kp] x [Kp, Cp] on the MXU with a fused elementwise activation."""
    def kernel(x_ref, w_ref, o_ref):
        acc = jnp.dot(x_ref[...], w_ref[...], preferred_element_type=jnp.float32)
        if act == "leaky":
            acc = jnp.where(acc > 0, acc, LEAKY_SLOPE * acc)
        elif act == "sigmoid":
            acc = jax.nn.sigmoid(acc)
        o_ref[...] = acc
    return kernel


def _matmul_stats_kernel(x_ref, w_ref, o_ref, sum_ref, sq_ref):
    """Conv matmul + per-channel sum / sum-of-squares accumulated across the M
    grid axis (accumulator outputs, init at step 0).  Zero-padded M rows and
    Co columns contribute exactly 0 to both stats, so no masking is needed."""
    @pl.when(pl.program_id(0) == 0)
    def _():
        sum_ref[...] = jnp.zeros_like(sum_ref)
        sq_ref[...] = jnp.zeros_like(sq_ref)

    acc = jnp.dot(x_ref[...], w_ref[...], preferred_element_type=jnp.float32)
    o_ref[...] = acc
    sum_ref[...] += jnp.sum(acc, axis=0, keepdims=True)
    sq_ref[...] += jnp.sum(acc * acc, axis=0, keepdims=True)


def _make_bn_leaky_kernel(inv_m):
    """Normalize pass: x*scale + shift then LeakyReLU(0.2).
    Batch statistics come from the fused sum/sumsq accumulators; divide by the
    *actual* M (inv_m is a trace-time constant)."""
    def kernel(x_ref, sum_ref, sq_ref, g_ref, b_ref, o_ref):
        mean = sum_ref[...] * inv_m
        var = sq_ref[...] * inv_m - mean * mean          # biased batch variance
        scale = jax.lax.rsqrt(var + BN_EPS) * g_ref[...]
        shift = b_ref[...] - mean * scale
        y = x_ref[...] * scale + shift
        o_ref[...] = jnp.where(y > 0, y, LEAKY_SLOPE * y)
    return kernel


# ---------------------------------------------------------------------------
# Wrappers
# ---------------------------------------------------------------------------
def _pad_and_cast(patches, wmat):
    """Zero-pad K and Co to multiples of 128 (lane-dense), cast to bf16."""
    M, K = patches.shape
    Co = wmat.shape[1]
    Kp = _round_up(K, 128)
    Cp = _round_up(Co, 128)
    patches = jnp.pad(patches.astype(jnp.bfloat16), ((0, 0), (0, Kp - K)))
    wmat = jnp.pad(wmat.astype(jnp.bfloat16), ((0, Kp - K), (0, Cp - Co)))
    return patches, wmat, Kp, Cp


def _m_tiling(M, tm):
    """Single block when small (skip grid overhead), otherwise tm-row tiles."""
    if M <= 2 * tm:
        Mp = _round_up(M, 8)
        return Mp, Mp, 1
    Mp = _round_up(M, tm)
    return Mp, tm, Mp // tm


def pallas_matmul_act(patches, wmat, act, tm=512):
    """[M, K] @ [K, Co] with fused activation.  Returns f32 [M, Co]."""
    M, K = patches.shape
    Co = wmat.shape[1]
    patches, wmat, Kp, Cp = _pad_and_cast(patches, wmat)
    Mp, tm_eff, n_blk = _m_tiling(M, tm)
    if Mp != M:
        patches = jnp.pad(patches, ((0, Mp - M), (0, 0)))

    out = pl.pallas_call(
        _make_matmul_act_kernel(act),
        out_shape=jax.ShapeDtypeStruct((Mp, Cp), jnp.float32),
        grid=(n_blk,),
        in_specs=[
            pl.BlockSpec((tm_eff, Kp), lambda i: (i, 0)),
            pl.BlockSpec((Kp, Cp), lambda i: (0, 0)),
        ],
        out_specs=pl.BlockSpec((tm_eff, Cp), lambda i: (i, 0)),
        compiler_params=pltpu.CompilerParams(dimension_semantics=("parallel",)),
    )(patches, wmat)
    return out[:M, :Co]


def pallas_conv_bn_leaky(patches, wmat, gamma, beta, tm=512):
    """Conv matmul with fused per-channel sum/sumsq accumulation, followed by a
    lightweight tiled BatchNorm(batch stats)+LeakyReLU normalize pass."""
    M, K = patches.shape
    Co = wmat.shape[1]
    patches, wmat, Kp, Cp = _pad_and_cast(patches, wmat)
    Mp, tm_eff, n_blk = _m_tiling(M, tm)
    if Mp != M:
        patches = jnp.pad(patches, ((0, Mp - M), (0, 0)))

    conv_out, s_sum, s_sq = pl.pallas_call(
        _matmul_stats_kernel,
        out_shape=(
            jax.ShapeDtypeStruct((Mp, Cp), jnp.float32),
            jax.ShapeDtypeStruct((1, Cp), jnp.float32),
            jax.ShapeDtypeStruct((1, Cp), jnp.float32),
        ),
        grid=(n_blk,),
        in_specs=[
            pl.BlockSpec((tm_eff, Kp), lambda i: (i, 0)),
            pl.BlockSpec((Kp, Cp), lambda i: (0, 0)),
        ],
        out_specs=(
            pl.BlockSpec((tm_eff, Cp), lambda i: (i, 0)),
            pl.BlockSpec((1, Cp), lambda i: (0, 0)),   # resident accumulator
            pl.BlockSpec((1, Cp), lambda i: (0, 0)),   # resident accumulator
        ),
        compiler_params=pltpu.CompilerParams(dimension_semantics=("arbitrary",)),
    )(patches, wmat)

    g = jnp.pad(gamma.astype(jnp.float32), (0, Cp - Co),
                constant_values=1.0).reshape(1, Cp)
    b = jnp.pad(beta.astype(jnp.float32), (0, Cp - Co)).reshape(1, Cp)

    out = pl.pallas_call(
        _make_bn_leaky_kernel(1.0 / M),
        out_shape=jax.ShapeDtypeStruct((Mp, Cp), jnp.float32),
        grid=(n_blk,),
        in_specs=[
            pl.BlockSpec((tm_eff, Cp), lambda i: (i, 0)),
            pl.BlockSpec((1, Cp), lambda i: (0, 0)),
            pl.BlockSpec((1, Cp), lambda i: (0, 0)),
            pl.BlockSpec((1, Cp), lambda i: (0, 0)),
            pl.BlockSpec((1, Cp), lambda i: (0, 0)),
        ],
        out_specs=pl.BlockSpec((tm_eff, Cp), lambda i: (i, 0)),
        compiler_params=pltpu.CompilerParams(dimension_semantics=("parallel",)),
    )(conv_out, s_sum, s_sq, g, b)
    return out[:M, :Co]


def _im2col(x_nhwc, k, stride, pad):
    """Extract conv patches.  Returns [N*Ho*Wo, k*k*Cin] and output dims."""
    x = jnp.pad(x_nhwc, ((0, 0), (pad, pad), (pad, pad), (0, 0)))
    N, H, W, C = x.shape
    Ho = (H - k) // stride + 1
    Wo = (W - k) // stride + 1
    patches = []
    for di in range(k):
        for dj in range(k):
            patches.append(
                x[:, di:di + stride * Ho:stride, dj:dj + stride * Wo:stride, :]
            )
    p = jnp.stack(patches, axis=3)                     # (N, Ho, Wo, k*k, C)
    return p.reshape(N * Ho * Wo, k * k * C), (N, Ho, Wo)


def _prep_weight(w_oihw):
    # (Co, Ci, kh, kw) -> (kh, kw, Ci, Co) -> (kh*kw*Ci, Co): matches patch order.
    k = w_oihw.shape[-1]
    co, ci = w_oihw.shape[0], w_oihw.shape[1]
    return jnp.transpose(w_oihw, (2, 3, 1, 0)).reshape(k * k * ci, co), k, co


def _conv_layer_act(x_nhwc, w_oihw, stride, pad, act):
    wmat, k, _ = _prep_weight(w_oihw)
    # Cast activations to bf16 *before* im2col -> the 16x-expanded patch array
    # is materialized/streamed at half the bytes.
    patches, (n, ho, wo) = _im2col(x_nhwc.astype(jnp.bfloat16), k, stride, pad)
    out = pallas_matmul_act(patches, wmat, act)
    return out, (n, ho, wo)


def _conv_layer_bn_leaky(x_nhwc, w_oihw, gamma, beta, stride, pad):
    wmat, k, _ = _prep_weight(w_oihw)
    patches, (n, ho, wo) = _im2col(x_nhwc.astype(jnp.bfloat16), k, stride, pad)
    out = pallas_conv_bn_leaky(patches, wmat, gamma, beta)
    return out, (n, ho, wo)


def discriminator_forward(x_nchw, weights, gammas, betas):
    """Equivalent of Discriminator.forward.  Returns shape (N,)."""
    x = jnp.transpose(x_nchw, (0, 2, 3, 1)).astype(jnp.float32)   # NCHW -> NHWC

    # conv1 + LeakyReLU (fused in the matmul kernel)
    out, (n, ho, wo) = _conv_layer_act(x, weights[0], 2, 1, "leaky")
    x = out.reshape(n, ho, wo, -1)

    # conv2..conv4: conv matmul (+ fused channel stats) -> BN + LeakyReLU
    for li in range(1, 4):
        out, (n, ho, wo) = _conv_layer_bn_leaky(
            x, weights[li], gammas[li - 1], betas[li - 1], 2, 1)
        x = out.reshape(n, ho, wo, -1)

    # conv5 + Sigmoid (fused), then .view(-1)
    out, _ = _conv_layer_act(x, weights[4], 1, 0, "sigmoid")
    return out.reshape(-1)


# ---------------------------------------------------------------------------
# Pure-JAX reference (for correctness check)
# ---------------------------------------------------------------------------
def reference_forward(x_nchw, weights, gammas, betas, matmul_dtype=jnp.float32):
    x = jnp.transpose(x_nchw, (0, 2, 3, 1)).astype(jnp.float32)

    def conv(x, w, stride, pad):
        return jax.lax.conv_general_dilated(
            x.astype(matmul_dtype),
            jnp.transpose(w, (2, 3, 1, 0)).astype(matmul_dtype),
            window_strides=(stride, stride),
            padding=[(pad, pad), (pad, pad)],
            dimension_numbers=("NHWC", "HWIO", "NHWC"),
            preferred_element_type=jnp.float32)

    def leaky(v):
        return jnp.where(v > 0, v, LEAKY_SLOPE * v)

    def bn(v, g, b):
        mean = jnp.mean(v, axis=(0, 1, 2), keepdims=True)
        var = jnp.mean(jnp.square(v - mean), axis=(0, 1, 2), keepdims=True)
        return (v - mean) * jax.lax.rsqrt(var + BN_EPS) * g + b

    x = leaky(conv(x, weights[0], 2, 1))
    x = leaky(bn(conv(x, weights[1], 2, 1), gammas[0], betas[0]))
    x = leaky(bn(conv(x, weights[2], 2, 1), gammas[1], betas[1]))
    x = leaky(bn(conv(x, weights[3], 2, 1), gammas[2], betas[2]))
    x = jax.nn.sigmoid(conv(x, weights[4], 1, 0))
    return x.reshape(-1)


# ---------------------------------------------------------------------------
# Main
# ---------------------------------------------------------------------------
if __name__ == "__main__":
    # Small shapes consistent with the module: the final 4x4/stride-1/pad-0 conv
    # requires 64x64 spatial input for the standard DCGAN discriminator.
    batch, channels, feature_maps, spatial = 2, 3, 8, 64

    key = jax.random.PRNGKey(0)
    k_x, k1, k2, k3, k4, k5 = jax.random.split(key, 6)

    x = jax.random.normal(k_x, (batch, channels, spatial, spatial), jnp.float32)

    fm = feature_maps
    weights = [
        0.02 * jax.random.normal(k1, (fm,      channels, 4, 4), jnp.float32),
        0.02 * jax.random.normal(k2, (fm * 2,  fm,       4, 4), jnp.float32),
        0.02 * jax.random.normal(k3, (fm * 4,  fm * 2,   4, 4), jnp.float32),
        0.02 * jax.random.normal(k4, (fm * 8,  fm * 4,   4, 4), jnp.float32),
        0.02 * jax.random.normal(k5, (1,       fm * 8,   4, 4), jnp.float32),
    ]
    # BatchNorm affine params (PyTorch default init: weight=1, bias=0).
    gammas = [jnp.ones((fm * 2,), jnp.float32),
              jnp.ones((fm * 4,), jnp.float32),
              jnp.ones((fm * 8,), jnp.float32)]
    betas = [jnp.zeros((fm * 2,), jnp.float32),
             jnp.zeros((fm * 4,), jnp.float32),
             jnp.zeros((fm * 8,), jnp.float32)]

    fwd = jax.jit(discriminator_forward)
    out = jax.block_until_ready(fwd(x, weights, gammas, betas))

    # Matched-precision reference (bf16 MXU inputs, f32 accumulation): tight check
    # of kernel logic.  Pure-f32 reference: looser check of module semantics
    # (the kernel uses bf16 matmul inputs).
    ref_bf16 = jax.block_until_ready(
        reference_forward(x, weights, gammas, betas, jnp.bfloat16))
    ref_f32 = jax.block_until_ready(
        reference_forward(x, weights, gammas, betas, jnp.float32))

    assert out.shape == (batch,), f"bad output shape {out.shape}"
    assert bool(jnp.all(jnp.isfinite(out)))
    assert bool(jnp.allclose(out, ref_bf16, atol=5e-3, rtol=5e-3)), (out, ref_bf16)
    assert bool(jnp.allclose(out, ref_f32, atol=2e-2, rtol=2e-2)), (out, ref_f32)

    print("KERNEL_OK")
</pallas_src>

<mosaic_0001>
module attributes {stable_mosaic.version = 11 : i64} {
  func.func @kernel(%arg0: i32, %arg1: memref<512x128xbf16, #tpu.memory_space<vmem>>, %arg2: memref<128x128xbf16, #tpu.memory_space<vmem>>, %arg3: memref<512x128xf32, #tpu.memory_space<vmem>>) attributes {dimension_semantics = [#tpu.dimension_semantics<parallel>], iteration_bounds = array<i64: 4>, scalar_prefetch = 0 : i64, scratch_operands = 0 : i64, tpu.core_type = #tpu.core_type<tc>, window_params = [{transform_indices = @transform_0, window_bounds = array<i64: 512, 128>}, {pipeline_mode = #tpu.pipeline_mode<synchronous>, transform_indices = @transform_1, window_bounds = array<i64: 128, 128>}, {transform_indices = @transform_2, window_bounds = array<i64: 512, 128>}]} {
    %c0 = arith.constant 0 : index
    %c0_0 = arith.constant 0 : index
    %0 = vector.load %arg1[%c0, %c0_0] : memref<512x128xbf16, #tpu.memory_space<vmem>>, vector<512x128xbf16>
    %c0_1 = arith.constant 0 : index
    %c0_2 = arith.constant 0 : index
    %1 = vector.load %arg2[%c0_1, %c0_2] : memref<128x128xbf16, #tpu.memory_space<vmem>>, vector<128x128xbf16>
    %cst = arith.constant dense<0.000000e+00> : vector<512x128xf32>
    %2 = tpu.matmul %0, %1, %cst {dimension_numbers = #tpu.dot_dimension_numbers<[1], [0], [0], [1], [0, 0, 1, 1], [], []>} : vector<512x128xbf16>, vector<128x128xbf16>, vector<512x128xf32> -> vector<512x128xf32>
    %cst_3 = arith.constant 0.000000e+00 : f32
    %3 = vector.broadcast %cst_3 : f32 to vector<512x128xf32>
    %4 = arith.cmpf ogt, %2, %3 : vector<512x128xf32>
    %cst_4 = arith.constant 2.000000e-01 : f32
    %5 = vector.broadcast %cst_4 : f32 to vector<512x128xf32>
    %6 = arith.mulf %5, %2 : vector<512x128xf32>
    %7 = arith.select %4, %2, %6 : vector<512x128xi1>, vector<512x128xf32>
    %c0_5 = arith.constant 0 : index
    %c0_6 = arith.constant 0 : index
    %8 = vector.load %arg3[%c0_5, %c0_6] : memref<512x128xf32, #tpu.memory_space<vmem>>, vector<512x128xf32>
    tpu.vector_store %arg3[%c0_5, %c0_6], %7 {strides = array<i32>} : memref<512x128xf32, #tpu.memory_space<vmem>>, vector<512x128xf32>,
    return
  }
  func.func @transform_0(%arg0: i32) -> (i32, i32) {
    %c0_i32 = arith.constant 0 : i32
    %c0_i32_0 = arith.constant 0 : i32
    return %arg0, %c0_i32 : i32, i32
  }
  func.func @transform_1(%arg0: i32) -> (i32, i32) {
    %c0_i32 = arith.constant 0 : i32
    %c0_i32_0 = arith.constant 0 : i32
    %c0_i32_1 = arith.constant 0 : i32
    return %c0_i32, %c0_i32_0 : i32, i32
  }
  func.func @transform_2(%arg0: i32) -> (i32, i32) {
    %c0_i32 = arith.constant 0 : i32
    %c0_i32_0 = arith.constant 0 : i32
    return %arg0, %c0_i32 : i32, i32
  }
}

module attributes {stable_mosaic.version = 11 : i64} {
  func.func @_matmul_stats_kernel(%arg0: i32, %arg1: memref<512x128xbf16, #tpu.memory_space<vmem>>, %arg2: memref<128x128xbf16, #tpu.memory_space<vmem>>, %arg3: memref<512x128xf32, #tpu.memory_space<vmem>>, %arg4: memref<1x128xf32, #tpu.memory_space<vmem>>, %arg5: memref<1x128xf32, #tpu.memory_space<vmem>>) attributes {dimension_semantics = [#tpu.dimension_semantics<arbitrary>], iteration_bounds = array<i64: 1>, scalar_prefetch = 0 : i64, scratch_operands = 0 : i64, tpu.core_type = #tpu.core_type<tc>, window_params = [{transform_indices = @transform_0, window_bounds = array<i64: 512, 128>}, {pipeline_mode = #tpu.pipeline_mode<synchronous>, transform_indices = @transform_1, window_bounds = array<i64: 128, 128>}, {transform_indices = @transform_2, window_bounds = array<i64: 512, 128>}, {pipeline_mode = #tpu.pipeline_mode<synchronous>, transform_indices = @transform_3, window_bounds = array<i64: 1, 128>}, {pipeline_mode = #tpu.pipeline_mode<synchronous>, transform_indices = @transform_4, window_bounds = array<i64: 1, 128>}]} {
    %c0_i32 = arith.constant 0 : i32
    %0 = arith.cmpi eq, %arg0, %c0_i32 : i32
    %1 = arith.extui %0 : i1 to i32
    %c0_i32_0 = arith.constant 0 : i32
    %2 = arith.cmpi ne, %1, %c0_i32_0 : i32
    scf.if %2 {
      %cst_16 = arith.constant 0.000000e+00 : f32
      %18 = vector.broadcast %cst_16 : f32 to vector<1x128xf32>
      %c0_17 = arith.constant 0 : index
      %c0_18 = arith.constant 0 : index
      %19 = vector.load %arg4[%c0_17, %c0_18] : memref<1x128xf32, #tpu.memory_space<vmem>>, vector<1x128xf32>
      tpu.vector_store %arg4[%c0_17, %c0_18], %18 {strides = array<i32>} : memref<1x128xf32, #tpu.memory_space<vmem>>, vector<1x128xf32>,
      %cst_19 = arith.constant 0.000000e+00 : f32
      %20 = vector.broadcast %cst_19 : f32 to vector<1x128xf32>
      %c0_20 = arith.constant 0 : index
      %c0_21 = arith.constant 0 : index
      %21 = vector.load %arg5[%c0_20, %c0_21] : memref<1x128xf32, #tpu.memory_space<vmem>>, vector<1x128xf32>
      tpu.vector_store %arg5[%c0_20, %c0_21], %20 {strides = array<i32>} : memref<1x128xf32, #tpu.memory_space<vmem>>, vector<1x128xf32>,
    } else {
    }
    %c0 = arith.constant 0 : index
    %c0_1 = arith.constant 0 : index
    %3 = vector.load %arg1[%c0, %c0_1] : memref<512x128xbf16, #tpu.memory_space<vmem>>, vector<512x128xbf16>
    %c0_2 = arith.constant 0 : index
    %c0_3 = arith.constant 0 : index
    %4 = vector.load %arg2[%c0_2, %c0_3] : memref<128x128xbf16, #tpu.memory_space<vmem>>, vector<128x128xbf16>
    %cst = arith.constant dense<0.000000e+00> : vector<512x128xf32>
    %5 = tpu.matmul %3, %4, %cst {dimension_numbers = #tpu.dot_dimension_numbers<[1], [0], [0], [1], [0, 0, 1, 1], [], []>} : vector<512x128xbf16>, vector<128x128xbf16>, vector<512x128xf32> -> vector<512x128xf32>
    %c0_4 = arith.constant 0 : index
    %c0_5 = arith.constant 0 : index
    %6 = vector.load %arg3[%c0_4, %c0_5] : memref<512x128xf32, #tpu.memory_space<vmem>>, vector<512x128xf32>
    tpu.vector_store %arg3[%c0_4, %c0_5], %5 {strides = array<i32>} : memref<512x128xf32, #tpu.memory_space<vmem>>, vector<512x128xf32>,
    %c0_6 = arith.constant 0 : index
    %c0_7 = arith.constant 0 : index
    %7 = vector.load %arg4[%c0_6, %c0_7] : memref<1x128xf32, #tpu.memory_space<vmem>>, vector<1x128xf32>
    %cst_8 = arith.constant dense<0.000000e+00> : vector<128xf32>
    %8 = vector.multi_reduction <add>, %5, %cst_8 [0] : vector<512x128xf32> to vector<128xf32>
    %9 = vector.shape_cast %8 : vector<128xf32> to vector<1x128xf32>
    %10 = arith.addf %7, %9 : vector<1x128xf32>
    %c0_9 = arith.constant 0 : index
    %c0_10 = arith.constant 0 : index
    %11 = vector.load %arg4[%c0_9, %c0_10] : memref<1x128xf32, #tpu.memory_space<vmem>>, vector<1x128xf32>
    tpu.vector_store %arg4[%c0_9, %c0_10], %10 {strides = array<i32>} : memref<1x128xf32, #tpu.memory_space<vmem>>, vector<1x128xf32>,
    %c0_11 = arith.constant 0 : index
    %c0_12 = arith.constant 0 : index
    %12 = vector.load %arg5[%c0_11, %c0_12] : memref<1x128xf32, #tpu.memory_space<vmem>>, vector<1x128xf32>
    %13 = arith.mulf %5, %5 : vector<512x128xf32>
    %cst_13 = arith.constant dense<0.000000e+00> : vector<128xf32>
    %14 = vector.multi_reduction <add>, %13, %cst_13 [0] : vector<512x128xf32> to vector<128xf32>
    %15 = vector.shape_cast %14 : vector<128xf32> to vector<1x128xf32>
    %16 = arith.addf %12, %15 : vector<1x128xf32>
    %c0_14 = arith.constant 0 : index
    %c0_15 = arith.constant 0 : index
    %17 = vector.load %arg5[%c0_14, %c0_15] : memref<1x128xf32, #tpu.memory_space<vmem>>, vector<1x128xf32>
    tpu.vector_store %arg5[%c0_14, %c0_15], %16 {strides = array<i32>} : memref<1x128xf32, #tpu.memory_space<vmem>>, vector<1x128xf32>,
    return
  }
  func.func @transform_0(%arg0: i32) -> (i32, i32) {
    %c0_i32 = arith.constant 0 : i32
    %c0_i32_0 = arith.constant 0 : i32
    return %arg0, %c0_i32 : i32, i32
  }
  func.func @transform_1(%arg0: i32) -> (i32, i32) {
    %c0_i32 = arith.constant 0 : i32
    %c0_i32_0 = arith.constant 0 : i32
    %c0_i32_1 = arith.constant 0 : i32
    return %c0_i32, %c0_i32_0 : i32, i32
  }
  func.func @transform_2(%arg0: i32) -> (i32, i32) {
    %c0_i32 = arith.constant 0 : i32
    %c0_i32_0 = arith.constant 0 : i32
    return %arg0, %c0_i32 : i32, i32
  }
  func.func @transform_3(%arg0: i32) -> (i32, i32) {
    %c0_i32 = arith.constant 0 : i32
    %c0_i32_0 = arith.constant 0 : i32
    %c0_i32_1 = arith.constant 0 : i32
    return %c0_i32, %c0_i32_0 : i32, i32
  }
  func.func @transform_4(%arg0: i32) -> (i32, i32) {
    %c0_i32 = arith.constant 0 : i32
    %c0_i32_0 = arith.constant 0 : i32
    %c0_i32_1 = arith.constant 0 : i32
    return %c0_i32, %c0_i32_0 : i32, i32
  }
}

module attributes {stable_mosaic.version = 11 : i64} {
  func.func @kernel(%arg0: i32, %arg1: memref<512x128xf32, #tpu.memory_space<vmem>>, %arg2: memref<1x128xf32, #tpu.memory_space<vmem>>, %arg3: memref<1x128xf32, #tpu.memory_space<vmem>>, %arg4: memref<1x128xf32, #tpu.memory_space<vmem>>, %arg5: memref<1x128xf32, #tpu.memory_space<vmem>>, %arg6: memref<512x128xf32, #tpu.memory_space<vmem>>) attributes {dimension_semantics = [#tpu.dimension_semantics<parallel>], iteration_bounds = array<i64: 1>, scalar_prefetch = 0 : i64, scratch_operands = 0 : i64, tpu.core_type = #tpu.core_type<tc>, window_params = [{transform_indices = @transform_0, window_bounds = array<i64: 512, 128>}, {pipeline_mode = #tpu.pipeline_mode<synchronous>, transform_indices = @transform_1, window_bounds = array<i64: 1, 128>}, {pipeline_mode = #tpu.pipeline_mode<synchronous>, transform_indices = @transform_2, window_bounds = array<i64: 1, 128>}, {pipeline_mode = #tpu.pipeline_mode<synchronous>, transform_indices = @transform_3, window_bounds = array<i64: 1, 128>}, {pipeline_mode = #tpu.pipeline_mode<synchronous>, transform_indices = @transform_4, window_bounds = array<i64: 1, 128>}, {transform_indices = @transform_5, window_bounds = array<i64: 512, 128>}]} {
    %c0 = arith.constant 0 : index
    %c0_0 = arith.constant 0 : index
    %0 = vector.load %arg2[%c0, %c0_0] : memref<1x128xf32, #tpu.memory_space<vmem>>, vector<1x128xf32>
    %cst = arith.constant 0.001953125 : f32
    %1 = vector.broadcast %cst : f32 to vector<1x128xf32>
    %2 = arith.mulf %0, %1 : vector<1x128xf32>
    %c0_1 = arith.constant 0 : index
    %c0_2 = arith.constant 0 : index
    %3 = vector.load %arg3[%c0_1, %c0_2] : memref<1x128xf32, #tpu.memory_space<vmem>>, vector<1x128xf32>
    %cst_3 = arith.constant 0.001953125 : f32
    %4 = vector.broadcast %cst_3 : f32 to vector<1x128xf32>
    %5 = arith.mulf %3, %4 : vector<1x128xf32>
    %6 = arith.mulf %2, %2 : vector<1x128xf32>
    %7 = arith.subf %5, %6 : vector<1x128xf32>
    %cst_4 = arith.constant 9.99999974E-6 : f32
    %8 = vector.broadcast %cst_4 : f32 to vector<1x128xf32>
    %9 = arith.addf %7, %8 : vector<1x128xf32>
    %10 = math.rsqrt %9 : vector<1x128xf32>
    %c0_5 = arith.constant 0 : index
    %c0_6 = arith.constant 0 : index
    %11 = vector.load %arg4[%c0_5, %c0_6] : memref<1x128xf32, #tpu.memory_space<vmem>>, vector<1x128xf32>
    %12 = arith.mulf %10, %11 : vector<1x128xf32>
    %c0_7 = arith.constant 0 : index
    %c0_8 = arith.constant 0 : index
    %13 = vector.load %arg5[%c0_7, %c0_8] : memref<1x128xf32, #tpu.memory_space<vmem>>, vector<1x128xf32>
    %14 = arith.mulf %2, %12 : vector<1x128xf32>
    %15 = arith.subf %13, %14 : vector<1x128xf32>
    %c0_9 = arith.constant 0 : index
    %c0_10 = arith.constant 0 : index
    %16 = vector.load %arg1[%c0_9, %c0_10] : memref<512x128xf32, #tpu.memory_space<vmem>>, vector<512x128xf32>
    %17 = vector.broadcast %12 : vector<1x128xf32> to vector<512x128xf32>
    %18 = arith.mulf %16, %17 : vector<512x128xf32>
    %19 = vector.broadcast %15 : vector<1x128xf32> to vector<512x128xf32>
    %20 = arith.addf %18, %19 : vector<512x128xf32>
    %cst_11 = arith.constant 0.000000e+00 : f32
    %21 = vector.broadcast %cst_11 : f32 to vector<512x128xf32>
    %22 = arith.cmpf ogt, %20, %21 : vector<512x128xf32>
    %cst_12 = arith.constant 2.000000e-01 : f32
    %23 = vector.broadcast %cst_12 : f32 to vector<512x128xf32>
    %24 = arith.mulf %23, %20 : vector<512x128xf32>
    %25 = arith.select %22, %20, %24 : vector<512x128xi1>, vector<512x128xf32>
    %c0_13 = arith.constant 0 : index
    %c0_14 = arith.constant 0 : index
    %26 = vector.load %arg6[%c0_13, %c0_14] : memref<512x128xf32, #tpu.memory_space<vmem>>, vector<512x128xf32>
    tpu.vector_store %arg6[%c0_13, %c0_14], %25 {strides = array<i32>} : memref<512x128xf32, #tpu.memory_space<vmem>>, vector<512x128xf32>,
    return
  }
  func.func @transform_0(%arg0: i32) -> (i32, i32) {
    %c0_i32 = arith.constant 0 : i32
    %c0_i32_0 = arith.constant 0 : i32
    return %arg0, %c0_i32 : i32, i32
  }
  func.func @transform_1(%arg0: i32) -> (i32, i32) {
    %c0_i32 = arith.constant 0 : i32
    %c0_i32_0 = arith.constant 0 : i32
    %c0_i32_1 = arith.constant 0 : i32
    return %c0_i32, %c0_i32_0 : i32, i32
  }
  func.func @transform_2(%arg0: i32) -> (i32, i32) {
    %c0_i32 = arith.constant 0 : i32
    %c0_i32_0 = arith.constant 0 : i32
    %c0_i32_1 = arith.constant 0 : i32
    return %c0_i32, %c0_i32_0 : i32, i32
  }
  func.func @transform_3(%arg0: i32) -> (i32, i32) {
    %c0_i32 = arith.constant 0 : i32
    %c0_i32_0 = arith.constant 0 : i32
    %c0_i32_1 = arith.constant 0 : i32
    return %c0_i32, %c0_i32_0 : i32, i32
  }
  func.func @transform_4(%arg0: i32) -> (i32, i32) {
    %c0_i32 = arith.constant 0 : i32
    %c0_i32_0 = arith.constant 0 : i32
    %c0_i32_1 = arith.constant 0 : i32
    return %c0_i32, %c0_i32_0 : i32, i32
  }
  func.func @transform_5(%arg0: i32) -> (i32, i32) {
    %c0_i32 = arith.constant 0 : i32
    %c0_i32_0 = arith.constant 0 : i32
    return %arg0, %c0_i32 : i32, i32
  }
}

module attributes {stable_mosaic.version = 11 : i64} {
  func.func @_matmul_stats_kernel(%arg0: i32, %arg1: memref<128x256xbf16, #tpu.memory_space<vmem>>, %arg2: memref<256x128xbf16, #tpu.memory_space<vmem>>, %arg3: memref<128x128xf32, #tpu.memory_space<vmem>>, %arg4: memref<1x128xf32, #tpu.memory_space<vmem>>, %arg5: memref<1x128xf32, #tpu.memory_space<vmem>>) attributes {dimension_semantics = [#tpu.dimension_semantics<arbitrary>], iteration_bounds = array<i64: 1>, scalar_prefetch = 0 : i64, scratch_operands = 0 : i64, tpu.core_type = #tpu.core_type<tc>, window_params = [{transform_indices = @transform_0, window_bounds = array<i64: 128, 256>}, {pipeline_mode = #tpu.pipeline_mode<synchronous>, transform_indices = @transform_1, window_bounds = array<i64: 256, 128>}, {transform_indices = @transform_2, window_bounds = array<i64: 128, 128>}, {pipeline_mode = #tpu.pipeline_mode<synchronous>, transform_indices = @transform_3, window_bounds = array<i64: 1, 128>}, {pipeline_mode = #tpu.pipeline_mode<synchronous>, transform_indices = @transform_4, window_bounds = array<i64: 1, 128>}]} {
    %c0_i32 = arith.constant 0 : i32
    %0 = arith.cmpi eq, %arg0, %c0_i32 : i32
    %1 = arith.extui %0 : i1 to i32
    %c0_i32_0 = arith.constant 0 : i32
    %2 = arith.cmpi ne, %1, %c0_i32_0 : i32
    scf.if %2 {
      %cst_16 = arith.constant 0.000000e+00 : f32
      %18 = vector.broadcast %cst_16 : f32 to vector<1x128xf32>
      %c0_17 = arith.constant 0 : index
      %c0_18 = arith.constant 0 : index
      %19 = vector.load %arg4[%c0_17, %c0_18] : memref<1x128xf32, #tpu.memory_space<vmem>>, vector<1x128xf32>
      tpu.vector_store %arg4[%c0_17, %c0_18], %18 {strides = array<i32>} : memref<1x128xf32, #tpu.memory_space<vmem>>, vector<1x128xf32>,
      %cst_19 = arith.constant 0.000000e+00 : f32
      %20 = vector.broadcast %cst_19 : f32 to vector<1x128xf32>
      %c0_20 = arith.constant 0 : index
      %c0_21 = arith.constant 0 : index
      %21 = vector.load %arg5[%c0_20, %c0_21] : memref<1x128xf32, #tpu.memory_space<vmem>>, vector<1x128xf32>
      tpu.vector_store %arg5[%c0_20, %c0_21], %20 {strides = array<i32>} : memref<1x128xf32, #tpu.memory_space<vmem>>, vector<1x128xf32>,
    } else {
    }
    %c0 = arith.constant 0 : index
    %c0_1 = arith.constant 0 : index
    %3 = vector.load %arg1[%c0, %c0_1] : memref<128x256xbf16, #tpu.memory_space<vmem>>, vector<128x256xbf16>
    %c0_2 = arith.constant 0 : index
    %c0_3 = arith.constant 0 : index
    %4 = vector.load %arg2[%c0_2, %c0_3] : memref<256x128xbf16, #tpu.memory_space<vmem>>, vector<256x128xbf16>
    %cst = arith.constant dense<0.000000e+00> : vector<128x128xf32>
    %5 = tpu.matmul %3, %4, %cst {dimension_numbers = #tpu.dot_dimension_numbers<[1], [0], [0], [1], [0, 0, 1, 1], [], []>} : vector<128x256xbf16>, vector<256x128xbf16>, vector<128x128xf32> -> vector<128x128xf32>
    %c0_4 = arith.constant 0 : index
    %c0_5 = arith.constant 0 : index
    %6 = vector.load %arg3[%c0_4, %c0_5] : memref<128x128xf32, #tpu.memory_space<vmem>>, vector<128x128xf32>
    tpu.vector_store %arg3[%c0_4, %c0_5], %5 {strides = array<i32>} : memref<128x128xf32, #tpu.memory_space<vmem>>, vector<128x128xf32>,
    %c0_6 = arith.constant 0 : index
    %c0_7 = arith.constant 0 : index
    %7 = vector.load %arg4[%c0_6, %c0_7] : memref<1x128xf32, #tpu.memory_space<vmem>>, vector<1x128xf32>
    %cst_8 = arith.constant dense<0.000000e+00> : vector<128xf32>
    %8 = vector.multi_reduction <add>, %5, %cst_8 [0] : vector<128x128xf32> to vector<128xf32>
    %9 = vector.shape_cast %8 : vector<128xf32> to vector<1x128xf32>
    %10 = arith.addf %7, %9 : vector<1x128xf32>
    %c0_9 = arith.constant 0 : index
    %c0_10 = arith.constant 0 : index
    %11 = vector.load %arg4[%c0_9, %c0_10] : memref<1x128xf32, #tpu.memory_space<vmem>>, vector<1x128xf32>
    tpu.vector_store %arg4[%c0_9, %c0_10], %10 {strides = array<i32>} : memref<1x128xf32, #tpu.memory_space<vmem>>, vector<1x128xf32>,
    %c0_11 = arith.constant 0 : index
    %c0_12 = arith.constant 0 : index
    %12 = vector.load %arg5[%c0_11, %c0_12] : memref<1x128xf32, #tpu.memory_space<vmem>>, vector<1x128xf32>
    %13 = arith.mulf %5, %5 : vector<128x128xf32>
    %cst_13 = arith.constant dense<0.000000e+00> : vector<128xf32>
    %14 = vector.multi_reduction <add>, %13, %cst_13 [0] : vector<128x128xf32> to vector<128xf32>
    %15 = vector.shape_cast %14 : vector<128xf32> to vector<1x128xf32>
    %16 = arith.addf %12, %15 : vector<1x128xf32>
    %c0_14 = arith.constant 0 : index
    %c0_15 = arith.constant 0 : index
    %17 = vector.load %arg5[%c0_14, %c0_15] : memref<1x128xf32, #tpu.memory_space<vmem>>, vector<1x128xf32>
    tpu.vector_store %arg5[%c0_14, %c0_15], %16 {strides = array<i32>} : memref<1x128xf32, #tpu.memory_space<vmem>>, vector<1x128xf32>,
    return
  }
  func.func @transform_0(%arg0: i32) -> (i32, i32) {
    %c0_i32 = arith.constant 0 : i32
    %c0_i32_0 = arith.constant 0 : i32
    return %arg0, %c0_i32 : i32, i32
  }
  func.func @transform_1(%arg0: i32) -> (i32, i32) {
    %c0_i32 = arith.constant 0 : i32
    %c0_i32_0 = arith.constant 0 : i32
    %c0_i32_1 = arith.constant 0 : i32
    return %c0_i32, %c0_i32_0 : i32, i32
  }
  func.func @transform_2(%arg0: i32) -> (i32, i32) {
    %c0_i32 = arith.constant 0 : i32
    %c0_i32_0 = arith.constant 0 : i32
    return %arg0, %c0_i32 : i32, i32
  }
  func.func @transform_3(%arg0: i32) -> (i32, i32) {
    %c0_i32 = arith.constant 0 : i32
    %c0_i32_0 = arith.constant 0 : i32
    %c0_i32_1 = arith.constant 0 : i32
    return %c0_i32, %c0_i32_0 : i32, i32
  }
  func.func @transform_4(%arg0: i32) -> (i32, i32) {
    %c0_i32 = arith.constant 0 : i32
    %c0_i32_0 = arith.constant 0 : i32
    %c0_i32_1 = arith.constant 0 : i32
    return %c0_i32, %c0_i32_0 : i32, i32
  }
}

module attributes {stable_mosaic.version = 11 : i64} {
  func.func @kernel(%arg0: i32, %arg1: memref<128x128xf32, #tpu.memory_space<vmem>>, %arg2: memref<1x128xf32, #tpu.memory_space<vmem>>, %arg3: memref<1x128xf32, #tpu.memory_space<vmem>>, %arg4: memref<1x128xf32, #tpu.memory_space<vmem>>, %arg5: memref<1x128xf32, #tpu.memory_space<vmem>>, %arg6: memref<128x128xf32, #tpu.memory_space<vmem>>) attributes {dimension_semantics = [#tpu.dimension_semantics<parallel>], iteration_bounds = array<i64: 1>, scalar_prefetch = 0 : i64, scratch_operands = 0 : i64, tpu.core_type = #tpu.core_type<tc>, window_params = [{transform_indices = @transform_0, window_bounds = array<i64: 128, 128>}, {pipeline_mode = #tpu.pipeline_mode<synchronous>, transform_indices = @transform_1, window_bounds = array<i64: 1, 128>}, {pipeline_mode = #tpu.pipeline_mode<synchronous>, transform_indices = @transform_2, window_bounds = array<i64: 1, 128>}, {pipeline_mode = #tpu.pipeline_mode<synchronous>, transform_indices = @transform_3, window_bounds = array<i64: 1, 128>}, {pipeline_mode = #tpu.pipeline_mode<synchronous>, transform_indices = @transform_4, window_bounds = array<i64: 1, 128>}, {transform_indices = @transform_5, window_bounds = array<i64: 128, 128>}]} {
    %c0 = arith.constant 0 : index
    %c0_0 = arith.constant 0 : index
    %0 = vector.load %arg2[%c0, %c0_0] : memref<1x128xf32, #tpu.memory_space<vmem>>, vector<1x128xf32>
    %cst = arith.constant 7.812500e-03 : f32
    %1 = vector.broadcast %cst : f32 to vector<1x128xf32>
    %2 = arith.mulf %0, %1 : vector<1x128xf32>
    %c0_1 = arith.constant 0 : index
    %c0_2 = arith.constant 0 : index
    %3 = vector.load %arg3[%c0_1, %c0_2] : memref<1x128xf32, #tpu.memory_space<vmem>>, vector<1x128xf32>
    %cst_3 = arith.constant 7.812500e-03 : f32
    %4 = vector.broadcast %cst_3 : f32 to vector<1x128xf32>
    %5 = arith.mulf %3, %4 : vector<1x128xf32>
    %6 = arith.mulf %2, %2 : vector<1x128xf32>
    %7 = arith.subf %5, %6 : vector<1x128xf32>
    %cst_4 = arith.constant 9.99999974E-6 : f32
    %8 = vector.broadcast %cst_4 : f32 to vector<1x128xf32>
    %9 = arith.addf %7, %8 : vector<1x128xf32>
    %10 = math.rsqrt %9 : vector<1x128xf32>
    %c0_5 = arith.constant 0 : index
    %c0_6 = arith.constant 0 : index
    %11 = vector.load %arg4[%c0_5, %c0_6] : memref<1x128xf32, #tpu.memory_space<vmem>>, vector<1x128xf32>
    %12 = arith.mulf %10, %11 : vector<1x128xf32>
    %c0_7 = arith.constant 0 : index
    %c0_8 = arith.constant 0 : index
    %13 = vector.load %arg5[%c0_7, %c0_8] : memref<1x128xf32, #tpu.memory_space<vmem>>, vector<1x128xf32>
    %14 = arith.mulf %2, %12 : vector<1x128xf32>
    %15 = arith.subf %13, %14 : vector<1x128xf32>
    %c0_9 = arith.constant 0 : index
    %c0_10 = arith.constant 0 : index
    %16 = vector.load %arg1[%c0_9, %c0_10] : memref<128x128xf32, #tpu.memory_space<vmem>>, vector<128x128xf32>
    %17 = vector.broadcast %12 : vector<1x128xf32> to vector<128x128xf32>
    %18 = arith.mulf %16, %17 : vector<128x128xf32>
    %19 = vector.broadcast %15 : vector<1x128xf32> to vector<128x128xf32>
    %20 = arith.addf %18, %19 : vector<128x128xf32>
    %cst_11 = arith.constant 0.000000e+00 : f32
    %21 = vector.broadcast %cst_11 : f32 to vector<128x128xf32>
    %22 = arith.cmpf ogt, %20, %21 : vector<128x128xf32>
    %cst_12 = arith.constant 2.000000e-01 : f32
    %23 = vector.broadcast %cst_12 : f32 to vector<128x128xf32>
    %24 = arith.mulf %23, %20 : vector<128x128xf32>
    %25 = arith.select %22, %20, %24 : vector<128x128xi1>, vector<128x128xf32>
    %c0_13 = arith.constant 0 : index
    %c0_14 = arith.constant 0 : index
    %26 = vector.load %arg6[%c0_13, %c0_14] : memref<128x128xf32, #tpu.memory_space<vmem>>, vector<128x128xf32>
    tpu.vector_store %arg6[%c0_13, %c0_14], %25 {strides = array<i32>} : memref<128x128xf32, #tpu.memory_space<vmem>>, vector<128x128xf32>,
    return
  }
  func.func @transform_0(%arg0: i32) -> (i32, i32) {
    %c0_i32 = arith.constant 0 : i32
    %c0_i32_0 = arith.constant 0 : i32
    return %arg0, %c0_i32 : i32, i32
  }
  func.func @transform_1(%arg0: i32) -> (i32, i32) {
    %c0_i32 = arith.constant 0 : i32
    %c0_i32_0 = arith.constant 0 : i32
    %c0_i32_1 = arith.constant 0 : i32
    return %c0_i32, %c0_i32_0 : i32, i32
  }
  func.func @transform_2(%arg0: i32) -> (i32, i32) {
    %c0_i32 = arith.constant 0 : i32
    %c0_i32_0 = arith.constant 0 : i32
    %c0_i32_1 = arith.constant 0 : i32
    return %c0_i32, %c0_i32_0 : i32, i32
  }
  func.func @transform_3(%arg0: i32) -> (i32, i32) {
    %c0_i32 = arith.constant 0 : i32
    %c0_i32_0 = arith.constant 0 : i32
    %c0_i32_1 = arith.constant 0 : i32
    return %c0_i32, %c0_i32_0 : i32, i32
  }
  func.func @transform_4(%arg0: i32) -> (i32, i32) {
    %c0_i32 = arith.constant 0 : i32
    %c0_i32_0 = arith.constant 0 : i32
    %c0_i32_1 = arith.constant 0 : i32
    return %c0_i32, %c0_i32_0 : i32, i32
  }
  func.func @transform_5(%arg0: i32) -> (i32, i32) {
    %c0_i32 = arith.constant 0 : i32
    %c0_i32_0 = arith.constant 0 : i32
    return %arg0, %c0_i32 : i32, i32
  }
}

module attributes {stable_mosaic.version = 11 : i64} {
  func.func @_matmul_stats_kernel(%arg0: i32, %arg1: memref<32x512xbf16, #tpu.memory_space<vmem>>, %arg2: memref<512x128xbf16, #tpu.memory_space<vmem>>, %arg3: memref<32x128xf32, #tpu.memory_space<vmem>>, %arg4: memref<1x128xf32, #tpu.memory_space<vmem>>, %arg5: memref<1x128xf32, #tpu.memory_space<vmem>>) attributes {dimension_semantics = [#tpu.dimension_semantics<arbitrary>], iteration_bounds = array<i64: 1>, scalar_prefetch = 0 : i64, scratch_operands = 0 : i64, tpu.core_type = #tpu.core_type<tc>, window_params = [{transform_indices = @transform_0, window_bounds = array<i64: 32, 512>}, {pipeline_mode = #tpu.pipeline_mode<synchronous>, transform_indices = @transform_1, window_bounds = array<i64: 512, 128>}, {transform_indices = @transform_2, window_bounds = array<i64: 32, 128>}, {pipeline_mode = #tpu.pipeline_mode<synchronous>, transform_indices = @transform_3, window_bounds = array<i64: 1, 128>}, {pipeline_mode = #tpu.pipeline_mode<synchronous>, transform_indices = @transform_4, window_bounds = array<i64: 1, 128>}]} {
    %c0_i32 = arith.constant 0 : i32
    %0 = arith.cmpi eq, %arg0, %c0_i32 : i32
    %1 = arith.extui %0 : i1 to i32
    %c0_i32_0 = arith.constant 0 : i32
    %2 = arith.cmpi ne, %1, %c0_i32_0 : i32
    scf.if %2 {
      %cst_16 = arith.constant 0.000000e+00 : f32
      %18 = vector.broadcast %cst_16 : f32 to vector<1x128xf32>
      %c0_17 = arith.constant 0 : index
      %c0_18 = arith.constant 0 : index
      %19 = vector.load %arg4[%c0_17, %c0_18] : memref<1x128xf32, #tpu.memory_space<vmem>>, vector<1x128xf32>
      tpu.vector_store %arg4[%c0_17, %c0_18], %18 {strides = array<i32>} : memref<1x128xf32, #tpu.memory_space<vmem>>, vector<1x128xf32>,
      %cst_19 = arith.constant 0.000000e+00 : f32
      %20 = vector.broadcast %cst_19 : f32 to vector<1x128xf32>
      %c0_20 = arith.constant 0 : index
      %c0_21 = arith.constant 0 : index
      %21 = vector.load %arg5[%c0_20, %c0_21] : memref<1x128xf32, #tpu.memory_space<vmem>>, vector<1x128xf32>
      tpu.vector_store %arg5[%c0_20, %c0_21], %20 {strides = array<i32>} : memref<1x128xf32, #tpu.memory_space<vmem>>, vector<1x128xf32>,
    } else {
    }
    %c0 = arith.constant 0 : index
    %c0_1 = arith.constant 0 : index
    %3 = vector.load %arg1[%c0, %c0_1] : memref<32x512xbf16, #tpu.memory_space<vmem>>, vector<32x512xbf16>
    %c0_2 = arith.constant 0 : index
    %c0_3 = arith.constant 0 : index
    %4 = vector.load %arg2[%c0_2, %c0_3] : memref<512x128xbf16, #tpu.memory_space<vmem>>, vector<512x128xbf16>
    %cst = arith.constant dense<0.000000e+00> : vector<32x128xf32>
    %5 = tpu.matmul %3, %4, %cst {dimension_numbers = #tpu.dot_dimension_numbers<[1], [0], [0], [1], [0, 0, 1, 1], [], []>} : vector<32x512xbf16>, vector<512x128xbf16>, vector<32x128xf32> -> vector<32x128xf32>
    %c0_4 = arith.constant 0 : index
    %c0_5 = arith.constant 0 : index
    %6 = vector.load %arg3[%c0_4, %c0_5] : memref<32x128xf32, #tpu.memory_space<vmem>>, vector<32x128xf32>
    tpu.vector_store %arg3[%c0_4, %c0_5], %5 {strides = array<i32>} : memref<32x128xf32, #tpu.memory_space<vmem>>, vector<32x128xf32>,
    %c0_6 = arith.constant 0 : index
    %c0_7 = arith.constant 0 : index
    %7 = vector.load %arg4[%c0_6, %c0_7] : memref<1x128xf32, #tpu.memory_space<vmem>>, vector<1x128xf32>
    %cst_8 = arith.constant dense<0.000000e+00> : vector<128xf32>
    %8 = vector.multi_reduction <add>, %5, %cst_8 [0] : vector<32x128xf32> to vector<128xf32>
    %9 = vector.shape_cast %8 : vector<128xf32> to vector<1x128xf32>
    %10 = arith.addf %7, %9 : vector<1x128xf32>
    %c0_9 = arith.constant 0 : index
    %c0_10 = arith.constant 0 : index
    %11 = vector.load %arg4[%c0_9, %c0_10] : memref<1x128xf32, #tpu.memory_space<vmem>>, vector<1x128xf32>
    tpu.vector_store %arg4[%c0_9, %c0_10], %10 {strides = array<i32>} : memref<1x128xf32, #tpu.memory_space<vmem>>, vector<1x128xf32>,
    %c0_11 = arith.constant 0 : index
    %c0_12 = arith.constant 0 : index
    %12 = vector.load %arg5[%c0_11, %c0_12] : memref<1x128xf32, #tpu.memory_space<vmem>>, vector<1x128xf32>
    %13 = arith.mulf %5, %5 : vector<32x128xf32>
    %cst_13 = arith.constant dense<0.000000e+00> : vector<128xf32>
    %14 = vector.multi_reduction <add>, %13, %cst_13 [0] : vector<32x128xf32> to vector<128xf32>
    %15 = vector.shape_cast %14 : vector<128xf32> to vector<1x128xf32>
    %16 = arith.addf %12, %15 : vector<1x128xf32>
    %c0_14 = arith.constant 0 : index
    %c0_15 = arith.constant 0 : index
    %17 = vector.load %arg5[%c0_14, %c0_15] : memref<1x128xf32, #tpu.memory_space<vmem>>, vector<1x128xf32>
    tpu.vector_store %arg5[%c0_14, %c0_15], %16 {strides = array<i32>} : memref<1x128xf32, #tpu.memory_space<vmem>>, vector<1x128xf32>,
    return
  }
  func.func @transform_0(%arg0: i32) -> (i32, i32) {
    %c0_i32 = arith.constant 0 : i32
    %c0_i32_0 = arith.constant 0 : i32
    return %arg0, %c0_i32 : i32, i32
  }
  func.func @transform_1(%arg0: i32) -> (i32, i32) {
    %c0_i32 = arith.constant 0 : i32
    %c0_i32_0 = arith.constant 0 : i32
    %c0_i32_1 = arith.constant 0 : i32
    return %c0_i32, %c0_i32_0 : i32, i32
  }
  func.func @transform_2(%arg0: i32) -> (i32, i32) {
    %c0_i32 = arith.constant 0 : i32
    %c0_i32_0 = arith.constant 0 : i32
    return %arg0, %c0_i32 : i32, i32
  }
  func.func @transform_3(%arg0: i32) -> (i32, i32) {
    %c0_i32 = arith.constant 0 : i32
    %c0_i32_0 = arith.constant 0 : i32
    %c0_i32_1 = arith.constant 0 : i32
    return %c0_i32, %c0_i32_0 : i32, i32
  }
  func.func @transform_4(%arg0: i32) -> (i32, i32) {
    %c0_i32 = arith.constant 0 : i32
    %c0_i32_0 = arith.constant 0 : i32
    %c0_i32_1 = arith.constant 0 : i32
    return %c0_i32, %c0_i32_0 : i32, i32
  }
}

module attributes {stable_mosaic.version = 11 : i64} {
  func.func @kernel(%arg0: i32, %arg1: memref<32x128xf32, #tpu.memory_space<vmem>>, %arg2: memref<1x128xf32, #tpu.memory_space<vmem>>, %arg3: memref<1x128xf32, #tpu.memory_space<vmem>>, %arg4: memref<1x128xf32, #tpu.memory_space<vmem>>, %arg5: memref<1x128xf32, #tpu.memory_space<vmem>>, %arg6: memref<32x128xf32, #tpu.memory_space<vmem>>) attributes {dimension_semantics = [#tpu.dimension_semantics<parallel>], iteration_bounds = array<i64: 1>, scalar_prefetch = 0 : i64, scratch_operands = 0 : i64, tpu.core_type = #tpu.core_type<tc>, window_params = [{transform_indices = @transform_0, window_bounds = array<i64: 32, 128>}, {pipeline_mode = #tpu.pipeline_mode<synchronous>, transform_indices = @transform_1, window_bounds = array<i64: 1, 128>}, {pipeline_mode = #tpu.pipeline_mode<synchronous>, transform_indices = @transform_2, window_bounds = array<i64: 1, 128>}, {pipeline_mode = #tpu.pipeline_mode<synchronous>, transform_indices = @transform_3, window_bounds = array<i64: 1, 128>}, {pipeline_mode = #tpu.pipeline_mode<synchronous>, transform_indices = @transform_4, window_bounds = array<i64: 1, 128>}, {transform_indices = @transform_5, window_bounds = array<i64: 32, 128>}]} {
    %c0 = arith.constant 0 : index
    %c0_0 = arith.constant 0 : index
    %0 = vector.load %arg2[%c0, %c0_0] : memref<1x128xf32, #tpu.memory_space<vmem>>, vector<1x128xf32>
    %cst = arith.constant 3.125000e-02 : f32
    %1 = vector.broadcast %cst : f32 to vector<1x128xf32>
    %2 = arith.mulf %0, %1 : vector<1x128xf32>
    %c0_1 = arith.constant 0 : index
    %c0_2 = arith.constant 0 : index
    %3 = vector.load %arg3[%c0_1, %c0_2] : memref<1x128xf32, #tpu.memory_space<vmem>>, vector<1x128xf32>
    %cst_3 = arith.constant 3.125000e-02 : f32
    %4 = vector.broadcast %cst_3 : f32 to vector<1x128xf32>
    %5 = arith.mulf %3, %4 : vector<1x128xf32>
    %6 = arith.mulf %2, %2 : vector<1x128xf32>
    %7 = arith.subf %5, %6 : vector<1x128xf32>
    %cst_4 = arith.constant 9.99999974E-6 : f32
    %8 = vector.broadcast %cst_4 : f32 to vector<1x128xf32>
    %9 = arith.addf %7, %8 : vector<1x128xf32>
    %10 = math.rsqrt %9 : vector<1x128xf32>
    %c0_5 = arith.constant 0 : index
    %c0_6 = arith.constant 0 : index
    %11 = vector.load %arg4[%c0_5, %c0_6] : memref<1x128xf32, #tpu.memory_space<vmem>>, vector<1x128xf32>
    %12 = arith.mulf %10, %11 : vector<1x128xf32>
    %c0_7 = arith.constant 0 : index
    %c0_8 = arith.constant 0 : index
    %13 = vector.load %arg5[%c0_7, %c0_8] : memref<1x128xf32, #tpu.memory_space<vmem>>, vector<1x128xf32>
    %14 = arith.mulf %2, %12 : vector<1x128xf32>
    %15 = arith.subf %13, %14 : vector<1x128xf32>
    %c0_9 = arith.constant 0 : index
    %c0_10 = arith.constant 0 : index
    %16 = vector.load %arg1[%c0_9, %c0_10] : memref<32x128xf32, #tpu.memory_space<vmem>>, vector<32x128xf32>
    %17 = vector.broadcast %12 : vector<1x128xf32> to vector<32x128xf32>
    %18 = arith.mulf %16, %17 : vector<32x128xf32>
    %19 = vector.broadcast %15 : vector<1x128xf32> to vector<32x128xf32>
    %20 = arith.addf %18, %19 : vector<32x128xf32>
    %cst_11 = arith.constant 0.000000e+00 : f32
    %21 = vector.broadcast %cst_11 : f32 to vector<32x128xf32>
    %22 = arith.cmpf ogt, %20, %21 : vector<32x128xf32>
    %cst_12 = arith.constant 2.000000e-01 : f32
    %23 = vector.broadcast %cst_12 : f32 to vector<32x128xf32>
    %24 = arith.mulf %23, %20 : vector<32x128xf32>
    %25 = arith.select %22, %20, %24 : vector<32x128xi1>, vector<32x128xf32>
    %c0_13 = arith.constant 0 : index
    %c0_14 = arith.constant 0 : index
    %26 = vector.load %arg6[%c0_13, %c0_14] : memref<32x128xf32, #tpu.memory_space<vmem>>, vector<32x128xf32>
    tpu.vector_store %arg6[%c0_13, %c0_14], %25 {strides = array<i32>} : memref<32x128xf32, #tpu.memory_space<vmem>>, vector<32x128xf32>,
    return
  }
  func.func @transform_0(%arg0: i32) -> (i32, i32) {
    %c0_i32 = arith.constant 0 : i32
    %c0_i32_0 = arith.constant 0 : i32
    return %arg0, %c0_i32 : i32, i32
  }
  func.func @transform_1(%arg0: i32) -> (i32, i32) {
    %c0_i32 = arith.constant 0 : i32
    %c0_i32_0 = arith.constant 0 : i32
    %c0_i32_1 = arith.constant 0 : i32
    return %c0_i32, %c0_i32_0 : i32, i32
  }
  func.func @transform_2(%arg0: i32) -> (i32, i32) {
    %c0_i32 = arith.constant 0 : i32
    %c0_i32_0 = arith.constant 0 : i32
    %c0_i32_1 = arith.constant 0 : i32
    return %c0_i32, %c0_i32_0 : i32, i32
  }
  func.func @transform_3(%arg0: i32) -> (i32, i32) {
    %c0_i32 = arith.constant 0 : i32
    %c0_i32_0 = arith.constant 0 : i32
    %c0_i32_1 = arith.constant 0 : i32
    return %c0_i32, %c0_i32_0 : i32, i32
  }
  func.func @transform_4(%arg0: i32) -> (i32, i32) {
    %c0_i32 = arith.constant 0 : i32
    %c0_i32_0 = arith.constant 0 : i32
    %c0_i32_1 = arith.constant 0 : i32
    return %c0_i32, %c0_i32_0 : i32, i32
  }
  func.func @transform_5(%arg0: i32) -> (i32, i32) {
    %c0_i32 = arith.constant 0 : i32
    %c0_i32_0 = arith.constant 0 : i32
    return %arg0, %c0_i32 : i32, i32
  }
}

module attributes {stable_mosaic.version = 11 : i64} {
  func.func @kernel(%arg0: i32, %arg1: memref<8x1024xbf16, #tpu.memory_space<vmem>>, %arg2: memref<1024x128xbf16, #tpu.memory_space<vmem>>, %arg3: memref<8x128xf32, #tpu.memory_space<vmem>>) attributes {dimension_semantics = [#tpu.dimension_semantics<parallel>], iteration_bounds = array<i64: 1>, scalar_prefetch = 0 : i64, scratch_operands = 0 : i64, tpu.core_type = #tpu.core_type<tc>, window_params = [{transform_indices = @transform_0, window_bounds = array<i64: 8, 1024>}, {pipeline_mode = #tpu.pipeline_mode<synchronous>, transform_indices = @transform_1, window_bounds = array<i64: 1024, 128>}, {transform_indices = @transform_2, window_bounds = array<i64: 8, 128>}]} {
    %c0 = arith.constant 0 : index
    %c0_0 = arith.constant 0 : index
    %0 = vector.load %arg1[%c0, %c0_0] : memref<8x1024xbf16, #tpu.memory_space<vmem>>, vector<8x1024xbf16>
    %c0_1 = arith.constant 0 : index
    %c0_2 = arith.constant 0 : index
    %1 = vector.load %arg2[%c0_1, %c0_2] : memref<1024x128xbf16, #tpu.memory_space<vmem>>, vector<1024x128xbf16>
    %cst = arith.constant dense<0.000000e+00> : vector<8x128xf32>
    %2 = tpu.matmul %0, %1, %cst {dimension_numbers = #tpu.dot_dimension_numbers<[1], [0], [0], [1], [0, 0, 1, 1], [], []>} : vector<8x1024xbf16>, vector<1024x128xbf16>, vector<8x128xf32> -> vector<8x128xf32>
    %3 = arith.negf %2 : vector<8x128xf32>
    %4 = math.exp %3 : vector<8x128xf32>
    %cst_3 = arith.constant 1.000000e+00 : f32
    %5 = vector.broadcast %cst_3 : f32 to vector<8x128xf32>
    %6 = arith.addf %5, %4 : vector<8x128xf32>
    %7 = arith.divf %5, %6 : vector<8x128xf32>
    %c0_4 = arith.constant 0 : index
    %c0_5 = arith.constant 0 : index
    %8 = vector.load %arg3[%c0_4, %c0_5] : memref<8x128xf32, #tpu.memory_space<vmem>>, vector<8x128xf32>
    tpu.vector_store %arg3[%c0_4, %c0_5], %7 {strides = array<i32>} : memref<8x128xf32, #tpu.memory_space<vmem>>, vector<8x128xf32>,
    return
  }
  func.func @transform_0(%arg0: i32) -> (i32, i32) {
    %c0_i32 = arith.constant 0 : i32
    %c0_i32_0 = arith.constant 0 : i32
    return %arg0, %c0_i32 : i32, i32
  }
  func.func @transform_1(%arg0: i32) -> (i32, i32) {
    %c0_i32 = arith.constant 0 : i32
    %c0_i32_0 = arith.constant 0 : i32
    %c0_i32_1 = arith.constant 0 : i32
    return %c0_i32, %c0_i32_0 : i32, i32
  }
  func.func @transform_2(%arg0: i32) -> (i32, i32) {
    %c0_i32 = arith.constant 0 : i32
    %c0_i32_0 = arith.constant 0 : i32
    return %arg0, %c0_i32 : i32, i32
  }
}

</mosaic_0001>

<bundles_post_ra>
// kernel: discriminator_forward.8
= control target key start
LH: loop header
LB: loop body
LE: loop exit
PB: predicated region body
PF: predicated region fallthrough
CT: control target
= control target key end

     0   :  { %s1214_s9 = smov 0   ;;  %s1359_s0 = inlined_call_operand.vmem [shape: bf16[2048,128], index: 0, kind: input, shape index: {}]   ;;  %s1360_s1 = inlined_call_operand.vmem [shape: bf16[128,128], index: 1, kind: input, shape index: {}]   ;;  %s1361_s2 = inlined_call_operand.vmem [shape: f32[2048,128], index: 2, kind: output, shape index: {}]  }
   0x1 LB: > { %s948_s10 = sadd.s32 4294967295, %s1197_s9   ;;  %p952_p0 = scmp.ge.s32.totalorder %s1197_s9, 1  ;;  %s1197_s9 = sphi %s1214_s9, %s12_s9  }
   0x2   : > { %p113_p1 = scmp.lt.s32.totalorder %s1197_s9, 5 }
   0x4   : > { %p114_p2 = pnand %p952_p0, %p113_p1 }
   0x5   : > { %s953_s19 = sshll.u32 (!%p114_p2), %s948_s10, 6 }
   0x6   : > { %117 = sbr.rel (%p114_p2) target bundleno = 301 (0x12d), region = 28  ;;  %p136_p3 = scmp.lt.s32.totalorder (!%p114_p2), %s953_s19, 255 }
   0xb   : > { %v1158_v0 = vld [vmem:[%s1360_s1 + $0x38] sm:$0xff]  ;;  %v1157_v1 = vld [vmem:[%s1360_s1 + $0x30] sm:$0xff]  ;;  %v1156_v2 = vld [vmem:[%s1360_s1 + $0x28] sm:$0xff]  ;;  %s1363_s19 = smov (!%p136_p3, %s953_s19), 255 }
   0xc   : > { %467 = vmatpush.bf16.msra.mxu0 %v1158_v0  ;;  %1159 = vmatpush.bf16.msra.mxu1 %v1158_v0  ;;  %v1155_v3 = vld [vmem:[%s1360_s1 + $0x20] sm:$0xff]  ;;  %v1154_v4 = vld [vmem:[%s1360_s1 + $0x18] sm:$0xff]  ;;  %v1153_v5 = vld [vmem:[%s1360_s1 + $0x10] sm:$0xff]  ;;  %s954_s26 = sshll.u32 %s1363_s19, 2  ;;  %s956_s4 = sshll.u32 %s1363_s19, 3 }
   0xd   : > { %1160 = vmatpush.bf16.msra.mxu2 %v1158_v0  ;;  %1161 = vmatpush.bf16.msra.mxu3 %v1158_v0  ;;  %v1152_v6 = vld [vmem:[%s1360_s1 + $0x8] sm:$0xff]  ;;  %v1151_v7 = vld [vmem:[%s1360_s1] sm:$0xff]  ;;  %s1252_s3 = scalar_lea.vmem %s1359_s0, %s954_s26  ;;  %s1290_s7 = scalar_lea.vmem %s1361_s2, %s956_s4 }
   0xe   : > { %v1119_v8 = vld [vmem:[%s1252_s3] sm:$0xff]  ;;  %v1120_v12 = vld [vmem:[%s1252_s3 + $0x8] sm:$0xff]  ;;  %v1121_v16 = vld [vmem:[%s1252_s3 + $0x10] sm:$0xff] }
   0xf   : > { %v1127_v9 = vld [vmem:[%s1252_s3 + $0x40] sm:$0xff]  ;;  %v1128_v13 = vld [vmem:[%s1252_s3 + $0x48] sm:$0xff]  ;;  %v1129_v17 = vld [vmem:[%s1252_s3 + $0x50] sm:$0xff] }
  0x10   : > { %468 = vmatpush.bf16.msra.mxu0 %v1157_v1  ;;  %1162 = vmatpush.bf16.msra.mxu1 %v1157_v1  ;;  %v1135_v10 = vld [vmem:[%s1252_s3 + $0x80] sm:$0xff]  ;;  %v1136_v14 = vld [vmem:[%s1252_s3 + $0x88] sm:$0xff]  ;;  %v1137_v18 = vld [vmem:[%s1252_s3 + $0x90] sm:$0xff] }
  0x11   : > { %1163 = vmatpush.bf16.msra.mxu2 %v1157_v1  ;;  %1164 = vmatpush.bf16.msra.mxu3 %v1157_v1  ;;  %v1143_v11 = vld [vmem:[%s1252_s3 + $0xc0] sm:$0xff]  ;;  %v1144_v15 = vld [vmem:[%s1252_s3 + $0xc8] sm:$0xff]  ;;  %v1145_v19 = vld [vmem:[%s1252_s3 + $0xd0] sm:$0xff] }
  0x12   : > { %v1122_v20 = vld [vmem:[%s1252_s3 + $0x18] sm:$0xff]  ;;  %v1123_v24 = vld [vmem:[%s1252_s3 + $0x20] sm:$0xff]  ;;  %v1124_v28 = vld [vmem:[%s1252_s3 + $0x28] sm:$0xff] }
  0x13   : > { %v1130_v21 = vld [vmem:[%s1252_s3 + $0x58] sm:$0xff]  ;;  %v1131_v25 = vld [vmem:[%s1252_s3 + $0x60] sm:$0xff]  ;;  %v1132_v29 = vld [vmem:[%s1252_s3 + $0x68] sm:$0xff] }
  0x14   : > { %469 = vmatpush.bf16.msra.mxu0 %v1156_v2  ;;  %1165 = vmatpush.bf16.msra.mxu1 %v1156_v2  ;;  %v1138_v22 = vld [vmem:[%s1252_s3 + $0x98] sm:$0xff]  ;;  %v1139_v26 = vld [vmem:[%s1252_s3 + $0xa0] sm:$0xff]  ;;  %v1140_v30 = vld [vmem:[%s1252_s3 + $0xa8] sm:$0xff] }
  0x15   : > { %1166 = vmatpush.bf16.msra.mxu2 %v1156_v2  ;;  %1167 = vmatpush.bf16.msra.mxu3 %v1156_v2  ;;  %v1146_v23 = vld [vmem:[%s1252_s3 + $0xd8] sm:$0xff]  ;;  %v1147_v27 = vld [vmem:[%s1252_s3 + $0xe0] sm:$0xff]  ;;  %v1148_v31 = vld [vmem:[%s1252_s3 + $0xe8] sm:$0xff] }
  0x16   : > { %v1125_v32 = vld [vmem:[%s1252_s3 + $0x30] sm:$0xff]  ;;  %v1126_v36 = vld [vmem:[%s1252_s3 + $0x38] sm:$0xff] }
  0x17   : > { %v1133_v33 = vld [vmem:[%s1252_s3 + $0x70] sm:$0xff]  ;;  %v1134_v37 = vld [vmem:[%s1252_s3 + $0x78] sm:$0xff] }
  0x18   : > { %470 = vmatpush.bf16.msra.mxu0 %v1155_v3  ;;  %1168 = vmatpush.bf16.msra.mxu1 %v1155_v3  ;;  %v1141_v34 = vld [vmem:[%s1252_s3 + $0xb0] sm:$0xff]  ;;  %v1142_v38 = vld [vmem:[%s1252_s3 + $0xb8] sm:$0xff] }
  0x19   : > { %1169 = vmatpush.bf16.msra.mxu2 %v1155_v3  ;;  %1170 = vmatpush.bf16.msra.mxu3 %v1155_v3  ;;  %v1149_v35 = vld [vmem:[%s1252_s3 + $0xf0] sm:$0xff]  ;;  %v1150_v39 = vld [vmem:[%s1252_s3 + $0xf8] sm:$0xff] }
  0x1c   : > { %471 = vmatpush.bf16.msra.mxu0 %v1154_v4  ;;  %1171 = vmatpush.bf16.msra.mxu1 %v1154_v4 }
  0x1d   : > { %1172 = vmatpush.bf16.msra.mxu2 %v1154_v4  ;;  %1173 = vmatpush.bf16.msra.mxu3 %v1154_v4 }
  0x20   : > { %472 = vmatpush.bf16.msra.mxu0 %v1153_v5  ;;  %1174 = vmatpush.bf16.msra.mxu1 %v1153_v5 }
  0x21   : > { %1175 = vmatpush.bf16.msra.mxu2 %v1153_v5  ;;  %1176 = vmatpush.bf16.msra.mxu3 %v1153_v5 }
  0x24   : > { %473 = vmatpush.bf16.msra.mxu0 %v1152_v6  ;;  %1177 = vmatpush.bf16.msra.mxu1 %v1152_v6 }
  0x25   : > { %1178 = vmatpush.bf16.msra.mxu2 %v1152_v6  ;;  %1179 = vmatpush.bf16.msra.mxu3 %v1152_v6 }
  0x28   : > { %474 = vmatpush.bf16.msra.mxu0 %v1151_v7  ;;  %1180 = vmatpush.bf16.msra.mxu1 %v1151_v7 }
  0x29   : > { %1181 = vmatpush.bf16.msra.mxu2 %v1151_v7  ;;  %1182 = vmatpush.bf16.msra.mxu3 %v1151_v7 }
  0x2b   : > { %475 = vmatmul.bf16.vlgmr.msra.gmra.mxu0 %v1119_v8  ;;  %515 = vmatmul.bf16.vlgmr.msra.gmra.mxu1 %v1127_v9 }
  0x2c   : > { %555 = vmatmul.bf16.vlgmr.msra.gmra.mxu2 %v1135_v10  ;;  %595 = vmatmul.bf16.vlgmr.msra.gmra.mxu3 %v1143_v11 }
  0x3b   : > { %480 = vmatmul.bf16.gmra.mxu0 %v1120_v12  ;;  %520 = vmatmul.bf16.gmra.mxu1 %v1128_v13 }
  0x3c   : > { %560 = vmatmul.bf16.gmra.mxu2 %v1136_v14  ;;  %600 = vmatmul.bf16.gmra.mxu3 %v1144_v15 }
  0x4b   : > { %485 = vmatmul.bf16.gmra.mxu0 %v1121_v16  ;;  %525 = vmatmul.bf16.gmra.mxu1 %v1129_v17 }
  0x4c   : > { %565 = vmatmul.bf16.gmra.mxu2 %v1137_v18  ;;  %605 = vmatmul.bf16.gmra.mxu3 %v1145_v19 }
  0x5b   : > { %490 = vmatmul.bf16.gmra.mxu0 %v1122_v20  ;;  %530 = vmatmul.bf16.gmra.mxu1 %v1130_v21 }
  0x5c   : > { %570 = vmatmul.bf16.gmra.mxu2 %v1138_v22  ;;  %610 = vmatmul.bf16.gmra.mxu3 %v1146_v23 }
  0x6b   : > { %495 = vmatmul.bf16.gmra.mxu0 %v1123_v24  ;;  %535 = vmatmul.bf16.gmra.mxu1 %v1131_v25 }
  0x6c   : > { %575 = vmatmul.bf16.gmra.mxu2 %v1139_v26  ;;  %615 = vmatmul.bf16.gmra.mxu3 %v1147_v27 }
  0x7b   : > { %500 = vmatmul.bf16.gmra.mxu0 %v1124_v28  ;;  %540 = vmatmul.bf16.gmra.mxu1 %v1132_v29 }
  0x7c   : > { %580 = vmatmul.bf16.gmra.mxu2 %v1140_v30  ;;  %620 = vmatmul.bf16.gmra.mxu3 %v1148_v31 }
  0x8b   : > { %505 = vmatmul.bf16.gmra.mxu0 %v1125_v32  ;;  %545 = vmatmul.bf16.gmra.mxu1 %v1133_v33 }
  0x8c   : > { %585 = vmatmul.bf16.gmra.mxu2 %v1141_v34  ;;  %625 = vmatmul.bf16.gmra.mxu3 %v1149_v35 }
  0x9b   : > { %510 = vmatmul.bf16.gmra.mxu0 %v1126_v36  ;;  %550 = vmatmul.bf16.gmra.mxu1 %v1134_v37 }
  0x9c   : > { %590 = vmatmul.bf16.gmra.mxu2 %v1142_v38  ;;  %630 = vmatmul.bf16.gmra.mxu3 %v1150_v39 }
  0xa8   : > { %v476_v40 = vpop.f32.mrf.mxu0  ;;  %v516_v41 = vpop.f32.mrf.mxu1 }
  0xa9   : > { %vm636_vm0 = vcmp.gt.f32.partialorder %v476_v40, 0.0  ;;  %v700_v42 = vmul.f32 0.2, %v476_v40  ;;  %vm652_vm1 = vcmp.gt.f32.partialorder %v516_v41, 0.0  ;;  %v716_v43 = vmul.f32 0.2, %v516_v41 }
  0xab   : > { %v764_v44 = vsel %vm636_vm0, %v476_v40, %v700_v42  ;;  %v780_v45 = vsel %vm652_vm1, %v516_v41, %v716_v43 }
  0xac   : > { %828 = vst [vmem:[%s1290_s7] sm:$0xff] %v764_v44 }
  0xad   : > { %844 = vst [vmem:[%s1290_s7 + $0x80] sm:$0xff] %v780_v45 }
  0xaf   : > { %v556_v46 = vpop.f32.mrf.mxu2  ;;  %v596_v47 = vpop.f32.mrf.mxu3 }
  0xb0   : > { %vm668_vm2 = vcmp.gt.f32.partialorder %v556_v46, 0.0  ;;  %v732_v48 = vmul.f32 0.2, %v556_v46  ;;  %vm684_vm3 = vcmp.gt.f32.partialorder %v596_v47, 0.0  ;;  %v748_v49 = vmul.f32 0.2, %v596_v47  ;;  %v478_v50 = vpop.f32.mrf.mxu0  ;;  %v518_v51 = vpop.f32.mrf.mxu1 }
  0xb1   : > { %vm637_vm4 = vcmp.gt.f32.partialorder %v478_v50, 0.0  ;;  %v701_v52 = vmul.f32 0.2, %v478_v50  ;;  %vm653_vm5 = vcmp.gt.f32.partialorder %v518_v51, 0.0  ;;  %v717_v53 = vmul.f32 0.2, %v518_v51 }
  0xb2   : > { %v796_v54 = vsel %vm668_vm2, %v556_v46, %v732_v48  ;;  %v812_v55 = vsel %vm684_vm3, %v596_v47, %v748_v49 }
  0xb3   : > { %860 = vst [vmem:[%s1290_s7 + $0x100] sm:$0xff] %v796_v54  ;;  %v765_v56 = vsel %vm637_vm4, %v478_v50, %v701_v52  ;;  %v781_v57 = vsel %vm653_vm5, %v518_v51, %v717_v53 }
  0xb4   : > { %876 = vst [vmem:[%s1290_s7 + $0x180] sm:$0xff] %v812_v55 }
  0xb5   : > { %829 = vst [vmem:[%s1290_s7 + $0x8] sm:$0xff] %v765_v56 }
  0xb6   : > { %845 = vst [vmem:[%s1290_s7 + $0x88] sm:$0xff] %v781_v57 }
  0xb7   : > { %v558_v58 = vpop.f32.mrf.mxu2  ;;  %v598_v59 = vpop.f32.mrf.mxu3 }
  0xb8   : > { %vm669_vm6 = vcmp.gt.f32.partialorder %v558_v58, 0.0  ;;  %v733_v60 = vmul.f32 0.2, %v558_v58  ;;  %vm685_vm7 = vcmp.gt.f32.partialorder %v598_v59, 0.0  ;;  %v749_v61 = vmul.f32 0.2, %v598_v59  ;;  %v481_v62 = vpop.f32.mrf.mxu0  ;;  %v521_v63 = vpop.f32.mrf.mxu1 }
  0xb9   : > { %vm638_vm8 = vcmp.gt.f32.partialorder %v481_v62, 0.0  ;;  %v702_v0 = vmul.f32 0.2, %v481_v62  ;;  %vm654_vm9 = vcmp.gt.f32.partialorder %v521_v63, 0.0  ;;  %v718_v1 = vmul.f32 0.2, %v521_v63 }
  0xba   : > { %v797_v2 = vsel %vm669_vm6, %v558_v58, %v733_v60  ;;  %v813_v3 = vsel %vm685_vm7, %v598_v59, %v749_v61 }
  0xbb   : > { %861 = vst [vmem:[%s1290_s7 + $0x108] sm:$0xff] %v797_v2  ;;  %v766_v4 = vsel %vm638_vm8, %v481_v62, %v702_v0  ;;  %v782_v5 = vsel %vm654_vm9, %v521_v63, %v718_v1 }
  0xbc   : > { %877 = vst [vmem:[%s1290_s7 + $0x188] sm:$0xff] %v813_v3 }
  0xbd   : > { %830 = vst [vmem:[%s1290_s7 + $0x10] sm:$0xff] %v766_v4 }
  0xbe   : > { %846 = vst [vmem:[%s1290_s7 + $0x90] sm:$0xff] %v782_v5 }
  0xbf   : > { %v561_v6 = vpop.f32.mrf.mxu2  ;;  %v601_v7 = vpop.f32.mrf.mxu3 }
  0xc0   : > { %vm670_vm10 = vcmp.gt.f32.partialorder %v561_v6, 0.0  ;;  %v734_v8 = vmul.f32 0.2, %v561_v6  ;;  %vm686_vm11 = vcmp.gt.f32.partialorder %v601_v7, 0.0  ;;  %v750_v9 = vmul.f32 0.2, %v601_v7  ;;  %v483_v10 = vpop.f32.mrf.mxu0  ;;  %v523_v11 = vpop.f32.mrf.mxu1 }
  0xc1   : > { %vm639_vm12 = vcmp.gt.f32.partialorder %v483_v10, 0.0  ;;  %v703_v12 = vmul.f32 0.2, %v483_v10  ;;  %vm655_vm13 = vcmp.gt.f32.partialorder %v523_v11, 0.0  ;;  %v719_v13 = vmul.f32 0.2, %v523_v11 }
  0xc2   : > { %v798_v14 = vsel %vm670_vm10, %v561_v6, %v734_v8  ;;  %v814_v15 = vsel %vm686_vm11, %v601_v7, %v750_v9 }
  0xc3   : > { %862 = vst [vmem:[%s1290_s7 + $0x110] sm:$0xff] %v798_v14  ;;  %v767_v16 = vsel %vm639_vm12, %v483_v10, %v703_v12  ;;  %v783_v17 = vsel %vm655_vm13, %v523_v11, %v719_v13 }
  0xc4   : > { %878 = vst [vmem:[%s1290_s7 + $0x190] sm:$0xff] %v814_v15 }
  0xc5   : > { %831 = vst [vmem:[%s1290_s7 + $0x18] sm:$0xff] %v767_v16 }
  0xc6   : > { %847 = vst [vmem:[%s1290_s7 + $0x98] sm:$0xff] %v783_v17 }
  0xc7   : > { %v563_v18 = vpop.f32.mrf.mxu2  ;;  %v603_v19 = vpop.f32.mrf.mxu3 }
  0xc8   : > { %vm671_vm14 = vcmp.gt.f32.partialorder %v563_v18, 0.0  ;;  %v735_v20 = vmul.f32 0.2, %v563_v18  ;;  %vm687_vm15 = vcmp.gt.f32.partialorder %v603_v19, 0.0  ;;  %v751_v21 = vmul.f32 0.2, %v603_v19  ;;  %v486_v22 = vpop.f32.mrf.mxu0  ;;  %v526_v23 = vpop.f32.mrf.mxu1 }
  0xc9   : > { %vm640_vm0 = vcmp.gt.f32.partialorder %v486_v22, 0.0  ;;  %v704_v24 = vmul.f32 0.2, %v486_v22  ;;  %vm656_vm1 = vcmp.gt.f32.partialorder %v526_v23, 0.0  ;;  %v720_v25 = vmul.f32 0.2, %v526_v23 }
  0xca   : > { %v799_v26 = vsel %vm671_vm14, %v563_v18, %v735_v20  ;;  %v815_v27 = vsel %vm687_vm15, %v603_v19, %v751_v21 }
  0xcb   : > { %863 = vst [vmem:[%s1290_s7 + $0x118] sm:$0xff] %v799_v26  ;;  %v768_v28 = vsel %vm640_vm0, %v486_v22, %v704_v24  ;;  %v784_v29 = vsel %vm656_vm1, %v526_v23, %v720_v25 }
  0xcc   : > { %879 = vst [vmem:[%s1290_s7 + $0x198] sm:$0xff] %v815_v27 }
  0xcd   : > { %832 = vst [vmem:[%s1290_s7 + $0x20] sm:$0xff] %v768_v28 }
  0xce   : > { %848 = vst [vmem:[%s1290_s7 + $0xa0] sm:$0xff] %v784_v29 }
  0xcf   : > { %v566_v30 = vpop.f32.mrf.mxu2  ;;  %v606_v31 = vpop.f32.mrf.mxu3 }
  0xd0   : > { %vm672_vm2 = vcmp.gt.f32.partialorder %v566_v30, 0.0  ;;  %v736_v32 = vmul.f32 0.2, %v566_v30  ;;  %vm688_vm3 = vcmp.gt.f32.partialorder %v606_v31, 0.0  ;;  %v752_v33 = vmul.f32 0.2, %v606_v31  ;;  %v488_v34 = vpop.f32.mrf.mxu0  ;;  %v528_v35 = vpop.f32.mrf.mxu1 }
  0xd1   : > { %vm641_vm4 = vcmp.gt.f32.partialorder %v488_v34, 0.0  ;;  %v705_v36 = vmul.f32 0.2, %v488_v34  ;;  %vm657_vm5 = vcmp.gt.f32.partialorder %v528_v35, 0.0  ;;  %v721_v37 = vmul.f32 0.2, %v528_v35 }
  0xd2   : > { %v800_v38 = vsel %vm672_vm2, %v566_v30, %v736_v32  ;;  %v816_v39 = vsel %vm688_vm3, %v606_v31, %v752_v33 }
  0xd3   : > { %864 = vst [vmem:[%s1290_s7 + $0x120] sm:$0xff] %v800_v38  ;;  %v769_v40 = vsel %vm641_vm4, %v488_v34, %v705_v36  ;;  %v785_v41 = vsel %vm657_vm5, %v528_v35, %v721_v37 }
  0xd4   : > { %880 = vst [vmem:[%s1290_s7 + $0x1a0] sm:$0xff] %v816_v39 }
  0xd5   : > { %833 = vst [vmem:[%s1290_s7 + $0x28] sm:$0xff] %v769_v40 }
  0xd6   : > { %849 = vst [vmem:[%s1290_s7 + $0xa8] sm:$0xff] %v785_v41 }
  0xd7   : > { %v568_v42 = vpop.f32.mrf.mxu2  ;;  %v608_v43 = vpop.f32.mrf.mxu3 }
  0xd8   : > { %vm673_vm6 = vcmp.gt.f32.partialorder %v568_v42, 0.0  ;;  %v737_v44 = vmul.f32 0.2, %v568_v42  ;;  %vm689_vm7 = vcmp.gt.f32.partialorder %v608_v43, 0.0  ;;  %v753_v45 = vmul.f32 0.2, %v608_v43  ;;  %v491_v46 = vpop.f32.mrf.mxu0  ;;  %v531_v47 = vpop.f32.mrf.mxu1 }
  0xd9   : > { %vm642_vm8 = vcmp.gt.f32.partialorder %v491_v46, 0.0  ;;  %v706_v48 = vmul.f32 0.2, %v491_v46  ;;  %vm658_vm9 = vcmp.gt.f32.partialorder %v531_v47, 0.0  ;;  %v722_v49 = vmul.f32 0.2, %v531_v47 }
  0xda   : > { %v801_v50 = vsel %vm673_vm6, %v568_v42, %v737_v44  ;;  %v817_v51 = vsel %vm689_vm7, %v608_v43, %v753_v45 }
  0xdb   : > { %865 = vst [vmem:[%s1290_s7 + $0x128] sm:$0xff] %v801_v50  ;;  %v770_v52 = vsel %vm642_vm8, %v491_v46, %v706_v48  ;;  %v786_v53 = vsel %vm658_vm9, %v531_v47, %v722_v49 }
  0xdc   : > { %881 = vst [vmem:[%s1290_s7 + $0x1a8] sm:$0xff] %v817_v51 }
  0xdd   : > { %834 = vst [vmem:[%s1290_s7 + $0x30] sm:$0xff] %v770_v52 }
  0xde   : > { %850 = vst [vmem:[%s1290_s7 + $0xb0] sm:$0xff] %v786_v53 }
  0xdf   : > { %v571_v54 = vpop.f32.mrf.mxu2  ;;  %v611_v55 = vpop.f32.mrf.mxu3 }
  0xe0   : > { %vm674_vm10 = vcmp.gt.f32.partialorder %v571_v54, 0.0  ;;  %v738_v56 = vmul.f32 0.2, %v571_v54  ;;  %vm690_vm11 = vcmp.gt.f32.partialorder %v611_v55, 0.0  ;;  %v754_v57 = vmul.f32 0.2, %v611_v55  ;;  %v493_v58 = vpop.f32.mrf.mxu0  ;;  %v533_v59 = vpop.f32.mrf.mxu1 }
  0xe1   : > { %vm643_vm12 = vcmp.gt.f32.partialorder %v493_v58, 0.0  ;;  %v707_v60 = vmul.f32 0.2, %v493_v58  ;;  %vm659_vm13 = vcmp.gt.f32.partialorder %v533_v59, 0.0  ;;  %v723_v61 = vmul.f32 0.2, %v533_v59 }
  0xe2   : > { %v802_v62 = vsel %vm674_vm10, %v571_v54, %v738_v56  ;;  %v818_v63 = vsel %vm690_vm11, %v611_v55, %v754_v57 }
  0xe3   : > { %866 = vst [vmem:[%s1290_s7 + $0x130] sm:$0xff] %v802_v62  ;;  %v771_v0 = vsel %vm643_vm12, %v493_v58, %v707_v60  ;;  %v787_v1 = vsel %vm659_vm13, %v533_v59, %v723_v61 }
  0xe4   : > { %882 = vst [vmem:[%s1290_s7 + $0x1b0] sm:$0xff] %v818_v63 }
  0xe5   : > { %835 = vst [vmem:[%s1290_s7 + $0x38] sm:$0xff] %v771_v0 }
  0xe6   : > { %851 = vst [vmem:[%s1290_s7 + $0xb8] sm:$0xff] %v787_v1 }
  0xe7   : > { %v573_v2 = vpop.f32.mrf.mxu2  ;;  %v613_v3 = vpop.f32.mrf.mxu3 }
  0xe8   : > { %vm675_vm14 = vcmp.gt.f32.partialorder %v573_v2, 0.0  ;;  %v739_v4 = vmul.f32 0.2, %v573_v2  ;;  %vm691_vm15 = vcmp.gt.f32.partialorder %v613_v3, 0.0  ;;  %v755_v5 = vmul.f32 0.2, %v613_v3  ;;  %v496_v6 = vpop.f32.mrf.mxu0  ;;  %v536_v7 = vpop.f32.mrf.mxu1 }
  0xe9   : > { %vm644_vm0 = vcmp.gt.f32.partialorder %v496_v6, 0.0  ;;  %v708_v8 = vmul.f32 0.2, %v496_v6  ;;  %vm660_vm1 = vcmp.gt.f32.partialorder %v536_v7, 0.0  ;;  %v724_v9 = vmul.f32 0.2, %v536_v7 }
  0xea   : > { %v803_v10 = vsel %vm675_vm14, %v573_v2, %v739_v4  ;;  %v819_v11 = vsel %vm691_vm15, %v613_v3, %v755_v5 }
  0xeb   : > { %867 = vst [vmem:[%s1290_s7 + $0x138] sm:$0xff] %v803_v10  ;;  %v772_v12 = vsel %vm644_vm0, %v496_v6, %v708_v8  ;;  %v788_v13 = vsel %vm660_vm1, %v536_v7, %v724_v9 }
  0xec   : > { %883 = vst [vmem:[%s1290_s7 + $0x1b8] sm:$0xff] %v819_v11 }
  0xed   : > { %836 = vst [vmem:[%s1290_s7 + $0x40] sm:$0xff] %v772_v12 }
  0xee   : > { %852 = vst [vmem:[%s1290_s7 + $0xc0] sm:$0xff] %v788_v13 }
  0xef   : > { %v576_v14 = vpop.f32.mrf.mxu2  ;;  %v616_v15 = vpop.f32.mrf.mxu3 }
  0xf0   : > { %vm676_vm2 = vcmp.gt.f32.partialorder %v576_v14, 0.0  ;;  %v740_v16 = vmul.f32 0.2, %v576_v14  ;;  %vm692_vm3 = vcmp.gt.f32.partialorder %v616_v15, 0.0  ;;  %v756_v17 = vmul.f32 0.2, %v616_v15  ;;  %v498_v18 = vpop.f32.mrf.mxu0  ;;  %v538_v19 = vpop.f32.mrf.mxu1 }
  0xf1   : > { %vm645_vm4 = vcmp.gt.f32.partialorder %v498_v18, 0.0  ;;  %v709_v20 = vmul.f32 0.2, %v498_v18  ;;  %vm661_vm5 = vcmp.gt.f32.partialorder %v538_v19, 0.0  ;;  %v725_v21 = vmul.f32 0.2, %v538_v19 }
  0xf2   : > { %v804_v22 = vsel %vm676_vm2, %v576_v14, %v740_v16  ;;  %v820_v23 = vsel %vm692_vm3, %v616_v15, %v756_v17 }
  0xf3   : > { %868 = vst [vmem:[%s1290_s7 + $0x140] sm:$0xff] %v804_v22  ;;  %v773_v24 = vsel %vm645_vm4, %v498_v18, %v709_v20  ;;  %v789_v25 = vsel %vm661_vm5, %v538_v19, %v725_v21 }
  0xf4   : > { %884 = vst [vmem:[%s1290_s7 + $0x1c0] sm:$0xff] %v820_v23 }
  0xf5   : > { %837 = vst [vmem:[%s1290_s7 + $0x48] sm:$0xff] %v773_v24 }
  0xf6   : > { %853 = vst [vmem:[%s1290_s7 + $0xc8] sm:$0xff] %v789_v25 }
  0xf7   : > { %v578_v26 = vpop.f32.mrf.mxu2  ;;  %v618_v27 = vpop.f32.mrf.mxu3 }
  0xf8   : > { %vm677_vm6 = vcmp.gt.f32.partialorder %v578_v26, 0.0  ;;  %v741_v28 = vmul.f32 0.2, %v578_v26  ;;  %vm693_vm7 = vcmp.gt.f32.partialorder %v618_v27, 0.0  ;;  %v757_v29 = vmul.f32 0.2, %v618_v27  ;;  %v501_v30 = vpop.f32.mrf.mxu0  ;;  %v541_v31 = vpop.f32.mrf.mxu1 }
  0xf9   : > { %vm646_vm8 = vcmp.gt.f32.partialorder %v501_v30, 0.0  ;;  %v710_v32 = vmul.f32 0.2, %v501_v30  ;;  %vm662_vm9 = vcmp.gt.f32.partialorder %v541_v31, 0.0  ;;  %v726_v33 = vmul.f32 0.2, %v541_v31 }
  0xfa   : > { %v805_v34 = vsel %vm677_vm6, %v578_v26, %v741_v28  ;;  %v821_v35 = vsel %vm693_vm7, %v618_v27, %v757_v29 }
  0xfb   : > { %869 = vst [vmem:[%s1290_s7 + $0x148] sm:$0xff] %v805_v34  ;;  %v774_v36 = vsel %vm646_vm8, %v501_v30, %v710_v32  ;;  %v790_v37 = vsel %vm662_vm9, %v541_v31, %v726_v33 }
  0xfc   : > { %885 = vst [vmem:[%s1290_s7 + $0x1c8] sm:$0xff] %v821_v35 }
  0xfd   : > { %838 = vst [vmem:[%s1290_s7 + $0x50] sm:$0xff] %v774_v36 }
  0xfe   : > { %854 = vst [vmem:[%s1290_s7 + $0xd0] sm:$0xff] %v790_v37 }
  0xff   : > { %v581_v38 = vpop.f32.mrf.mxu2  ;;  %v621_v39 = vpop.f32.mrf.mxu3 }
 0x100   : > { %vm678_vm10 = vcmp.gt.f32.partialorder %v581_v38, 0.0  ;;  %v742_v40 = vmul.f32 0.2, %v581_v38  ;;  %vm694_vm11 = vcmp.gt.f32.partialorder %v621_v39, 0.0  ;;  %v758_v41 = vmul.f32 0.2, %v621_v39  ;;  %v503_v42 = vpop.f32.mrf.mxu0  ;;  %v543_v43 = vpop.f32.mrf.mxu1 }
 0x101   : > { %vm647_vm12 = vcmp.gt.f32.partialorder %v503_v42, 0.0  ;;  %v711_v44 = vmul.f32 0.2, %v503_v42  ;;  %vm663_vm13 = vcmp.gt.f32.partialorder %v543_v43, 0.0  ;;  %v727_v45 = vmul.f32 0.2, %v543_v43 }
 0x102   : > { %v806_v46 = vsel %vm678_vm10, %v581_v38, %v742_v40  ;;  %v822_v47 = vsel %vm694_vm11, %v621_v39, %v758_v41 }
 0x103   : > { %870 = vst [vmem:[%s1290_s7 + $0x150] sm:$0xff] %v806_v46  ;;  %v775_v48 = vsel %vm647_vm12, %v503_v42, %v711_v44  ;;  %v791_v49 = vsel %vm663_vm13, %v543_v43, %v727_v45 }
 0x104   : > { %886 = vst [vmem:[%s1290_s7 + $0x1d0] sm:$0xff] %v822_v47 }
 0x105   : > { %839 = vst [vmem:[%s1290_s7 + $0x58] sm:$0xff] %v775_v48 }
 0x106   : > { %855 = vst [vmem:[%s1290_s7 + $0xd8] sm:$0xff] %v791_v49 }
 0x107   : > { %v583_v50 = vpop.f32.mrf.mxu2  ;;  %v623_v51 = vpop.f32.mrf.mxu3 }
 0x108   : > { %vm679_vm14 = vcmp.gt.f32.partialorder %v583_v50, 0.0  ;;  %v743_v52 = vmul.f32 0.2, %v583_v50  ;;  %vm695_vm15 = vcmp.gt.f32.partialorder %v623_v51, 0.0  ;;  %v759_v53 = vmul.f32 0.2, %v623_v51  ;;  %v506_v54 = vpop.f32.mrf.mxu0  ;;  %v546_v55 = vpop.f32.mrf.mxu1 }
 0x109   : > { %vm648_vm0 = vcmp.gt.f32.partialorder %v506_v54, 0.0  ;;  %v712_v56 = vmul.f32 0.2, %v506_v54  ;;  %vm664_vm1 = vcmp.gt.f32.partialorder %v546_v55, 0.0  ;;  %v728_v57 = vmul.f32 0.2, %v546_v55 }
 0x10a   : > { %v807_v58 = vsel %vm679_vm14, %v583_v50, %v743_v52  ;;  %v823_v59 = vsel %vm695_vm15, %v623_v51, %v759_v53 }
 0x10b   : > { %871 = vst [vmem:[%s1290_s7 + $0x158] sm:$0xff] %v807_v58  ;;  %v776_v60 = vsel %vm648_vm0, %v506_v54, %v712_v56  ;;  %v792_v61 = vsel %vm664_vm1, %v546_v55, %v728_v57 }
 0x10c   : > { %887 = vst [vmem:[%s1290_s7 + $0x1d8] sm:$0xff] %v823_v59 }
 0x10d   : > { %840 = vst [vmem:[%s1290_s7 + $0x60] sm:$0xff] %v776_v60 }
 0x10e   : > { %856 = vst [vmem:[%s1290_s7 + $0xe0] sm:$0xff] %v792_v61 }
 0x10f   : > { %v586_v62 = vpop.f32.mrf.mxu2  ;;  %v626_v63 = vpop.f32.mrf.mxu3 }
 0x110   : > { %vm680_vm2 = vcmp.gt.f32.partialorder %v586_v62, 0.0  ;;  %v744_v0 = vmul.f32 0.2, %v586_v62  ;;  %vm696_vm3 = vcmp.gt.f32.partialorder %v626_v63, 0.0  ;;  %v760_v1 = vmul.f32 0.2, %v626_v63  ;;  %v508_v2 = vpop.f32.mrf.mxu0  ;;  %v548_v3 = vpop.f32.mrf.mxu1 }
 0x111   : > { %vm649_vm4 = vcmp.gt.f32.partialorder %v508_v2, 0.0  ;;  %v713_v4 = vmul.f32 0.2, %v508_v2  ;;  %vm665_vm5 = vcmp.gt.f32.partialorder %v548_v3, 0.0  ;;  %v729_v5 = vmul.f32 0.2, %v548_v3 }
 0x112   : > { %v808_v6 = vsel %vm680_vm2, %v586_v62, %v744_v0  ;;  %v824_v7 = vsel %vm696_vm3, %v626_v63, %v760_v1 }
 0x113   : > { %872 = vst [vmem:[%s1290_s7 + $0x160] sm:$0xff] %v808_v6  ;;  %v777_v8 = vsel %vm649_vm4, %v508_v2, %v713_v4  ;;  %v793_v9 = vsel %vm665_vm5, %v548_v3, %v729_v5 }
 0x114   : > { %888 = vst [vmem:[%s1290_s7 + $0x1e0] sm:$0xff] %v824_v7 }
 0x115   : > { %841 = vst [vmem:[%s1290_s7 + $0x68] sm:$0xff] %v777_v8 }
 0x116   : > { %857 = vst [vmem:[%s1290_s7 + $0xe8] sm:$0xff] %v793_v9 }
 0x117   : > { %v588_v10 = vpop.f32.mrf.mxu2  ;;  %v628_v11 = vpop.f32.mrf.mxu3 }
 0x118   : > { %vm681_vm6 = vcmp.gt.f32.partialorder %v588_v10, 0.0  ;;  %v745_v12 = vmul.f32 0.2, %v588_v10  ;;  %vm697_vm7 = vcmp.gt.f32.partialorder %v628_v11, 0.0  ;;  %v761_v13 = vmul.f32 0.2, %v628_v11  ;;  %v511_v14 = vpop.f32.mrf.mxu0  ;;  %v551_v15 = vpop.f32.mrf.mxu1 }
 0x119   : > { %vm650_vm8 = vcmp.gt.f32.partialorder %v511_v14, 0.0  ;;  %v714_v16 = vmul.f32 0.2, %v511_v14  ;;  %vm666_vm9 = vcmp.gt.f32.partialorder %v551_v15, 0.0  ;;  %v730_v17 = vmul.f32 0.2, %v551_v15 }
 0x11a   : > { %v809_v18 = vsel %vm681_vm6, %v588_v10, %v745_v12  ;;  %v825_v19 = vsel %vm697_vm7, %v628_v11, %v761_v13 }
 0x11b   : > { %873 = vst [vmem:[%s1290_s7 + $0x168] sm:$0xff] %v809_v18  ;;  %v778_v20 = vsel %vm650_vm8, %v511_v14, %v714_v16  ;;  %v794_v21 = vsel %vm666_vm9, %v551_v15, %v730_v17 }
 0x11c   : > { %889 = vst [vmem:[%s1290_s7 + $0x1e8] sm:$0xff] %v825_v19 }
 0x11d   : > { %842 = vst [vmem:[%s1290_s7 + $0x70] sm:$0xff] %v778_v20 }
 0x11e   : > { %858 = vst [vmem:[%s1290_s7 + $0xf0] sm:$0xff] %v794_v21 }
 0x11f   : > { %v591_v22 = vpop.f32.mrf.mxu2  ;;  %v631_v23 = vpop.f32.mrf.mxu3 }
 0x120   : > { %vm682_vm10 = vcmp.gt.f32.partialorder %v591_v22, 0.0  ;;  %v746_v24 = vmul.f32 0.2, %v591_v22  ;;  %vm698_vm11 = vcmp.gt.f32.partialorder %v631_v23, 0.0  ;;  %v762_v25 = vmul.f32 0.2, %v631_v23  ;;  %v513_v26 = vpop.f32.mrf.mxu0  ;;  %v553_v27 = vpop.f32.mrf.mxu1 }
 0x121   : > { %vm651_vm12 = vcmp.gt.f32.partialorder %v513_v26, 0.0  ;;  %v715_v28 = vmul.f32 0.2, %v513_v26  ;;  %vm667_vm13 = vcmp.gt.f32.partialorder %v553_v27, 0.0  ;;  %v731_v29 = vmul.f32 0.2, %v553_v27 }
 0x122   : > { %v810_v30 = vsel %vm682_vm10, %v591_v22, %v746_v24  ;;  %v826_v31 = vsel %vm698_vm11, %v631_v23, %v762_v25 }
 0x123   : > { %874 = vst [vmem:[%s1290_s7 + $0x170] sm:$0xff] %v810_v30  ;;  %v779_v32 = vsel %vm651_vm12, %v513_v26, %v715_v28  ;;  %v795_v33 = vsel %vm667_vm13, %v553_v27, %v731_v29 }
 0x124   : > { %890 = vst [vmem:[%s1290_s7 + $0x1f0] sm:$0xff] %v826_v31 }
 0x125   : > { %843 = vst [vmem:[%s1290_s7 + $0x78] sm:$0xff] %v779_v32 }
 0x126   : > { %859 = vst [vmem:[%s1290_s7 + $0xf8] sm:$0xff] %v795_v33 }
 0x127   : > { %v593_v34 = vpop.f32.mrf.mxu2  ;;  %v633_v35 = vpop.f32.mrf.mxu3 }
 0x128   : > { %vm683_vm14 = vcmp.gt.f32.partialorder %v593_v34, 0.0  ;;  %v747_v36 = vmul.f32 0.2, %v593_v34  ;;  %vm699_vm15 = vcmp.gt.f32.partialorder %v633_v35, 0.0  ;;  %v763_v37 = vmul.f32 0.2, %v633_v35 }
 0x12a   : > { %v811_v38 = vsel %vm683_vm14, %v593_v34, %v747_v36  ;;  %v827_v39 = vsel %vm699_vm15, %v633_v35, %v763_v37 }
 0x12b   : > { %875 = vst [vmem:[%s1290_s7 + $0x178] sm:$0xff] %v811_v38 }
 0x12c   : > { %891 = vst [vmem:[%s1290_s7 + $0x1f8] sm:$0xff] %v827_v39 }
 0x12d PF: > { %s12_s9 = sadd.s32 1, %s1197_s9  }
 0x12e   : > { %p9_p4 = scmp.ge.s32.totalorder %s12_s9, 6  }
 0x130   :  { %11 = sbr.rel (!%p9_p4) target bundleno = 1 (0x1), region = 58 }

// kernel: discriminator_forward.9
= control target key start
LH: loop header
LB: loop body
LE: loop exit
PB: predicated region body
PF: predicated region fallthrough
CT: control target
= control target key end

     0   :  { %s1668_s1 = inlined_call_operand.vmem [shape: bf16[128,128], index: 1, kind: input, shape index: {}]   ;;  %s1669_s0 = inlined_call_operand.vmem [shape: bf16[512,128], index: 0, kind: input, shape index: {}]   ;;  %s1670_s2 = inlined_call_operand.vmem [shape: f32[512,128], index: 2, kind: output, shape index: {0}]   ;;  %s1671_s3 = inlined_call_operand.vmem [shape: f32[1,128], index: 3, kind: output, shape index: {1}]   ;;  %s1672_s4 = inlined_call_operand.vmem [shape: f32[1,128], index: 4, kind: output, shape index: {2}]  }
   0x1   :  { %v992_v0 = vld [vmem:[%s1668_s1 + $0x38] sm:$0xff]  ;;  %v991_v1 = vld [vmem:[%s1668_s1 + $0x30] sm:$0xff]  ;;  %v990_v2 = vld [vmem:[%s1668_s1 + $0x28] sm:$0xff] }
   0x2   :  { %340 = vmatpush.bf16.msra.mxu0 %v992_v0  ;;  %993 = vmatpush.bf16.msra.mxu1 %v992_v0  ;;  %v989_v3 = vld [vmem:[%s1668_s1 + $0x20] sm:$0xff]  ;;  %v988_v4 = vld [vmem:[%s1668_s1 + $0x18] sm:$0xff]  ;;  %v987_v5 = vld [vmem:[%s1668_s1 + $0x10] sm:$0xff] }
   0x3   :  { %994 = vmatpush.bf16.msra.mxu2 %v992_v0  ;;  %995 = vmatpush.bf16.msra.mxu3 %v992_v0  ;;  %v986_v6 = vld [vmem:[%s1668_s1 + $0x8] sm:$0xff]  ;;  %v985_v7 = vld [vmem:[%s1668_s1] sm:$0xff]  ;;  %v955_v13 = vld [vmem:[%s1669_s0 + $0x10] sm:$0xff] }
   0x4   :  { %v953_v8 = vld [vmem:[%s1669_s0] sm:$0xff]  ;;  %v954_v10 = vld [vmem:[%s1669_s0 + $0x8] sm:$0xff]  ;;  %v963_v14 = vld [vmem:[%s1669_s0 + $0x50] sm:$0xff] }
   0x5   :  { %v961_v9 = vld [vmem:[%s1669_s0 + $0x40] sm:$0xff]  ;;  %v962_v11 = vld [vmem:[%s1669_s0 + $0x48] sm:$0xff]  ;;  %v956_v16 = vld [vmem:[%s1669_s0 + $0x18] sm:$0xff] }
   0x6   :  { %341 = vmatpush.bf16.msra.mxu0 %v991_v1  ;;  %996 = vmatpush.bf16.msra.mxu1 %v991_v1  ;;  %v969_v12 = vld [vmem:[%s1669_s0 + $0x80] sm:$0xff]  ;;  %v970_v15 = vld [vmem:[%s1669_s0 + $0x88] sm:$0xff]  ;;  %v964_v17 = vld [vmem:[%s1669_s0 + $0x58] sm:$0xff] }
   0x7   :  { %997 = vmatpush.bf16.msra.mxu2 %v991_v1  ;;  %998 = vmatpush.bf16.msra.mxu3 %v991_v1  ;;  %v971_v18 = vld [vmem:[%s1669_s0 + $0x90] sm:$0xff]  ;;  %v977_v19 = vld [vmem:[%s1669_s0 + $0xc0] sm:$0xff]  ;;  %v972_v22 = vld [vmem:[%s1669_s0 + $0x98] sm:$0xff] }
   0x8   :  { %v957_v20 = vld [vmem:[%s1669_s0 + $0x20] sm:$0xff]  ;;  %v978_v23 = vld [vmem:[%s1669_s0 + $0xc8] sm:$0xff]  ;;  %v979_v27 = vld [vmem:[%s1669_s0 + $0xd0] sm:$0xff] }
   0x9   :  { %v965_v21 = vld [vmem:[%s1669_s0 + $0x60] sm:$0xff]  ;;  %v958_v24 = vld [vmem:[%s1669_s0 + $0x28] sm:$0xff]  ;;  %v959_v28 = vld [vmem:[%s1669_s0 + $0x30] sm:$0xff] }
   0xa   :  { %342 = vmatpush.bf16.msra.mxu0 %v990_v2  ;;  %999 = vmatpush.bf16.msra.mxu1 %v990_v2  ;;  %v966_v25 = vld [vmem:[%s1669_s0 + $0x68] sm:$0xff]  ;;  %v973_v26 = vld [vmem:[%s1669_s0 + $0xa0] sm:$0xff]  ;;  %v967_v29 = vld [vmem:[%s1669_s0 + $0x70] sm:$0xff] }
   0xb   :  { %1000 = vmatpush.bf16.msra.mxu2 %v990_v2  ;;  %1001 = vmatpush.bf16.msra.mxu3 %v990_v2  ;;  %v974_v30 = vld [vmem:[%s1669_s0 + $0xa8] sm:$0xff]  ;;  %v980_v31 = vld [vmem:[%s1669_s0 + $0xd8] sm:$0xff]  ;;  %v975_v34 = vld [vmem:[%s1669_s0 + $0xb0] sm:$0xff] }
   0xc   :  { %v960_v32 = vld [vmem:[%s1669_s0 + $0x38] sm:$0xff]  ;;  %v981_v35 = vld [vmem:[%s1669_s0 + $0xe0] sm:$0xff]  ;;  %v982_v39 = vld [vmem:[%s1669_s0 + $0xe8] sm:$0xff] }
   0xd   :  { %v968_v33 = vld [vmem:[%s1669_s0 + $0x78] sm:$0xff]  ;;  %v983_v51 = vld [vmem:[%s1669_s0 + $0xf0] sm:$0xff] }
   0xe   :  { %343 = vmatpush.bf16.msra.mxu0 %v989_v3  ;;  %1002 = vmatpush.bf16.msra.mxu1 %v989_v3  ;;  %v976_v38 = vld [vmem:[%s1669_s0 + $0xb8] sm:$0xff] }
   0xf   :  { %1003 = vmatpush.bf16.msra.mxu2 %v989_v3  ;;  %1004 = vmatpush.bf16.msra.mxu3 %v989_v3  ;;  %v984_v0 = vld [vmem:[%s1669_s0 + $0xf8] sm:$0xff] }
  0x12   :  { %344 = vmatpush.bf16.msra.mxu0 %v988_v4  ;;  %1005 = vmatpush.bf16.msra.mxu1 %v988_v4 }
  0x13   :  { %1006 = vmatpush.bf16.msra.mxu2 %v988_v4  ;;  %1007 = vmatpush.bf16.msra.mxu3 %v988_v4 }
  0x16   :  { %345 = vmatpush.bf16.msra.mxu0 %v987_v5  ;;  %1008 = vmatpush.bf16.msra.mxu1 %v987_v5 }
  0x17   :  { %1009 = vmatpush.bf16.msra.mxu2 %v987_v5  ;;  %1010 = vmatpush.bf16.msra.mxu3 %v987_v5 }
  0x1a   :  { %346 = vmatpush.bf16.msra.mxu0 %v986_v6  ;;  %1011 = vmatpush.bf16.msra.mxu1 %v986_v6 }
  0x1b   :  { %1012 = vmatpush.bf16.msra.mxu2 %v986_v6  ;;  %1013 = vmatpush.bf16.msra.mxu3 %v986_v6 }
  0x1e   :  { %347 = vmatpush.bf16.msra.mxu0 %v985_v7  ;;  %1014 = vmatpush.bf16.msra.mxu1 %v985_v7 }
  0x1f   :  { %1015 = vmatpush.bf16.msra.mxu2 %v985_v7  ;;  %1016 = vmatpush.bf16.msra.mxu3 %v985_v7 }
  0x21   :  { %348 = vmatmul.bf16.vlgmr.msra.gmra.mxu0 %v953_v8  ;;  %388 = vmatmul.bf16.vlgmr.msra.gmra.mxu1 %v961_v9 }
  0x22   :  { %428 = vmatmul.bf16.vlgmr.msra.gmra.mxu2 %v969_v12  ;;  %468 = vmatmul.bf16.vlgmr.msra.gmra.mxu3 %v977_v19 }
  0x31   :  { %353 = vmatmul.bf16.gmra.mxu0 %v954_v10  ;;  %393 = vmatmul.bf16.gmra.mxu1 %v962_v11 }
  0x32   :  { %433 = vmatmul.bf16.gmra.mxu2 %v970_v15  ;;  %473 = vmatmul.bf16.gmra.mxu3 %v978_v23 }
  0x41   :  { %358 = vmatmul.bf16.gmra.mxu0 %v955_v13  ;;  %398 = vmatmul.bf16.gmra.mxu1 %v963_v14 }
  0x42   :  { %438 = vmatmul.bf16.gmra.mxu2 %v971_v18  ;;  %478 = vmatmul.bf16.gmra.mxu3 %v979_v27 }
  0x51   :  { %363 = vmatmul.bf16.gmra.mxu0 %v956_v16  ;;  %403 = vmatmul.bf16.gmra.mxu1 %v964_v17 }
  0x52   :  { %443 = vmatmul.bf16.gmra.mxu2 %v972_v22  ;;  %483 = vmatmul.bf16.gmra.mxu3 %v980_v31 }
  0x61   :  { %368 = vmatmul.bf16.gmra.mxu0 %v957_v20  ;;  %408 = vmatmul.bf16.gmra.mxu1 %v965_v21 }
  0x62   :  { %448 = vmatmul.bf16.gmra.mxu2 %v973_v26  ;;  %488 = vmatmul.bf16.gmra.mxu3 %v981_v35 }
  0x71   :  { %373 = vmatmul.bf16.gmra.mxu0 %v958_v24  ;;  %413 = vmatmul.bf16.gmra.mxu1 %v966_v25 }
  0x72   :  { %453 = vmatmul.bf16.gmra.mxu2 %v974_v30  ;;  %493 = vmatmul.bf16.gmra.mxu3 %v982_v39 }
  0x81   :  { %378 = vmatmul.bf16.gmra.mxu0 %v959_v28  ;;  %418 = vmatmul.bf16.gmra.mxu1 %v967_v29 }
  0x82   :  { %458 = vmatmul.bf16.gmra.mxu2 %v975_v34  ;;  %498 = vmatmul.bf16.gmra.mxu3 %v983_v51 }
  0x91   :  { %383 = vmatmul.bf16.gmra.mxu0 %v960_v32  ;;  %423 = vmatmul.bf16.gmra.mxu1 %v968_v33 }
  0x92   :  { %463 = vmatmul.bf16.gmra.mxu2 %v976_v38  ;;  %503 = vmatmul.bf16.gmra.mxu3 %v984_v0 }
  0x9e   :  { %v349_v36 = vpop.f32.mrf.mxu0  ;;  %v1152_v37 = vpop.f32.mrf.mxu1 }
  0x9f   :  { %509 = vst [vmem:[%s1670_s2] sm:$0xff] %v349_v36  ;;  %v646_v42 = vmul.f32 %v349_v36, %v349_v36 }
  0xa0   :  { %525 = vst [vmem:[%s1670_s2 + $0x80] sm:$0xff] %v1152_v37 }
  0xa5   :  { %v1193_v56 = vpop.f32.mrf.mxu2  ;;  %v1262_v10 = vpop.f32.mrf.mxu3 }
  0xa6   :  { %v351_v40 = vpop.f32.mrf.mxu0  ;;  %v1167_v41 = vpop.f32.mrf.mxu1  ;;  %541 = vst [vmem:[%s1670_s2 + $0x100] sm:$0xff] %v1193_v56 }
  0xa7   :  { %510 = vst [vmem:[%s1670_s2 + $0x8] sm:$0xff] %v351_v40  ;;  %v574_v43 = vadd.f32 %v351_v40, %v349_v36  ;;  %v647_v44 = vmul.f32 %v351_v40, %v351_v40 }
  0xa8   :  { %526 = vst [vmem:[%s1670_s2 + $0x88] sm:$0xff] %v1167_v41 }
  0xa9   :  { %v710_v45 = vadd.f32 %v647_v44, %v646_v42  ;;  %557 = vst [vmem:[%s1670_s2 + $0x180] sm:$0xff] %v1262_v10 }
  0xad   :  { %v1210_v62 = vpop.f32.mrf.mxu2  ;;  %v1283_v14 = vpop.f32.mrf.mxu3 }
  0xae   :  { %v354_v46 = vpop.f32.mrf.mxu0  ;;  %v1176_v47 = vpop.f32.mrf.mxu1  ;;  %542 = vst [vmem:[%s1670_s2 + $0x108] sm:$0xff] %v1210_v62 }
  0xaf   :  { %511 = vst [vmem:[%s1670_s2 + $0x10] sm:$0xff] %v354_v46  ;;  %v575_v48 = vadd.f32 %v574_v43, %v354_v46  ;;  %v648_v49 = vmul.f32 %v354_v46, %v354_v46 }
  0xb0   :  { %527 = vst [vmem:[%s1670_s2 + $0x90] sm:$0xff] %v1176_v47 }
  0xb1   :  { %v711_v50 = vadd.f32 %v710_v45, %v648_v49  ;;  %558 = vst [vmem:[%s1670_s2 + $0x188] sm:$0xff] %v1283_v14 }
  0xb5   :  { %v1230_v3 = vpop.f32.mrf.mxu2  ;;  %v1304_v18 = vpop.f32.mrf.mxu3 }
  0xb6   :  { %v356_v52 = vpop.f32.mrf.mxu0  ;;  %v1188_v53 = vpop.f32.mrf.mxu1  ;;  %543 = vst [vmem:[%s1670_s2 + $0x110] sm:$0xff] %v1230_v3 }
  0xb7   :  { %512 = vst [vmem:[%s1670_s2 + $0x18] sm:$0xff] %v356_v52  ;;  %v576_v54 = vadd.f32 %v575_v48, %v356_v52  ;;  %v649_v55 = vmul.f32 %v356_v52, %v356_v52 }
  0xb8   :  { %528 = vst [vmem:[%s1670_s2 + $0x98] sm:$0xff] %v1188_v53 }
  0xb9   :  { %v712_v57 = vadd.f32 %v711_v50, %v649_v55  ;;  %559 = vst [vmem:[%s1670_s2 + $0x190] sm:$0xff] %v1304_v18 }
  0xbd   :  { %v1245_v6 = vpop.f32.mrf.mxu2  ;;  %v1325_v22 = vpop.f32.mrf.mxu3 }
  0xbe   :  { %v359_v58 = vpop.f32.mrf.mxu0  ;;  %v1203_v59 = vpop.f32.mrf.mxu1  ;;  %544 = vst [vmem:[%s1670_s2 + $0x118] sm:$0xff] %v1245_v6 }
  0xbf   :  { %513 = vst [vmem:[%s1670_s2 + $0x20] sm:$0xff] %v359_v58  ;;  %v1208_v60 = vadd.f32 %v576_v54, %v359_v58  ;;  %v650_v61 = vmul.f32 %v359_v58, %v359_v58 }
  0xc0   :  { %529 = vst [vmem:[%s1670_s2 + $0xa0] sm:$0xff] %v1203_v59 }
  0xc1   :  { %v1216_v63 = vadd.f32 %v712_v57, %v650_v61  ;;  %560 = vst [vmem:[%s1670_s2 + $0x198] sm:$0xff] %v1325_v22 }
  0xc5   :  { %v1260_v9 = vpop.f32.mrf.mxu2  ;;  %v1346_v26 = vpop.f32.mrf.mxu3 }
  0xc6   :  { %v361_v1 = vpop.f32.mrf.mxu0  ;;  %v1225_v2 = vpop.f32.mrf.mxu1  ;;  %545 = vst [vmem:[%s1670_s2 + $0x120] sm:$0xff] %v1260_v9 }
  0xc7   :  { %514 = vst [vmem:[%s1670_s2 + $0x28] sm:$0xff] %v361_v1  ;;  %v651_v31 = vmul.f32 %v361_v1, %v361_v1  ;;  %v578_v32 = vadd.f32 %v1208_v60, %v361_v1 }
  0xc8   :  { %530 = vst [vmem:[%s1670_s2 + $0xa8] sm:$0xff] %v1225_v2 }
  0xc9   :  { %561 = vst [vmem:[%s1670_s2 + $0x1a0] sm:$0xff] %v1346_v26  ;;  %v714_v34 = vadd.f32 %v1216_v63, %v651_v31 }
  0xcd   :  { %v1281_v13 = vpop.f32.mrf.mxu2  ;;  %v1367_v30 = vpop.f32.mrf.mxu3 }
  0xce   :  { %v364_v4 = vpop.f32.mrf.mxu0  ;;  %v1240_v5 = vpop.f32.mrf.mxu1  ;;  %546 = vst [vmem:[%s1670_s2 + $0x128] sm:$0xff] %v1281_v13 }
  0xcf   :  { %515 = vst [vmem:[%s1670_s2 + $0x30] sm:$0xff] %v364_v4  ;;  %v652_v33 = vmul.f32 %v364_v4, %v364_v4  ;;  %v579_v35 = vadd.f32 %v578_v32, %v364_v4 }
  0xd0   :  { %531 = vst [vmem:[%s1670_s2 + $0xb0] sm:$0xff] %v1240_v5 }
  0xd1   :  { %562 = vst [vmem:[%s1670_s2 + $0x1a8] sm:$0xff] %v1367_v30  ;;  %v715_v40 = vadd.f32 %v714_v34, %v652_v33 }
  0xd5   :  { %v1302_v17 = vpop.f32.mrf.mxu2  ;;  %v1390_v45 = vpop.f32.mrf.mxu3 }
  0xd6   :  { %v366_v7 = vpop.f32.mrf.mxu0  ;;  %v1255_v8 = vpop.f32.mrf.mxu1  ;;  %547 = vst [vmem:[%s1670_s2 + $0x130] sm:$0xff] %v1302_v17 }
  0xd7   :  { %516 = vst [vmem:[%s1670_s2 + $0x38] sm:$0xff] %v366_v7  ;;  %v653_v36 = vmul.f32 %v366_v7, %v366_v7  ;;  %v580_v42 = vadd.f32 %v579_v35, %v366_v7 }
  0xd8   :  { %532 = vst [vmem:[%s1670_s2 + $0xb8] sm:$0xff] %v1255_v8 }
  0xd9   :  { %v716_v46 = vadd.f32 %v715_v40, %v653_v36  ;;  %563 = vst [vmem:[%s1670_s2 + $0x1b0] sm:$0xff] %v1390_v45 }
  0xdd   :  { %v1323_v21 = vpop.f32.mrf.mxu2  ;;  %v1411_v4 = vpop.f32.mrf.mxu3 }
  0xde   :  { %v369_v11 = vpop.f32.mrf.mxu0  ;;  %v1276_v12 = vpop.f32.mrf.mxu1  ;;  %548 = vst [vmem:[%s1670_s2 + $0x138] sm:$0xff] %v1323_v21 }
  0xdf   :  { %517 = vst [vmem:[%s1670_s2 + $0x40] sm:$0xff] %v369_v11  ;;  %v654_v43 = vmul.f32 %v369_v11, %v369_v11  ;;  %v581_v48 = vadd.f32 %v580_v42, %v369_v11 }
  0xe0   :  { %533 = vst [vmem:[%s1670_s2 + $0xc0] sm:$0xff] %v1276_v12 }
  0xe1   :  { %v717_v50 = vadd.f32 %v716_v46, %v654_v43  ;;  %564 = vst [vmem:[%s1670_s2 + $0x1b8] sm:$0xff] %v1411_v4 }
  0xe5   :  { %v1344_v25 = vpop.f32.mrf.mxu2  ;;  %v1432_v43 = vpop.f32.mrf.mxu3 }
  0xe6   :  { %v371_v15 = vpop.f32.mrf.mxu0  ;;  %v1297_v16 = vpop.f32.mrf.mxu1  ;;  %549 = vst [vmem:[%s1670_s2 + $0x140] sm:$0xff] %v1344_v25 }
  0xe7   :  { %518 = vst [vmem:[%s1670_s2 + $0x48] sm:$0xff] %v371_v15  ;;  %v655_v49 = vmul.f32 %v371_v15, %v371_v15  ;;  %v582_v51 = vadd.f32 %v581_v48, %v371_v15 }
  0xe8   :  { %534 = vst [vmem:[%s1670_s2 + $0xc8] sm:$0xff] %v1297_v16 }
  0xe9   :  { %v718_v54 = vadd.f32 %v717_v50, %v655_v49  ;;  %565 = vst [vmem:[%s1670_s2 + $0x1c0] sm:$0xff] %v1432_v43  ;;  %v663_v49 = vmul.f32 %v1167_v41, %v1167_v41 }
  0xed   :  { %v1365_v29 = vpop.f32.mrf.mxu2 }
  0xee   :  { %v374_v19 = vpop.f32.mrf.mxu0  ;;  %v1318_v20 = vpop.f32.mrf.mxu1  ;;  %550 = vst [vmem:[%s1670_s2 + $0x148] sm:$0xff] %v1365_v29 }
  0xef   :  { %519 = vst [vmem:[%s1670_s2 + $0x50] sm:$0xff] %v374_v19  ;;  %v656_v52 = vmul.f32 %v374_v19, %v374_v19  ;;  %v583_v55 = vadd.f32 %v582_v51, %v374_v19 }
  0xf0   :  { %535 = vst [vmem:[%s1670_s2 + $0xd0] sm:$0xff] %v1318_v20 }
  0xf1   :  { %v719_v61 = vadd.f32 %v718_v54, %v656_v52 }
  0xf5   :  { %v1388_v44 = vpop.f32.mrf.mxu2 }
  0xf6   :  { %v376_v23 = vpop.f32.mrf.mxu0  ;;  %v1339_v24 = vpop.f32.mrf.mxu1  ;;  %551 = vst [vmem:[%s1670_s2 + $0x150] sm:$0xff] %v1388_v44 }
  0xf7   :  { %520 = vst [vmem:[%s1670_s2 + $0x58] sm:$0xff] %v376_v23  ;;  %v657_v57 = vmul.f32 %v376_v23, %v376_v23  ;;  %v584_v63 = vadd.f32 %v583_v55, %v376_v23  ;;  %v665_v55 = vmul.f32 %v1188_v53, %v1188_v53 }
  0xf8   :  { %536 = vst [vmem:[%s1670_s2 + $0xd8] sm:$0xff] %v1339_v24 }
  0xf9   :  { %v720_v7 = vadd.f32 %v719_v61, %v657_v57 }
  0xfd   :  { %v1409_v1 = vpop.f32.mrf.mxu2 }
  0xfe   :  { %v379_v27 = vpop.f32.mrf.mxu0  ;;  %v1360_v28 = vpop.f32.mrf.mxu1  ;;  %552 = vst [vmem:[%s1670_s2 + $0x158] sm:$0xff] %v1409_v1 }
  0xff   :  { %521 = vst [vmem:[%s1670_s2 + $0x60] sm:$0xff] %v379_v27  ;;  %v658_v0 = vmul.f32 %v379_v27, %v379_v27  ;;  %v585_v11 = vadd.f32 %v584_v63, %v379_v27  ;;  %v1460_v63 = vpop.f32.mrf.mxu3 }
 0x100   :  { %537 = vst [vmem:[%s1670_s2 + $0xe0] sm:$0xff] %v1360_v28 }
 0x101   :  { %v721_v19 = vadd.f32 %v720_v7, %v658_v0  ;;  %566 = vst [vmem:[%s1670_s2 + $0x1c8] sm:$0xff] %v1460_v63 }
 0x105   :  { %v1430_v42 = vpop.f32.mrf.mxu2 }
 0x106   :  { %v381_v38 = vpop.f32.mrf.mxu0  ;;  %v1383_v39 = vpop.f32.mrf.mxu1  ;;  %553 = vst [vmem:[%s1670_s2 + $0x160] sm:$0xff] %v1430_v42 }
 0x107   :  { %522 = vst [vmem:[%s1670_s2 + $0x68] sm:$0xff] %v381_v38  ;;  %v659_v15 = vmul.f32 %v381_v38, %v381_v38  ;;  %v586_v23 = vadd.f32 %v585_v11, %v381_v38  ;;  %v662_v38 = vmul.f32 %v1152_v37, %v1152_v37 }
 0x108   :  { %538 = vst [vmem:[%s1670_s2 + $0xe8] sm:$0xff] %v1383_v39 }
 0x109   :  { %v722_v32 = vadd.f32 %v721_v19, %v659_v15  ;;  %v668_v15 = vmul.f32 %v1240_v5, %v1240_v5 }
 0x10d   :  { %v1458_v61 = vpop.f32.mrf.mxu2 }
 0x10e   :  { %v384_v58 = vpop.f32.mrf.mxu0  ;;  %v1404_v60 = vpop.f32.mrf.mxu1  ;;  %554 = vst [vmem:[%s1670_s2 + $0x168] sm:$0xff] %v1458_v61 }
 0x10f   :  { %523 = vst [vmem:[%s1670_s2 + $0x70] sm:$0xff] %v384_v58  ;;  %v660_v31 = vmul.f32 %v384_v58, %v384_v58  ;;  %v587_v33 = vadd.f32 %v586_v23, %v384_v58 }
 0x110   :  { %539 = vst [vmem:[%s1670_s2 + $0xf0] sm:$0xff] %v1404_v60 }
 0x111   :  { %v723_v27 = vadd.f32 %v722_v32, %v660_v31 }
 0x116   :  { %v386_v34 = vpop.f32.mrf.mxu0  ;;  %v1425_v35 = vpop.f32.mrf.mxu1 }
 0x117   :  { %524 = vst [vmem:[%s1670_s2 + $0x78] sm:$0xff] %v386_v34  ;;  %v588_v36 = vadd.f32 %v587_v33, %v386_v34  ;;  %v661_v40 = vmul.f32 %v386_v34, %v386_v34  ;;  %v1482_v33 = vpop.f32.mrf.mxu2  ;;  %v1484_v34 = vpop.f32.mrf.mxu3 }
 0x118   :  { %540 = vst [vmem:[%s1670_s2 + $0xf8] sm:$0xff] %v1425_v35 }
 0x119   :  { %v589_v46 = vadd.f32 %v588_v36, %v1152_v37  ;;  %v724_v48 = vadd.f32 %v723_v27, %v661_v40  ;;  %v664_v37 = vmul.f32 %v1176_v47, %v1176_v47  ;;  %555 = vst [vmem:[%s1670_s2 + $0x170] sm:$0xff] %v1482_v33 }
 0x11a   :  { %567 = vst [vmem:[%s1670_s2 + $0x1d0] sm:$0xff] %v1484_v34 }
 0x11b   :  { %v590_v50 = vadd.f32 %v589_v46, %v1167_v41  ;;  %v725_v51 = vadd.f32 %v724_v48, %v662_v38  ;;  %v666_v41 = vmul.f32 %v1203_v59, %v1203_v59  ;;  %v672_v38 = vmul.f32 %v1318_v20, %v1318_v20 }
 0x11d   :  { %v591_v52 = vadd.f32 %v590_v50, %v1176_v47  ;;  %v726_v54 = vadd.f32 %v725_v51, %v663_v49 }
 0x11f   :  { %v592_v57 = vadd.f32 %v591_v52, %v1188_v53  ;;  %v727_v58 = vadd.f32 %v726_v54, %v664_v37  ;;  %v667_v53 = vmul.f32 %v1225_v2, %v1225_v2  ;;  %v1506_v51 = vpop.f32.mrf.mxu2  ;;  %v1508_v37 = vpop.f32.mrf.mxu3 }
 0x120   :  { %556 = vst [vmem:[%s1670_s2 + $0x178] sm:$0xff] %v1506_v51 }
 0x121   :  { %v593_v47 = vadd.f32 %v592_v57, %v1203_v59  ;;  %v728_v0 = vadd.f32 %v727_v58, %v665_v55  ;;  %v669_v59 = vmul.f32 %v1255_v8, %v1255_v8  ;;  %568 = vst [vmem:[%s1670_s2 + $0x1d8] sm:$0xff] %v1508_v37  ;;  %v675_v55 = vmul.f32 %v1383_v39, %v1383_v39 }
 0x123   :  { %v594_v7 = vadd.f32 %v593_v47, %v1225_v2  ;;  %v729_v11 = vadd.f32 %v728_v0, %v666_v41  ;;  %v670_v2 = vmul.f32 %v1276_v12, %v1276_v12  ;;  %v676_v41 = vmul.f32 %v1404_v60, %v1404_v60 }
 0x124   :  { %v677_v0 = vmul.f32 %v1425_v35, %v1425_v35 }
 0x125   :  { %v730_v19 = vadd.f32 %v729_v11, %v667_v53  ;;  %v595_v23 = vadd.f32 %v594_v7, %v1240_v5 }
 0x127   :  { %v596_v31 = vadd.f32 %v595_v23, %v1255_v8  ;;  %v731_v32 = vadd.f32 %v730_v19, %v668_v15  ;;  %v671_v8 = vmul.f32 %v1297_v16, %v1297_v16  ;;  %v1530_v53 = vpop.f32.mrf.mxu3 }
 0x128   :  { %569 = vst [vmem:[%s1670_s2 + $0x1e0] sm:$0xff] %v1530_v53 }
 0x129   :  { %v597_v5 = vadd.f32 %v596_v31, %v1276_v12  ;;  %v732_v27 = vadd.f32 %v731_v32, %v669_v59  ;;  %v673_v12 = vmul.f32 %v1339_v24, %v1339_v24  ;;  %v681_v31 = vmul.f32 %v1245_v6, %v1245_v6 }
 0x12b   :  { %v598_v36 = vadd.f32 %v597_v5, %v1297_v16  ;;  %v733_v40 = vadd.f32 %v732_v27, %v670_v2  ;;  %v683_v27 = vmul.f32 %v1281_v13, %v1281_v13 }
 0x12d   :  { %v599_v46 = vadd.f32 %v598_v36, %v1318_v20  ;;  %v734_v48 = vadd.f32 %v733_v40, %v671_v8  ;;  %v674_v20 = vmul.f32 %v1360_v28, %v1360_v28  ;;  %v684_v36 = vmul.f32 %v1302_v17, %v1302_v17 }
 0x12f   :  { %v600_v49 = vadd.f32 %v599_v46, %v1339_v24  ;;  %v735_v50 = vadd.f32 %v734_v48, %v672_v38  ;;  %v685_v46 = vmul.f32 %v1323_v21, %v1323_v21 }
 0x131   :  { %v601_v16 = vadd.f32 %v600_v49, %v1360_v28  ;;  %v736_v52 = vadd.f32 %v735_v50, %v673_v12 }
 0x133   :  { %v737_v24 = vadd.f32 %v736_v52, %v674_v20  ;;  %v602_v54 = vadd.f32 %v601_v16, %v1383_v39  ;;  %v678_v39 = vmul.f32 %v1193_v56, %v1193_v56  ;;  %v688_v20 = vmul.f32 %v1388_v44, %v1388_v44 }
 0x135   :  { %v738_v57 = vadd.f32 %v737_v24, %v675_v55  ;;  %v603_v58 = vadd.f32 %v602_v54, %v1404_v60  ;;  %v679_v60 = vmul.f32 %v1210_v62, %v1210_v62  ;;  %v689_v55 = vmul.f32 %v1409_v1, %v1409_v1 }
 0x137   :  { %v739_v47 = vadd.f32 %v738_v57, %v676_v41  ;;  %v604_v28 = vadd.f32 %v603_v58, %v1425_v35  ;;  %v680_v35 = vmul.f32 %v1230_v3, %v1230_v3 }
 0x139   :  { %v605_v7 = vadd.f32 %v604_v28, %v1193_v56  ;;  %v740_v11 = vadd.f32 %v739_v47, %v677_v0  ;;  %v1548_v56 = vpop.f32.mrf.mxu3 }
 0x13a   :  { %570 = vst [vmem:[%s1670_s2 + $0x1e8] sm:$0xff] %v1548_v56 }
 0x13b   :  { %v606_v15 = vadd.f32 %v605_v7, %v1210_v62  ;;  %v741_v19 = vadd.f32 %v740_v11, %v678_v39  ;;  %v682_v62 = vmul.f32 %v1260_v9, %v1260_v9  ;;  %v692_v39 = vmul.f32 %v1482_v33, %v1482_v33 }
 0x13d   :  { %v607_v23 = vadd.f32 %v606_v15, %v1230_v3  ;;  %v742_v59 = vadd.f32 %v741_v19, %v679_v60  ;;  %v693_v60 = vmul.f32 %v1506_v51, %v1506_v51  ;;  %v1018_v15 = vmov 0.0  }
 0x13e   :  { %18 = vst [vmem:[%s1671_s3] sm:$0x1] %v1018_v15 }
 0x13f   :  { %v608_v32 = vadd.f32 %v607_v23, %v1245_v6  ;;  %v743_v2 = vadd.f32 %v742_v59, %v680_v35  ;;  %19 = vst [vmem:[%s1672_s4] sm:$0x1] %v1018_v15  ;;  %v696_v23 = vmul.f32 %v1304_v18, %v1304_v18 }
 0x141   :  { %v609_v5 = vadd.f32 %v608_v32, %v1260_v9  ;;  %v744_v3 = vadd.f32 %v743_v2, %v681_v31  ;;  %v1566_v9 = vpop.f32.mrf.mxu3 }
 0x142   :  { %571 = vst [vmem:[%s1670_s2 + $0x1f0] sm:$0xff] %v1566_v9 }
 0x143   :  { %v610_v8 = vadd.f32 %v609_v5, %v1281_v13  ;;  %v745_v6 = vadd.f32 %v744_v3, %v682_v62  ;;  %v686_v13 = vmul.f32 %v1344_v25, %v1344_v25  ;;  %v698_v62 = vmul.f32 %v1346_v26, %v1346_v26 }
 0x145   :  { %v746_v40 = vadd.f32 %v745_v6, %v683_v27  ;;  %v611_v38 = vadd.f32 %v610_v8, %v1302_v17  ;;  %v687_v17 = vmul.f32 %v1365_v29, %v1365_v29 }
 0x147   :  { %v612_v48 = vadd.f32 %v611_v38, %v1323_v21  ;;  %v747_v12 = vadd.f32 %v746_v40, %v684_v36 }
 0x149   :  { %v613_v49 = vadd.f32 %v612_v48, %v1344_v25  ;;  %v748_v50 = vadd.f32 %v747_v12, %v685_v46  ;;  %v1584_v25 = vpop.f32.mrf.mxu3 }
 0x14a   :  { %572 = vst [vmem:[%s1670_s2 + $0x1f8] sm:$0xff] %v1584_v25 }
 0x14b   :  { %v614_v16 = vadd.f32 %v613_v49, %v1365_v29  ;;  %v749_v21 = vadd.f32 %v748_v50, %v686_v13 }
 0x14d   :  { %v615_v52 = vadd.f32 %v614_v16, %v1388_v44  ;;  %v750_v24 = vadd.f32 %v749_v21, %v687_v17  ;;  %v690_v44 = vmul.f32 %v1430_v42, %v1430_v42  ;;  %v705_v17 = vmul.f32 %v1508_v37, %v1508_v37 }
 0x14f   :  { %v616_v54 = vadd.f32 %v615_v52, %v1409_v1  ;;  %v751_v57 = vadd.f32 %v750_v24, %v688_v20  ;;  %v691_v1 = vmul.f32 %v1458_v61, %v1458_v61  ;;  %v706_v20 = vmul.f32 %v1530_v53, %v1530_v53 }
 0x150   :  { %v707_v24 = vmul.f32 %v1548_v56, %v1548_v56 }
 0x151   :  { %v752_v29 = vadd.f32 %v751_v57, %v689_v55  ;;  %v617_v58 = vadd.f32 %v616_v54, %v1430_v42  ;;  %v694_v42 = vmul.f32 %v1262_v10, %v1262_v10  ;;  %v708_v55 = vmul.f32 %v1566_v9, %v1566_v9 }
 0x153   :  { %v753_v41 = vadd.f32 %v752_v29, %v690_v44  ;;  %v618_v47 = vadd.f32 %v617_v58, %v1458_v61  ;;  %v709_v29 = vmul.f32 %v1584_v25, %v1584_v25 }
 0x155   :  { %v754_v28 = vadd.f32 %v753_v41, %v691_v1  ;;  %v619_v0 = vadd.f32 %v618_v47, %v1482_v33  ;;  %v695_v33 = vmul.f32 %v1283_v14, %v1283_v14 }
 0x157   :  { %v755_v7 = vadd.f32 %v754_v28, %v692_v39  ;;  %v620_v11 = vadd.f32 %v619_v0, %v1506_v51 }
 0x159   :  { %v621_v61 = vadd.f32 %v620_v11, %v1262_v10  ;;  %v756_v19 = vadd.f32 %v755_v7, %v693_v60  ;;  %v697_v10 = vmul.f32 %v1325_v22, %v1325_v22 }
 0x15b   :  { %v622_v51 = vadd.f32 %v621_v61, %v1283_v14  ;;  %v757_v35 = vadd.f32 %v756_v19, %v694_v42  ;;  %v699_v14 = vmul.f32 %v1367_v30, %v1367_v30 }
 0x15d   :  { %v623_v59 = vadd.f32 %v622_v51, %v1304_v18  ;;  %v758_v31 = vadd.f32 %v757_v35, %v695_v33  ;;  %v700_v18 = vmul.f32 %v1390_v45, %v1390_v45 }
 0x15f   :  { %v624_v32 = vadd.f32 %v623_v59, %v1325_v22  ;;  %v759_v2 = vadd.f32 %v758_v31, %v696_v23  ;;  %v701_v22 = vmul.f32 %v1411_v4, %v1411_v4 }
 0x161   :  { %v625_v5 = vadd.f32 %v624_v32, %v1346_v26  ;;  %v760_v3 = vadd.f32 %v759_v2, %v697_v10  ;;  %v702_v26 = vmul.f32 %v1432_v43, %v1432_v43 }
 0x163   :  { %v626_v27 = vadd.f32 %v625_v5, %v1367_v30  ;;  %v761_v8 = vadd.f32 %v760_v3, %v698_v62  ;;  %v703_v30 = vmul.f32 %v1460_v63, %v1460_v63 }
 0x165   :  { %v762_v6 = vadd.f32 %v761_v8, %v699_v14  ;;  %v627_v36 = vadd.f32 %v626_v27, %v1390_v45  ;;  %v704_v45 = vmul.f32 %v1484_v34, %v1484_v34 }
 0x167   :  { %v628_v40 = vadd.f32 %v627_v36, %v1411_v4  ;;  %v763_v38 = vadd.f32 %v762_v6, %v700_v18 }
 0x169   :  { %v629_v46 = vadd.f32 %v628_v40, %v1432_v43  ;;  %v764_v48 = vadd.f32 %v763_v38, %v701_v22 }
 0x16b   :  { %v630_v12 = vadd.f32 %v629_v46, %v1460_v63  ;;  %v765_v13 = vadd.f32 %v764_v48, %v702_v26 }
 0x16d   :  { %v631_v49 = vadd.f32 %v630_v12, %v1484_v34  ;;  %v766_v50 = vadd.f32 %v765_v13, %v703_v30 }
 0x16f   :  { %v632_v4 = vadd.f32 %v631_v49, %v1508_v37  ;;  %v767_v16 = vadd.f32 %v766_v50, %v704_v45 }
 0x171   :  { %v768_v43 = vadd.f32 %v767_v16, %v705_v17  ;;  %v633_v21 = vadd.f32 %v632_v4, %v1530_v53 }
 0x173   :  { %v769_v63 = vadd.f32 %v768_v43, %v706_v20  ;;  %v634_v52 = vadd.f32 %v633_v21, %v1548_v56 }
 0x175   :  { %v770_v34 = vadd.f32 %v769_v63, %v707_v24  ;;  %v635_v54 = vadd.f32 %v634_v52, %v1566_v9  ;;  %v573_v9 = vld [vmem:[%s1671_s3] sm:$0x1] }
 0x177   :  { %v771_v37 = vadd.f32 %v770_v34, %v708_v55  ;;  %v636_v57 = vadd.f32 %v635_v54, %v1584_v25  ;;  %v645_v25 = vld [vmem:[%s1672_s4] sm:$0x1] }
 0x179   :  { %v637_v58 = vrot.slane %v636_v57, 4  ;;  %v772_v53 = vadd.f32 %v771_v37, %v709_v29 }
 0x17b   :  { %v638_v44 = vadd.f32 %v637_v58, %v636_v57  ;;  %v773_v41 = vrot.slane %v772_v53, 4 }
 0x17d   :  { %v639_v47 = vrot.slane %v638_v44, 2  ;;  %v774_v1 = vadd.f32 %v773_v41, %v772_v53 }
 0x17f   :  { %v640_v28 = vadd.f32 %v639_v47, %v638_v44  ;;  %v775_v56 = vrot.slane %v774_v1, 2 }
 0x181   :  { %v641_v0 = vrot.slane %v640_v28, 1  ;;  %v776_v39 = vadd.f32 %v775_v56, %v774_v1 }
 0x183   :  { %v642_v7 = vadd.f32 %v641_v0, %v640_v28  ;;  %v777_v11 = vrot.slane %v776_v39, 1 }
 0x185   :  { %v643_v60 = vadd.f32 %v642_v7, %v573_v9  ;;  %v778_v15 = vadd.f32 %v777_v11, %v776_v39 }
 0x187   :  { %644 = vst [vmem:[%s1671_s3] sm:$0x1] %v643_v60  ;;  %v779_v42 = vadd.f32 %v778_v15, %v645_v25 }
 0x189   :  { %780 = vst [vmem:[%s1672_s4] sm:$0x1] %v779_v42 }

// kernel: discriminator_forward.10
= control target key start
LH: loop header
LB: loop body
LE: loop exit
PB: predicated region body
PF: predicated region fallthrough
CT: control target
= control target key end

     0   :  { %s1064_s1 = inlined_call_operand.vmem [shape: f32[1,128], index: 1, kind: input, shape index: {}]   ;;  %s1065_s2 = inlined_call_operand.vmem [shape: f32[1,128], index: 2, kind: input, shape index: {}]   ;;  %s1066_s3 = inlined_call_operand.vmem [shape: f32[1,128], index: 3, kind: input, shape index: {}]   ;;  %s1067_s0 = inlined_call_operand.vmem [shape: f32[512,128], index: 0, kind: input, shape index: {}]   ;;  %s1068_s4 = inlined_call_operand.vmem [shape: f32[1,128], index: 4, kind: input, shape index: {}]   ;;  %s1069_s5 = inlined_call_operand.vmem [shape: f32[512,128], index: 5, kind: output, shape index: {}]  }
   0x1   :  { %v20_v0 = vld [vmem:[%s1064_s1] sm:$0x1]  ;;  %v43_v18 = vld [vmem:[%s1067_s0 + $0x8] sm:$0xff]  ;;  %v44_v19 = vld [vmem:[%s1067_s0 + $0x10] sm:$0xff] }
   0x2   :  { %v22_v1 = vld [vmem:[%s1065_s2] sm:$0x1]  ;;  %v21_v2 = vmul.f32 0.001953125, %v20_v0  ;;  %v45_v20 = vld [vmem:[%s1067_s0 + $0x18] sm:$0xff]  ;;  %v47_v24 = vld [vmem:[%s1067_s0 + $0x28] sm:$0xff] }
   0x3   :  { %v23_v3 = vmul.f32 0.001953125, %v22_v1  ;;  %v37_v13 = vld [vmem:[%s1066_s3] sm:$0x1]  ;;  %v48_v25 = vld [vmem:[%s1067_s0 + $0x30] sm:$0xff]  ;;  %v49_v26 = vld [vmem:[%s1067_s0 + $0x38] sm:$0xff] }
   0x4   :  { %v24_v4 = vmul.f32 %v21_v2, %v21_v2  ;;  %v39_v16 = vld [vmem:[%s1068_s4] sm:$0x1]  ;;  %v51_v28 = vld [vmem:[%s1067_s0 + $0x48] sm:$0xff]  ;;  %v52_v29 = vld [vmem:[%s1067_s0 + $0x50] sm:$0xff] }
   0x5   :  { %v42_v17 = vld [vmem:[%s1067_s0] sm:$0xff]  ;;  %v53_v34 = vld [vmem:[%s1067_s0 + $0x58] sm:$0xff]  ;;  %v55_v36 = vld [vmem:[%s1067_s0 + $0x68] sm:$0xff] }
   0x6   :  { %v25_v5 = vsub.f32 %v23_v3, %v24_v4  ;;  %v46_v21 = vld [vmem:[%s1067_s0 + $0x20] sm:$0xff] }
   0x7   :  { %v50_v27 = vld [vmem:[%s1067_s0 + $0x40] sm:$0xff] }
   0x8   :  { %v26_v6 = vadd.f32 1e-05, %v25_v5  ;;  %v54_v35 = vld [vmem:[%s1067_s0 + $0x60] sm:$0xff] }
   0xa   :  { %500 = vrsqrt.f32 %v26_v6  ;;  %vm33_vm0 = vweird.f32 %v26_v6 }
  0x10   :  { %v501_v7 = vpop.eup %500 }
  0x11   :  { %v28_v8 = vmul.f32 %v501_v7, %v26_v6  ;;  %vm34_vm1 = vweird.f32 %v501_v7 }
  0x12   :  { %vm35_vm2 = vmor %vm33_vm0, %vm34_vm1 }
  0x13   :  { %v29_v9 = vmul.f32 %v501_v7, %v28_v8 }
  0x15   :  { %v30_v10 = vmul.f32 0.5, %v29_v9 }
  0x17   :  { %v31_v11 = vsub.f32 1.5, %v30_v10 }
  0x19   :  { %v32_v12 = vmul.f32 %v501_v7, %v31_v11 }
  0x1b   :  { %v36_v14 = vsel %vm35_vm2, %v501_v7, %v32_v12 }
  0x1c   :  { %v38_v15 = vmul.f32 %v37_v13, %v36_v14  ;;  %v56_v13 = vld [vmem:[%s1067_s0 + $0x70] sm:$0xff]  ;;  %v57_v14 = vld [vmem:[%s1067_s0 + $0x78] sm:$0xff] }
  0x1e   :  { %v40_v22 = vmul.f32 %v38_v15, %v21_v2  ;;  %v559_v23 = vperm.slane %v38_v15, 0 }
  0x20   :  { %v41_v30 = vsub.f32 %v39_v16, %v40_v22  ;;  %v109_v31 = vmul.f32 %v559_v23, %v42_v17  ;;  %v110_v32 = vmul.f32 %v559_v23, %v43_v18  ;;  %v111_v33 = vmul.f32 %v559_v23, %v44_v19  ;;  %v58_v17 = vld [vmem:[%s1067_s0 + $0x80] sm:$0xff]  ;;  %v59_v18 = vld [vmem:[%s1067_s0 + $0x88] sm:$0xff] }
  0x21   :  { %v112_v37 = vmul.f32 %v559_v23, %v45_v20  ;;  %v113_v38 = vmul.f32 %v559_v23, %v46_v21  ;;  %v114_v39 = vmul.f32 %v559_v23, %v47_v24  ;;  %v115_v40 = vmul.f32 %v559_v23, %v48_v25  ;;  %v60_v25 = vld [vmem:[%s1067_s0 + $0x90] sm:$0xff] }
  0x22   :  { %v595_v41 = vperm.slane %v41_v30, 0  ;;  %v116_v42 = vmul.f32 %v559_v23, %v49_v26  ;;  %v117_v43 = vmul.f32 %v559_v23, %v50_v27  ;;  %v118_v44 = vmul.f32 %v559_v23, %v51_v28 }
  0x23   :  { %v119_v45 = vmul.f32 %v559_v23, %v52_v29  ;;  %v120_v46 = vmul.f32 %v559_v23, %v53_v34  ;;  %v121_v47 = vmul.f32 %v559_v23, %v54_v35  ;;  %v122_v48 = vmul.f32 %v559_v23, %v55_v36  ;;  %v61_v29 = vld [vmem:[%s1067_s0 + $0x98] sm:$0xff]  ;;  %v62_v34 = vld [vmem:[%s1067_s0 + $0xa0] sm:$0xff] }
  0x24   :  { %v176_v49 = vadd.f32 %v595_v41, %v109_v31  ;;  %v177_v50 = vadd.f32 %v595_v41, %v110_v32  ;;  %v178_v51 = vadd.f32 %v595_v41, %v111_v33  ;;  %v179_v52 = vadd.f32 %v595_v41, %v112_v37 }
  0x25   :  { %v180_v53 = vadd.f32 %v595_v41, %v113_v38  ;;  %v181_v54 = vadd.f32 %v595_v41, %v114_v39  ;;  %v182_v55 = vadd.f32 %v595_v41, %v115_v40  ;;  %v183_v56 = vadd.f32 %v595_v41, %v116_v42 }
  0x26   :  { %vm240_vm3 = vcmp.gt.f32.partialorder %v176_v49, 0.0  ;;  %v304_v57 = vmul.f32 0.2, %v176_v49  ;;  %vm241_vm4 = vcmp.gt.f32.partialorder %v177_v50, 0.0  ;;  %v305_v58 = vmul.f32 0.2, %v177_v50 }
  0x27   :  { %vm242_vm5 = vcmp.gt.f32.partialorder %v178_v51, 0.0  ;;  %v306_v59 = vmul.f32 0.2, %v178_v51  ;;  %vm243_vm6 = vcmp.gt.f32.partialorder %v179_v52, 0.0  ;;  %v307_v60 = vmul.f32 0.2, %v179_v52 }
  0x28   :  { %v368_v61 = vsel %vm240_vm3, %v176_v49, %v304_v57  ;;  %v369_v62 = vsel %vm241_vm4, %v177_v50, %v305_v58  ;;  %vm244_vm7 = vcmp.gt.f32.partialorder %v180_v53, 0.0  ;;  %v308_v63 = vmul.f32 0.2, %v180_v53  ;;  %v63_v50 = vld [vmem:[%s1067_s0 + $0xa8] sm:$0xff]  ;;  %v65_v57 = vld [vmem:[%s1067_s0 + $0xb8] sm:$0xff]  ;;  %v66_v58 = vld [vmem:[%s1067_s0 + $0xc0] sm:$0xff] }
  0x29   :  { %432 = vst [vmem:[%s1069_s5] sm:$0xff] %v368_v61  ;;  %v370_v0 = vsel %vm242_vm5, %v178_v51, %v306_v59  ;;  %v371_v1 = vsel %vm243_vm6, %v179_v52, %v307_v60  ;;  %vm245_vm8 = vcmp.gt.f32.partialorder %v181_v54, 0.0  ;;  %v309_v2 = vmul.f32 0.2, %v181_v54  ;;  %v64_v51 = vld [vmem:[%s1067_s0 + $0xb0] sm:$0xff] }
  0x2a   :  { %433 = vst [vmem:[%s1069_s5 + $0x8] sm:$0xff] %v369_v62  ;;  %v372_v3 = vsel %vm244_vm7, %v180_v53, %v308_v63  ;;  %vm246_vm9 = vcmp.gt.f32.partialorder %v182_v55, 0.0  ;;  %v310_v4 = vmul.f32 0.2, %v182_v55  ;;  %vm247_vm10 = vcmp.gt.f32.partialorder %v183_v56, 0.0  ;;  %v67_v62 = vld [vmem:[%s1067_s0 + $0xc8] sm:$0xff] }
  0x2b   :  { %434 = vst [vmem:[%s1069_s5 + $0x10] sm:$0xff] %v370_v0  ;;  %v373_v5 = vsel %vm245_vm8, %v181_v54, %v309_v2  ;;  %v311_v6 = vmul.f32 0.2, %v183_v56  ;;  %v184_v7 = vadd.f32 %v595_v41, %v117_v43  ;;  %v185_v8 = vadd.f32 %v595_v41, %v118_v44  ;;  %v68_v63 = vld [vmem:[%s1067_s0 + $0xd0] sm:$0xff] }
  0x2c   :  { %435 = vst [vmem:[%s1069_s5 + $0x18] sm:$0xff] %v371_v1  ;;  %v374_v9 = vsel %vm246_vm9, %v182_v55, %v310_v4  ;;  %v186_v10 = vadd.f32 %v595_v41, %v119_v45  ;;  %v187_v11 = vadd.f32 %v595_v41, %v120_v46  ;;  %v188_v12 = vadd.f32 %v595_v41, %v121_v47 }
  0x2d   :  { %436 = vst [vmem:[%s1069_s5 + $0x20] sm:$0xff] %v372_v3  ;;  %v375_v15 = vsel %vm247_vm10, %v183_v56, %v311_v6  ;;  %vm248_vm11 = vcmp.gt.f32.partialorder %v184_v7, 0.0  ;;  %v312_v16 = vmul.f32 0.2, %v184_v7  ;;  %vm249_vm12 = vcmp.gt.f32.partialorder %v185_v8, 0.0 }
  0x2e   :  { %437 = vst [vmem:[%s1069_s5 + $0x28] sm:$0xff] %v373_v5  ;;  %v313_v19 = vmul.f32 0.2, %v185_v8  ;;  %vm250_vm13 = vcmp.gt.f32.partialorder %v186_v10, 0.0  ;;  %v314_v20 = vmul.f32 0.2, %v186_v10  ;;  %v189_v21 = vadd.f32 %v595_v41, %v122_v48 }
  0x2f   :  { %438 = vst [vmem:[%s1069_s5 + $0x30] sm:$0xff] %v374_v9  ;;  %v376_v22 = vsel %vm248_vm11, %v184_v7, %v312_v16  ;;  %vm251_vm14 = vcmp.gt.f32.partialorder %v187_v11, 0.0  ;;  %v315_v24 = vmul.f32 0.2, %v187_v11  ;;  %vm252_vm15 = vcmp.gt.f32.partialorder %v188_v12, 0.0  ;;  %v69_v7 = vld [vmem:[%s1067_s0 + $0xd8] sm:$0xff] }
  0x30   :  { %439 = vst [vmem:[%s1069_s5 + $0x38] sm:$0xff] %v375_v15  ;;  %v377_v26 = vsel %vm249_vm12, %v185_v8, %v313_v19  ;;  %v378_v27 = vsel %vm250_vm13, %v186_v10, %v314_v20  ;;  %v316_v28 = vmul.f32 0.2, %v188_v12  ;;  %vm253_vm0 = vcmp.gt.f32.partialorder %v189_v21, 0.0  ;;  %v70_v8 = vld [vmem:[%s1067_s0 + $0xe0] sm:$0xff] }
  0x31   :  { %440 = vst [vmem:[%s1069_s5 + $0x40] sm:$0xff] %v376_v22  ;;  %v379_v30 = vsel %vm251_vm14, %v187_v11, %v315_v24  ;;  %v317_v31 = vmul.f32 0.2, %v189_v21  ;;  %v123_v32 = vmul.f32 %v559_v23, %v56_v13  ;;  %v124_v33 = vmul.f32 %v559_v23, %v57_v14 }
  0x32   :  { %441 = vst [vmem:[%s1069_s5 + $0x48] sm:$0xff] %v377_v26  ;;  %v380_v35 = vsel %vm252_vm15, %v188_v12, %v316_v28  ;;  %v125_v36 = vmul.f32 %v559_v23, %v58_v17  ;;  %v126_v37 = vmul.f32 %v559_v23, %v59_v18  ;;  %v127_v38 = vmul.f32 %v559_v23, %v60_v25 }
  0x33   :  { %442 = vst [vmem:[%s1069_s5 + $0x50] sm:$0xff] %v378_v27  ;;  %v381_v39 = vsel %vm253_vm0, %v189_v21, %v317_v31  ;;  %v190_v40 = vadd.f32 %v595_v41, %v123_v32  ;;  %v191_v42 = vadd.f32 %v595_v41, %v124_v33  ;;  %v128_v43 = vmul.f32 %v559_v23, %v61_v29  ;;  %v71_v29 = vld [vmem:[%s1067_s0 + $0xe8] sm:$0xff] }
  0x34   :  { %443 = vst [vmem:[%s1069_s5 + $0x58] sm:$0xff] %v379_v30  ;;  %v192_v44 = vadd.f32 %v595_v41, %v125_v36  ;;  %v193_v45 = vadd.f32 %v595_v41, %v126_v37  ;;  %v194_v46 = vadd.f32 %v595_v41, %v127_v38  ;;  %v129_v47 = vmul.f32 %v559_v23, %v62_v34  ;;  %v72_v34 = vld [vmem:[%s1067_s0 + $0xf0] sm:$0xff] }
  0x35   :  { %444 = vst [vmem:[%s1069_s5 + $0x60] sm:$0xff] %v380_v35  ;;  %vm254_vm1 = vcmp.gt.f32.partialorder %v190_v40, 0.0  ;;  %v318_v48 = vmul.f32 0.2, %v190_v40  ;;  %vm255_vm2 = vcmp.gt.f32.partialorder %v191_v42, 0.0  ;;  %v195_v49 = vadd.f32 %v595_v41, %v128_v43  ;;  %v73_v35 = vld [vmem:[%s1067_s0 + $0xf8] sm:$0xff] }
  0x36   :  { %445 = vst [vmem:[%s1069_s5 + $0x68] sm:$0xff] %v381_v39  ;;  %v319_v52 = vmul.f32 0.2, %v191_v42  ;;  %vm256_vm3 = vcmp.gt.f32.partialorder %v192_v44, 0.0  ;;  %v320_v53 = vmul.f32 0.2, %v192_v44  ;;  %v196_v54 = vadd.f32 %v595_v41, %v129_v47 }
  0x37   :  { %v382_v55 = vsel %vm254_vm1, %v190_v40, %v318_v48  ;;  %vm257_vm4 = vcmp.gt.f32.partialorder %v193_v45, 0.0  ;;  %v321_v56 = vmul.f32 0.2, %v193_v45  ;;  %vm258_vm5 = vcmp.gt.f32.partialorder %v194_v46, 0.0  ;;  %v74_v39 = vld [vmem:[%s1067_s0 + $0x100] sm:$0xff]  ;;  %v75_v40 = vld [vmem:[%s1067_s0 + $0x108] sm:$0xff] }
  0x38   :  { %446 = vst [vmem:[%s1069_s5 + $0x70] sm:$0xff] %v382_v55  ;;  %v383_v59 = vsel %vm255_vm2, %v191_v42, %v319_v52  ;;  %v384_v60 = vsel %vm256_vm3, %v192_v44, %v320_v53  ;;  %v322_v61 = vmul.f32 0.2, %v194_v46  ;;  %vm259_vm6 = vcmp.gt.f32.partialorder %v195_v49, 0.0  ;;  %v76_v44 = vld [vmem:[%s1067_s0 + $0x110] sm:$0xff] }
  0x39   :  { %447 = vst [vmem:[%s1069_s5 + $0x78] sm:$0xff] %v383_v59  ;;  %v385_v0 = vsel %vm257_vm4, %v193_v45, %v321_v56  ;;  %v323_v1 = vmul.f32 0.2, %v195_v49  ;;  %vm260_vm7 = vcmp.gt.f32.partialorder %v196_v54, 0.0  ;;  %v324_v2 = vmul.f32 0.2, %v196_v54 }
  0x3a   :  { %448 = vst [vmem:[%s1069_s5 + $0x80] sm:$0xff] %v384_v60  ;;  %v386_v3 = vsel %vm258_vm5, %v194_v46, %v322_v61  ;;  %v130_v4 = vmul.f32 %v559_v23, %v63_v50  ;;  %v131_v5 = vmul.f32 %v559_v23, %v64_v51  ;;  %v132_v6 = vmul.f32 %v559_v23, %v65_v57  ;;  %v77_v57 = vld [vmem:[%s1067_s0 + $0x118] sm:$0xff]  ;;  %v78_v61 = vld [vmem:[%s1067_s0 + $0x120] sm:$0xff] }
  0x3b   :  { %449 = vst [vmem:[%s1069_s5 + $0x88] sm:$0xff] %v385_v0  ;;  %v387_v9 = vsel %vm259_vm6, %v195_v49, %v323_v1  ;;  %v388_v10 = vsel %vm260_vm7, %v196_v54, %v324_v2  ;;  %v133_v11 = vmul.f32 %v559_v23, %v66_v58  ;;  %v134_v12 = vmul.f32 %v559_v23, %v67_v62  ;;  %v79_v62 = vld [vmem:[%s1067_s0 + $0x128] sm:$0xff]  ;;  %v80_v1 = vld [vmem:[%s1067_s0 + $0x130] sm:$0xff] }
  0x3c   :  { %450 = vst [vmem:[%s1069_s5 + $0x90] sm:$0xff] %v386_v3  ;;  %v197_v13 = vadd.f32 %v595_v41, %v130_v4  ;;  %v198_v14 = vadd.f32 %v595_v41, %v131_v5  ;;  %v199_v15 = vadd.f32 %v595_v41, %v132_v6  ;;  %v135_v16 = vmul.f32 %v559_v23, %v68_v63  ;;  %v81_v5 = vld [vmem:[%s1067_s0 + $0x138] sm:$0xff] }
  0x3d   :  { %451 = vst [vmem:[%s1069_s5 + $0x98] sm:$0xff] %v387_v9  ;;  %v200_v17 = vadd.f32 %v595_v41, %v133_v11  ;;  %v201_v18 = vadd.f32 %v595_v41, %v134_v12  ;;  %v136_v19 = vmul.f32 %v559_v23, %v69_v7  ;;  %v137_v20 = vmul.f32 %v559_v23, %v70_v8  ;;  %v82_v8 = vld [vmem:[%s1067_s0 + $0x140] sm:$0xff] }
  0x3e   :  { %452 = vst [vmem:[%s1069_s5 + $0xa0] sm:$0xff] %v388_v10  ;;  %vm261_vm8 = vcmp.gt.f32.partialorder %v197_v13, 0.0  ;;  %v325_v21 = vmul.f32 0.2, %v197_v13  ;;  %vm262_vm9 = vcmp.gt.f32.partialorder %v198_v14, 0.0  ;;  %vm263_vm10 = vcmp.gt.f32.partialorder %v199_v15, 0.0 }
  0x3f   :  { %v326_v22 = vmul.f32 0.2, %v198_v14  ;;  %v327_v24 = vmul.f32 0.2, %v199_v15  ;;  %vm264_vm11 = vcmp.gt.f32.partialorder %v200_v17, 0.0  ;;  %vm265_vm12 = vcmp.gt.f32.partialorder %v201_v18, 0.0 }
  0x40   :  { %v389_v25 = vsel %vm261_vm8, %v197_v13, %v325_v21  ;;  %v328_v26 = vmul.f32 0.2, %v200_v17  ;;  %v329_v27 = vmul.f32 0.2, %v201_v18  ;;  %v202_v28 = vadd.f32 %v595_v41, %v135_v16  ;;  %v83_v13 = vld [vmem:[%s1067_s0 + $0x148] sm:$0xff] }
  0x41   :  { %453 = vst [vmem:[%s1069_s5 + $0xa8] sm:$0xff] %v389_v25  ;;  %v390_v30 = vsel %vm262_vm9, %v198_v14, %v326_v22  ;;  %v391_v31 = vsel %vm263_vm10, %v199_v15, %v327_v24  ;;  %v203_v32 = vadd.f32 %v595_v41, %v136_v19  ;;  %v204_v33 = vadd.f32 %v595_v41, %v137_v20 }
  0x42   :  { %454 = vst [vmem:[%s1069_s5 + $0xb0] sm:$0xff] %v390_v30  ;;  %v392_v36 = vsel %vm264_vm11, %v200_v17, %v328_v26  ;;  %v393_v37 = vsel %vm265_vm12, %v201_v18, %v329_v27  ;;  %vm266_vm13 = vcmp.gt.f32.partialorder %v202_v28, 0.0  ;;  %v330_v38 = vmul.f32 0.2, %v202_v28  ;;  %v84_v30 = vld [vmem:[%s1067_s0 + $0x150] sm:$0xff] }
  0x43   :  { %455 = vst [vmem:[%s1069_s5 + $0xb8] sm:$0xff] %v391_v31  ;;  %vm267_vm14 = vcmp.gt.f32.partialorder %v203_v32, 0.0  ;;  %v331_v42 = vmul.f32 0.2, %v203_v32  ;;  %vm268_vm15 = vcmp.gt.f32.partialorder %v204_v33, 0.0  ;;  %v138_v43 = vmul.f32 %v559_v23, %v71_v29  ;;  %v85_v31 = vld [vmem:[%s1067_s0 + $0x158] sm:$0xff] }
  0x44   :  { %456 = vst [vmem:[%s1069_s5 + $0xc0] sm:$0xff] %v392_v36  ;;  %v394_v45 = vsel %vm266_vm13, %v202_v28, %v330_v38  ;;  %v332_v46 = vmul.f32 0.2, %v204_v33  ;;  %v139_v47 = vmul.f32 %v559_v23, %v72_v34  ;;  %v140_v48 = vmul.f32 %v559_v23, %v73_v35  ;;  %v86_v36 = vld [vmem:[%s1067_s0 + $0x160] sm:$0xff] }
  0x45   :  { %457 = vst [vmem:[%s1069_s5 + $0xc8] sm:$0xff] %v393_v37  ;;  %v395_v49 = vsel %vm267_vm14, %v203_v32, %v331_v42  ;;  %v205_v50 = vadd.f32 %v595_v41, %v138_v43  ;;  %v141_v51 = vmul.f32 %v559_v23, %v74_v39  ;;  %v142_v52 = vmul.f32 %v559_v23, %v75_v40  ;;  %v87_v37 = vld [vmem:[%s1067_s0 + $0x168] sm:$0xff] }
  0x46   :  { %458 = vst [vmem:[%s1069_s5 + $0xd0] sm:$0xff] %v394_v45  ;;  %v396_v53 = vsel %vm268_vm15, %v204_v33, %v332_v46  ;;  %v206_v54 = vadd.f32 %v595_v41, %v139_v47  ;;  %v207_v55 = vadd.f32 %v595_v41, %v140_v48  ;;  %v143_v56 = vmul.f32 %v559_v23, %v76_v44  ;;  %v88_v46 = vld [vmem:[%s1067_s0 + $0x170] sm:$0xff] }
  0x47   :  { %459 = vst [vmem:[%s1069_s5 + $0xd8] sm:$0xff] %v395_v49  ;;  %vm269_vm0 = vcmp.gt.f32.partialorder %v205_v50, 0.0  ;;  %v333_v58 = vmul.f32 0.2, %v205_v50  ;;  %v208_v59 = vadd.f32 %v595_v41, %v141_v51  ;;  %v209_v60 = vadd.f32 %v595_v41, %v142_v52  ;;  %v89_v51 = vld [vmem:[%s1067_s0 + $0x178] sm:$0xff] }
  0x48   :  { %460 = vst [vmem:[%s1069_s5 + $0xe0] sm:$0xff] %v396_v53  ;;  %vm270_vm1 = vcmp.gt.f32.partialorder %v206_v54, 0.0  ;;  %v334_v63 = vmul.f32 0.2, %v206_v54  ;;  %vm271_vm2 = vcmp.gt.f32.partialorder %v207_v55, 0.0  ;;  %v210_v0 = vadd.f32 %v595_v41, %v143_v56 }
  0x49   :  { %v397_v2 = vsel %vm269_vm0, %v205_v50, %v333_v58  ;;  %v335_v3 = vmul.f32 0.2, %v207_v55  ;;  %vm272_vm3 = vcmp.gt.f32.partialorder %v208_v59, 0.0  ;;  %v336_v4 = vmul.f32 0.2, %v208_v59 }
  0x4a   :  { %461 = vst [vmem:[%s1069_s5 + $0xe8] sm:$0xff] %v397_v2  ;;  %v398_v6 = vsel %vm270_vm1, %v206_v54, %v334_v63  ;;  %vm273_vm4 = vcmp.gt.f32.partialorder %v209_v60, 0.0  ;;  %v337_v7 = vmul.f32 0.2, %v209_v60  ;;  %vm274_vm5 = vcmp.gt.f32.partialorder %v210_v0, 0.0  ;;  %v91_v63 = vld [vmem:[%s1067_s0 + $0x188] sm:$0xff] }
  0x4b   :  { %462 = vst [vmem:[%s1069_s5 + $0xf0] sm:$0xff] %v398_v6  ;;  %v399_v9 = vsel %vm271_vm2, %v207_v55, %v335_v3  ;;  %v400_v10 = vsel %vm272_vm3, %v208_v59, %v336_v4  ;;  %v338_v11 = vmul.f32 0.2, %v210_v0  ;;  %v144_v12 = vmul.f32 %v559_v23, %v77_v57 }
  0x4c   :  { %463 = vst [vmem:[%s1069_s5 + $0xf8] sm:$0xff] %v399_v9  ;;  %v401_v14 = vsel %vm273_vm4, %v209_v60, %v337_v7  ;;  %v145_v15 = vmul.f32 %v559_v23, %v78_v61  ;;  %v146_v16 = vmul.f32 %v559_v23, %v79_v62  ;;  %v147_v17 = vmul.f32 %v559_v23, %v80_v1  ;;  %v90_v62 = vld [vmem:[%s1067_s0 + $0x180] sm:$0xff]  ;;  %v92_v9 = vld [vmem:[%s1067_s0 + $0x190] sm:$0xff] }
  0x4d   :  { %464 = vst [vmem:[%s1069_s5 + $0x100] sm:$0xff] %v400_v10  ;;  %v402_v18 = vsel %vm274_vm5, %v210_v0, %v338_v11  ;;  %v211_v19 = vadd.f32 %v595_v41, %v144_v12  ;;  %v148_v20 = vmul.f32 %v559_v23, %v81_v5  ;;  %v149_v21 = vmul.f32 %v559_v23, %v82_v8  ;;  %v93_v10 = vld [vmem:[%s1067_s0 + $0x198] sm:$0xff]  ;;  %v94_v11 = vld [vmem:[%s1067_s0 + $0x1a0] sm:$0xff] }
  0x4e   :  { %465 = vst [vmem:[%s1069_s5 + $0x108] sm:$0xff] %v401_v14  ;;  %v212_v22 = vadd.f32 %v595_v41, %v145_v15  ;;  %v213_v24 = vadd.f32 %v595_v41, %v146_v16  ;;  %v214_v25 = vadd.f32 %v595_v41, %v147_v17  ;;  %v150_v26 = vmul.f32 %v559_v23, %v83_v13 }
  0x4f   :  { %466 = vst [vmem:[%s1069_s5 + $0x110] sm:$0xff] %v402_v18  ;;  %vm275_vm6 = vcmp.gt.f32.partialorder %v211_v19, 0.0  ;;  %v339_v27 = vmul.f32 0.2, %v211_v19  ;;  %v215_v28 = vadd.f32 %v595_v41, %v148_v20  ;;  %v216_v29 = vadd.f32 %v595_v41, %v149_v21 }
  0x50   :  { %vm276_vm7 = vcmp.gt.f32.partialorder %v212_v22, 0.0  ;;  %v340_v32 = vmul.f32 0.2, %v212_v22  ;;  %vm277_vm8 = vcmp.gt.f32.partialorder %v213_v24, 0.0  ;;  %v341_v33 = vmul.f32 0.2, %v213_v24 }
  0x51   :  { %v403_v34 = vsel %vm275_vm6, %v211_v19, %v339_v27  ;;  %vm278_vm9 = vcmp.gt.f32.partialorder %v214_v25, 0.0  ;;  %v342_v35 = vmul.f32 0.2, %v214_v25  ;;  %vm279_vm10 = vcmp.gt.f32.partialorder %v215_v28, 0.0 }
  0x52   :  { %467 = vst [vmem:[%s1069_s5 + $0x118] sm:$0xff] %v403_v34  ;;  %v404_v38 = vsel %vm276_vm7, %v212_v22, %v340_v32  ;;  %v405_v39 = vsel %vm277_vm8, %v213_v24, %v341_v33  ;;  %v343_v40 = vmul.f32 0.2, %v215_v28  ;;  %vm280_vm11 = vcmp.gt.f32.partialorder %v216_v29, 0.0  ;;  %v95_v22 = vld [vmem:[%s1067_s0 + $0x1a8] sm:$0xff]  ;;  %v96_v24 = vld [vmem:[%s1067_s0 + $0x1b0] sm:$0xff] }
  0x53   :  { %468 = vst [vmem:[%s1069_s5 + $0x120] sm:$0xff] %v404_v38  ;;  %v406_v42 = vsel %vm278_vm9, %v214_v25, %v342_v35  ;;  %v344_v43 = vmul.f32 0.2, %v216_v29  ;;  %v217_v44 = vadd.f32 %v595_v41, %v150_v26  ;;  %v151_v45 = vmul.f32 %v559_v23, %v84_v30  ;;  %v97_v25 = vld [vmem:[%s1067_s0 + $0x1b8] sm:$0xff] }
  0x54   :  { %469 = vst [vmem:[%s1069_s5 + $0x128] sm:$0xff] %v405_v39  ;;  %v407_v47 = vsel %vm279_vm10, %v215_v28, %v343_v40  ;;  %v152_v48 = vmul.f32 %v559_v23, %v85_v31  ;;  %v153_v49 = vmul.f32 %v559_v23, %v86_v36  ;;  %v154_v50 = vmul.f32 %v559_v23, %v87_v37  ;;  %v98_v36 = vld [vmem:[%s1067_s0 + $0x1c0] sm:$0xff] }
  0x55   :  { %470 = vst [vmem:[%s1069_s5 + $0x130] sm:$0xff] %v406_v42  ;;  %v408_v52 = vsel %vm280_vm11, %v216_v29, %v344_v43  ;;  %vm281_vm12 = vcmp.gt.f32.partialorder %v217_v44, 0.0  ;;  %v345_v53 = vmul.f32 0.2, %v217_v44  ;;  %v218_v54 = vadd.f32 %v595_v41, %v151_v45 }
  0x56   :  { %471 = vst [vmem:[%s1069_s5 + $0x138] sm:$0xff] %v407_v47  ;;  %v219_v55 = vadd.f32 %v595_v41, %v152_v48  ;;  %v220_v56 = vadd.f32 %v595_v41, %v153_v49  ;;  %v221_v57 = vadd.f32 %v595_v41, %v154_v50  ;;  %v155_v58 = vmul.f32 %v559_v23, %v88_v46  ;;  %v99_v47 = vld [vmem:[%s1067_s0 + $0x1c8] sm:$0xff]  ;;  %v100_v48 = vld [vmem:[%s1067_s0 + $0x1d0] sm:$0xff] }
  0x57   :  { %472 = vst [vmem:[%s1069_s5 + $0x140] sm:$0xff] %v408_v52  ;;  %v409_v59 = vsel %vm281_vm12, %v217_v44, %v345_v53  ;;  %vm282_vm13 = vcmp.gt.f32.partialorder %v218_v54, 0.0  ;;  %v346_v60 = vmul.f32 0.2, %v218_v54  ;;  %v156_v61 = vmul.f32 %v559_v23, %v89_v51  ;;  %v101_v52 = vld [vmem:[%s1067_s0 + $0x1d8] sm:$0xff] }
  0x58   :  { %473 = vst [vmem:[%s1069_s5 + $0x148] sm:$0xff] %v409_v59  ;;  %vm283_vm14 = vcmp.gt.f32.partialorder %v219_v55, 0.0  ;;  %v347_v0 = vmul.f32 0.2, %v219_v55  ;;  %vm284_vm15 = vcmp.gt.f32.partialorder %v220_v56, 0.0  ;;  %vm285_vm0 = vcmp.gt.f32.partialorder %v221_v57, 0.0 }
  0x59   :  { %v410_v1 = vsel %vm282_vm13, %v218_v54, %v346_v60  ;;  %v348_v2 = vmul.f32 0.2, %v220_v56  ;;  %v349_v3 = vmul.f32 0.2, %v221_v57  ;;  %v222_v4 = vadd.f32 %v595_v41, %v155_v58  ;;  %v103_v60 = vld [vmem:[%s1067_s0 + $0x1e8] sm:$0xff] }
  0x5a   :  { %474 = vst [vmem:[%s1069_s5 + $0x150] sm:$0xff] %v410_v1  ;;  %v411_v5 = vsel %vm283_vm14, %v219_v55, %v347_v0  ;;  %v223_v6 = vadd.f32 %v595_v41, %v156_v61  ;;  %v157_v7 = vmul.f32 %v559_v23, %v90_v62  ;;  %v158_v8 = vmul.f32 %v559_v23, %v91_v63  ;;  %v102_v55 = vld [vmem:[%s1067_s0 + $0x1e0] sm:$0xff]  ;;  %v104_v61 = vld [vmem:[%s1067_s0 + $0x1f0] sm:$0xff] }
  0x5b   :  { %475 = vst [vmem:[%s1069_s5 + $0x158] sm:$0xff] %v411_v5  ;;  %v412_v12 = vsel %vm284_vm15, %v220_v56, %v348_v2  ;;  %v413_v13 = vsel %vm285_vm0, %v221_v57, %v349_v3  ;;  %vm286_vm1 = vcmp.gt.f32.partialorder %v222_v4, 0.0  ;;  %v350_v14 = vmul.f32 0.2, %v222_v4 }
  0x5c   :  { %476 = vst [vmem:[%s1069_s5 + $0x160] sm:$0xff] %v412_v12  ;;  %vm287_vm2 = vcmp.gt.f32.partialorder %v223_v6, 0.0  ;;  %v351_v15 = vmul.f32 0.2, %v223_v6  ;;  %v224_v16 = vadd.f32 %v595_v41, %v157_v7  ;;  %v225_v17 = vadd.f32 %v595_v41, %v158_v8 }
  0x5d   :  { %477 = vst [vmem:[%s1069_s5 + $0x168] sm:$0xff] %v413_v13  ;;  %v414_v18 = vsel %vm286_vm1, %v222_v4, %v350_v14  ;;  %v159_v19 = vmul.f32 %v559_v23, %v92_v9  ;;  %v160_v20 = vmul.f32 %v559_v23, %v93_v10  ;;  %v161_v21 = vmul.f32 %v559_v23, %v94_v11  ;;  %v105_v14 = vld [vmem:[%s1067_s0 + $0x1f8] sm:$0xff] }
  0x5e   :  { %478 = vst [vmem:[%s1069_s5 + $0x170] sm:$0xff] %v414_v18  ;;  %v415_v26 = vsel %vm287_vm2, %v223_v6, %v351_v15  ;;  %vm288_vm3 = vcmp.gt.f32.partialorder %v224_v16, 0.0  ;;  %v352_v27 = vmul.f32 0.2, %v224_v16  ;;  %vm289_vm4 = vcmp.gt.f32.partialorder %v225_v17, 0.0 }
  0x5f   :  { %479 = vst [vmem:[%s1069_s5 + $0x178] sm:$0xff] %v415_v26  ;;  %v353_v28 = vmul.f32 0.2, %v225_v17  ;;  %v226_v29 = vadd.f32 %v595_v41, %v159_v19  ;;  %v227_v30 = vadd.f32 %v595_v41, %v160_v20  ;;  %v228_v31 = vadd.f32 %v595_v41, %v161_v21 }
  0x60   :  { %v416_v32 = vsel %vm288_vm3, %v224_v16, %v352_v27  ;;  %v162_v33 = vmul.f32 %v559_v23, %v95_v22  ;;  %v163_v34 = vmul.f32 %v559_v23, %v96_v24  ;;  %v164_v35 = vmul.f32 %v559_v23, %v97_v25 }
  0x61   :  { %480 = vst [vmem:[%s1069_s5 + $0x180] sm:$0xff] %v416_v32  ;;  %v417_v37 = vsel %vm289_vm4, %v225_v17, %v353_v28  ;;  %vm290_vm5 = vcmp.gt.f32.partialorder %v226_v29, 0.0  ;;  %v354_v38 = vmul.f32 0.2, %v226_v29  ;;  %vm291_vm6 = vcmp.gt.f32.partialorder %v227_v30, 0.0 }
  0x62   :  { %481 = vst [vmem:[%s1069_s5 + $0x188] sm:$0xff] %v417_v37  ;;  %v355_v39 = vmul.f32 0.2, %v227_v30  ;;  %vm292_vm7 = vcmp.gt.f32.partialorder %v228_v31, 0.0  ;;  %v356_v40 = vmul.f32 0.2, %v228_v31  ;;  %v229_v42 = vadd.f32 %v595_v41, %v162_v33 }
  0x63   :  { %v418_v43 = vsel %vm290_vm5, %v226_v29, %v354_v38  ;;  %v230_v44 = vadd.f32 %v595_v41, %v163_v34  ;;  %v231_v45 = vadd.f32 %v595_v41, %v164_v35  ;;  %v165_v46 = vmul.f32 %v559_v23, %v98_v36 }
  0x64   :  { %482 = vst [vmem:[%s1069_s5 + $0x190] sm:$0xff] %v418_v43  ;;  %v419_v49 = vsel %vm291_vm6, %v227_v30, %v355_v39  ;;  %v420_v50 = vsel %vm292_vm7, %v228_v31, %v356_v40  ;;  %vm293_vm8 = vcmp.gt.f32.partialorder %v229_v42, 0.0  ;;  %v357_v51 = vmul.f32 0.2, %v229_v42 }
  0x65   :  { %483 = vst [vmem:[%s1069_s5 + $0x198] sm:$0xff] %v419_v49  ;;  %vm294_vm9 = vcmp.gt.f32.partialorder %v230_v44, 0.0  ;;  %v358_v53 = vmul.f32 0.2, %v230_v44  ;;  %vm295_vm10 = vcmp.gt.f32.partialorder %v231_v45, 0.0  ;;  %v232_v54 = vadd.f32 %v595_v41, %v165_v46 }
  0x66   :  { %484 = vst [vmem:[%s1069_s5 + $0x1a0] sm:$0xff] %v420_v50  ;;  %v421_v56 = vsel %vm293_vm8, %v229_v42, %v357_v51  ;;  %v359_v57 = vmul.f32 0.2, %v231_v45  ;;  %v166_v58 = vmul.f32 %v559_v23, %v99_v47  ;;  %v167_v59 = vmul.f32 %v559_v23, %v100_v48 }
  0x67   :  { %485 = vst [vmem:[%s1069_s5 + $0x1a8] sm:$0xff] %v421_v56  ;;  %v422_v62 = vsel %vm294_vm9, %v230_v44, %v358_v53  ;;  %vm296_vm11 = vcmp.gt.f32.partialorder %v232_v54, 0.0  ;;  %v360_v63 = vmul.f32 0.2, %v232_v54  ;;  %v168_v0 = vmul.f32 %v559_v23, %v101_v52 }
  0x68   :  { %486 = vst [vmem:[%s1069_s5 + $0x1b0] sm:$0xff] %v422_v62  ;;  %v423_v1 = vsel %vm295_vm10, %v231_v45, %v359_v57  ;;  %v233_v2 = vadd.f32 %v595_v41, %v166_v58  ;;  %v234_v3 = vadd.f32 %v595_v41, %v167_v59  ;;  %v169_v4 = vmul.f32 %v559_v23, %v102_v55 }
  0x69   :  { %487 = vst [vmem:[%s1069_s5 + $0x1b8] sm:$0xff] %v423_v1  ;;  %v424_v5 = vsel %vm296_vm11, %v232_v54, %v360_v63  ;;  %v235_v6 = vadd.f32 %v595_v41, %v168_v0  ;;  %v170_v7 = vmul.f32 %v559_v23, %v103_v60  ;;  %v171_v8 = vmul.f32 %v559_v23, %v104_v61 }
  0x6a   :  { %488 = vst [vmem:[%s1069_s5 + $0x1c0] sm:$0xff] %v424_v5  ;;  %vm297_vm12 = vcmp.gt.f32.partialorder %v233_v2, 0.0  ;;  %v361_v9 = vmul.f32 0.2, %v233_v2  ;;  %vm298_vm13 = vcmp.gt.f32.partialorder %v234_v3, 0.0  ;;  %v236_v10 = vadd.f32 %v595_v41, %v169_v4 }
  0x6b   :  { %v362_v11 = vmul.f32 0.2, %v234_v3  ;;  %vm299_vm14 = vcmp.gt.f32.partialorder %v235_v6, 0.0  ;;  %v363_v12 = vmul.f32 0.2, %v235_v6  ;;  %v237_v13 = vadd.f32 %v595_v41, %v170_v7 }
  0x6c   :  { %v425_v15 = vsel %vm297_vm12, %v233_v2, %v361_v9  ;;  %vm300_vm15 = vcmp.gt.f32.partialorder %v236_v10, 0.0  ;;  %v364_v16 = vmul.f32 0.2, %v236_v10  ;;  %v238_v17 = vadd.f32 %v595_v41, %v171_v8 }
  0x6d   :  { %489 = vst [vmem:[%s1069_s5 + $0x1c8] sm:$0xff] %v425_v15  ;;  %v426_v18 = vsel %vm298_vm13, %v234_v3, %v362_v11  ;;  %v427_v19 = vsel %vm299_vm14, %v235_v6, %v363_v12  ;;  %vm301_vm0 = vcmp.gt.f32.partialorder %v237_v13, 0.0  ;;  %v365_v20 = vmul.f32 0.2, %v237_v13 }
  0x6e   :  { %490 = vst [vmem:[%s1069_s5 + $0x1d0] sm:$0xff] %v426_v18  ;;  %v428_v21 = vsel %vm300_vm15, %v236_v10, %v364_v16  ;;  %vm302_vm1 = vcmp.gt.f32.partialorder %v238_v17, 0.0  ;;  %v366_v22 = vmul.f32 0.2, %v238_v17  ;;  %v172_v24 = vmul.f32 %v559_v23, %v105_v14 }
  0x6f   :  { %491 = vst [vmem:[%s1069_s5 + $0x1d8] sm:$0xff] %v427_v19  ;;  %v429_v25 = vsel %vm301_vm0, %v237_v13, %v365_v20 }
  0x70   :  { %492 = vst [vmem:[%s1069_s5 + $0x1e0] sm:$0xff] %v428_v21  ;;  %v430_v26 = vsel %vm302_vm1, %v238_v17, %v366_v22  ;;  %v239_v27 = vadd.f32 %v595_v41, %v172_v24 }
  0x71   :  { %493 = vst [vmem:[%s1069_s5 + $0x1e8] sm:$0xff] %v429_v25 }
  0x72   :  { %494 = vst [vmem:[%s1069_s5 + $0x1f0] sm:$0xff] %v430_v26  ;;  %vm303_vm2 = vcmp.gt.f32.partialorder %v239_v27, 0.0  ;;  %v367_v23 = vmul.f32 0.2, %v239_v27 }
  0x74   :  { %v431_v28 = vsel %vm303_vm2, %v239_v27, %v367_v23 }
  0x75   :  { %495 = vst [vmem:[%s1069_s5 + $0x1f8] sm:$0xff] %v431_v28 }

// kernel: discriminator_forward.11
= control target key start
LH: loop header
LB: loop body
LE: loop exit
PB: predicated region body
PF: predicated region fallthrough
CT: control target
= control target key end

     0   :  { %s877_s1 = inlined_call_operand.vmem [shape: bf16[256,128], index: 1, kind: input, shape index: {}]   ;;  %s878_s0 = inlined_call_operand.vmem [shape: bf16[128,256], index: 0, kind: input, shape index: {}]   ;;  %s879_s2 = inlined_call_operand.vmem [shape: f32[128,128], index: 2, kind: output, shape index: {0}]   ;;  %s880_s3 = inlined_call_operand.vmem [shape: f32[1,128], index: 3, kind: output, shape index: {1}]   ;;  %s881_s4 = inlined_call_operand.vmem [shape: f32[1,128], index: 4, kind: output, shape index: {2}]  }
   0x1   :  { %v585_v0 = vld [vmem:[%s877_s1 + $0x38] sm:$0xff]  ;;  %v584_v2 = vld [vmem:[%s877_s1 + $0x30] sm:$0xff]  ;;  %v583_v4 = vld [vmem:[%s877_s1 + $0x28] sm:$0xff] }
   0x2   :  { %v593_v1 = vld [vmem:[%s877_s1 + $0x78] sm:$0xff]  ;;  %244 = vmatpush.bf16.msra.mxu0 %v585_v0  ;;  %v592_v3 = vld [vmem:[%s877_s1 + $0x70] sm:$0xff]  ;;  %594 = vmatpush.bf16.msra.mxu2 %v585_v0  ;;  %v591_v5 = vld [vmem:[%s877_s1 + $0x68] sm:$0xff] }
   0x3   :  { %293 = vmatpush.bf16.msra.mxu1 %v593_v1  ;;  %602 = vmatpush.bf16.msra.mxu3 %v593_v1  ;;  %v582_v6 = vld [vmem:[%s877_s1 + $0x20] sm:$0xff]  ;;  %v581_v8 = vld [vmem:[%s877_s1 + $0x18] sm:$0xff]  ;;  %v580_v10 = vld [vmem:[%s877_s1 + $0x10] sm:$0xff] }
   0x4   :  { %v590_v7 = vld [vmem:[%s877_s1 + $0x60] sm:$0xff]  ;;  %v589_v9 = vld [vmem:[%s877_s1 + $0x58] sm:$0xff]  ;;  %v588_v11 = vld [vmem:[%s877_s1 + $0x50] sm:$0xff] }
   0x5   :  { %v579_v12 = vld [vmem:[%s877_s1 + $0x8] sm:$0xff]  ;;  %v578_v14 = vld [vmem:[%s877_s1] sm:$0xff]  ;;  %v444_v28 = vld [vmem:[%s878_s0 + $0x10] sm:$0xf] }
   0x6   :  { %245 = vmatpush.bf16.msra.mxu0 %v584_v2  ;;  %595 = vmatpush.bf16.msra.mxu2 %v584_v2  ;;  %v587_v13 = vld [vmem:[%s877_s1 + $0x48] sm:$0xff]  ;;  %v586_v15 = vld [vmem:[%s877_s1 + $0x40] sm:$0xff]  ;;  %v565_v29 = vld [vmem:[%s878_s0 + $0x14] sm:$0xf0] }
   0x7   :  { %294 = vmatpush.bf16.msra.mxu1 %v592_v3  ;;  %603 = vmatpush.bf16.msra.mxu3 %v592_v3  ;;  %v436_v16 = vld [vmem:[%s878_s0] sm:$0xf]  ;;  %v563_v17 = vld [vmem:[%s878_s0 + $0x4] sm:$0xf0]  ;;  %v562_v18 = vld [vmem:[%s878_s0 + $0x4] sm:$0xf]  ;;  %v445_v36 = vor.u32 %v565_v29, %v444_v28 }
   0x8   :  { %v438_v19 = vld [vmem:[%s878_s0 + $0x8] sm:$0xf0]  ;;  %v468_v20 = vld [vmem:[%s878_s0 + $0x40] sm:$0xf]  ;;  %v571_v21 = vld [vmem:[%s878_s0 + $0x44] sm:$0xf0]  ;;  %v437_v24 = vor.u32 %v563_v17, %v436_v16 }
   0x9   :  { %v570_v22 = vld [vmem:[%s878_s0 + $0x44] sm:$0xf]  ;;  %v470_v23 = vld [vmem:[%s878_s0 + $0x48] sm:$0xf0]  ;;  %v441_v25 = vor.u32 %v562_v18, %v438_v19  ;;  %v469_v26 = vor.u32 %v571_v21, %v468_v20  ;;  %v564_v30 = vld [vmem:[%s878_s0 + $0x14] sm:$0xf] }
   0xa   :  { %246 = vmatpush.bf16.msra.mxu0 %v583_v4  ;;  %596 = vmatpush.bf16.msra.mxu2 %v583_v4  ;;  %v473_v27 = vor.u32 %v570_v22, %v470_v23  ;;  %v446_v31 = vld [vmem:[%s878_s0 + $0x18] sm:$0xf0]  ;;  %v476_v32 = vld [vmem:[%s878_s0 + $0x50] sm:$0xf]  ;;  %v573_v33 = vld [vmem:[%s878_s0 + $0x54] sm:$0xf0] }
   0xb   :  { %295 = vmatpush.bf16.msra.mxu1 %v591_v5  ;;  %604 = vmatpush.bf16.msra.mxu3 %v591_v5  ;;  %v572_v34 = vld [vmem:[%s878_s0 + $0x54] sm:$0xf]  ;;  %v478_v35 = vld [vmem:[%s878_s0 + $0x58] sm:$0xf0]  ;;  %v449_v37 = vor.u32 %v564_v30, %v446_v31  ;;  %v477_v38 = vor.u32 %v573_v33, %v476_v32  ;;  %v452_v40 = vld [vmem:[%s878_s0 + $0x20] sm:$0xf] }
   0xc   :  { %v481_v39 = vor.u32 %v572_v34, %v478_v35  ;;  %v567_v41 = vld [vmem:[%s878_s0 + $0x24] sm:$0xf0]  ;;  %v566_v42 = vld [vmem:[%s878_s0 + $0x24] sm:$0xf]  ;;  %v454_v43 = vld [vmem:[%s878_s0 + $0x28] sm:$0xf0] }
   0xd   :  { %v484_v44 = vld [vmem:[%s878_s0 + $0x60] sm:$0xf]  ;;  %v575_v45 = vld [vmem:[%s878_s0 + $0x64] sm:$0xf0]  ;;  %v574_v46 = vld [vmem:[%s878_s0 + $0x64] sm:$0xf]  ;;  %v453_v48 = vor.u32 %v567_v41, %v452_v40  ;;  %v457_v49 = vor.u32 %v566_v42, %v454_v43 }
   0xe   :  { %247 = vmatpush.bf16.msra.mxu0 %v582_v6  ;;  %597 = vmatpush.bf16.msra.mxu2 %v582_v6  ;;  %v486_v47 = vld [vmem:[%s878_s0 + $0x68] sm:$0xf0]  ;;  %v485_v50 = vor.u32 %v575_v45, %v484_v44  ;;  %v460_v52 = vld [vmem:[%s878_s0 + $0x30] sm:$0xf]  ;;  %v569_v53 = vld [vmem:[%s878_s0 + $0x34] sm:$0xf0] }
   0xf   :  { %296 = vmatpush.bf16.msra.mxu1 %v590_v7  ;;  %605 = vmatpush.bf16.msra.mxu3 %v590_v7  ;;  %v489_v51 = vor.u32 %v574_v46, %v486_v47  ;;  %v568_v54 = vld [vmem:[%s878_s0 + $0x34] sm:$0xf]  ;;  %v462_v55 = vld [vmem:[%s878_s0 + $0x38] sm:$0xf0]  ;;  %v492_v56 = vld [vmem:[%s878_s0 + $0x70] sm:$0xf]  ;;  %v461_v60 = vor.u32 %v569_v53, %v460_v52 }
  0x10   :  { %v577_v57 = vld [vmem:[%s878_s0 + $0x74] sm:$0xf0]  ;;  %v576_v58 = vld [vmem:[%s878_s0 + $0x74] sm:$0xf]  ;;  %v494_v59 = vld [vmem:[%s878_s0 + $0x78] sm:$0xf0]  ;;  %v465_v61 = vor.u32 %v568_v54, %v462_v55 }
  0x11   :  { %v493_v62 = vor.u32 %v577_v57, %v492_v56  ;;  %v497_v63 = vor.u32 %v576_v58, %v494_v59  ;;  %v611_v33 = vmov 0.0  }
  0x12   :  { %248 = vmatpush.bf16.msra.mxu0 %v581_v8  ;;  %598 = vmatpush.bf16.msra.mxu2 %v581_v8  ;;  %18 = vst [vmem:[%s880_s3] sm:$0x1] %v611_v33 }
  0x13   :  { %297 = vmatpush.bf16.msra.mxu1 %v589_v9  ;;  %606 = vmatpush.bf16.msra.mxu3 %v589_v9  ;;  %19 = vst [vmem:[%s881_s4] sm:$0x1] %v611_v33 }
  0x16   :  { %249 = vmatpush.bf16.msra.mxu0 %v580_v10  ;;  %599 = vmatpush.bf16.msra.mxu2 %v580_v10 }
  0x17   :  { %298 = vmatpush.bf16.msra.mxu1 %v588_v11  ;;  %607 = vmatpush.bf16.msra.mxu3 %v588_v11 }
  0x1a   :  { %250 = vmatpush.bf16.msra.mxu0 %v579_v12  ;;  %600 = vmatpush.bf16.msra.mxu2 %v579_v12 }
  0x1b   :  { %299 = vmatpush.bf16.msra.mxu1 %v587_v13  ;;  %608 = vmatpush.bf16.msra.mxu3 %v587_v13 }
  0x1e   :  { %251 = vmatpush.bf16.msra.mxu0 %v578_v14  ;;  %601 = vmatpush.bf16.msra.mxu2 %v578_v14 }
  0x1f   :  { %300 = vmatpush.bf16.msra.mxu1 %v586_v15  ;;  %609 = vmatpush.bf16.msra.mxu3 %v586_v15 }
  0x21   :  { %252 = vmatmul.bf16.vlgmr.msra.gmra.mxu0 %v437_v24  ;;  %272 = vmatmul.bf16.vlgmr.msra.gmra.mxu2 %v469_v26 }
  0x22   :  { %301 = vmatmul.bf16.vlgmr.msra.gmra.mxu1 %v441_v25  ;;  %321 = vmatmul.bf16.vlgmr.msra.gmra.mxu3 %v473_v27 }
  0x31   :  { %257 = vmatmul.bf16.gmra.mxu0 %v445_v36  ;;  %277 = vmatmul.bf16.gmra.mxu2 %v477_v38 }
  0x32   :  { %306 = vmatmul.bf16.gmra.mxu1 %v449_v37  ;;  %326 = vmatmul.bf16.gmra.mxu3 %v481_v39 }
  0x41   :  { %262 = vmatmul.bf16.gmra.mxu0 %v453_v48  ;;  %282 = vmatmul.bf16.gmra.mxu2 %v485_v50 }
  0x42   :  { %311 = vmatmul.bf16.gmra.mxu1 %v457_v49  ;;  %331 = vmatmul.bf16.gmra.mxu3 %v489_v51 }
  0x51   :  { %267 = vmatmul.bf16.gmra.mxu0 %v461_v60  ;;  %287 = vmatmul.bf16.gmra.mxu2 %v493_v62 }
  0x52   :  { %316 = vmatmul.bf16.gmra.mxu1 %v465_v61  ;;  %336 = vmatmul.bf16.gmra.mxu3 %v497_v63 }
  0x9e   :  { %v253_v0 = vpop.f32.mrf.mxu0 }
  0x9f   :  { %v302_v1 = vpop.f32.mrf.mxu1 }
  0xa0   :  { %v303_v2 = vadd.f32 %v302_v1, %v253_v0 }
  0xa2   :  { %342 = vst [vmem:[%s879_s2] sm:$0xff] %v303_v2  ;;  %v383_v35 = vmul.f32 %v303_v2, %v303_v2 }
  0xa4   :  { %v273_v3 = vpop.f32.mrf.mxu2 }
  0xa5   :  { %v322_v4 = vpop.f32.mrf.mxu3 }
  0xa6   :  { %v255_v5 = vpop.f32.mrf.mxu0  ;;  %v784_v7 = vadd.f32 %v322_v4, %v273_v3 }
  0xa7   :  { %v304_v6 = vpop.f32.mrf.mxu1 }
  0xa8   :  { %v305_v8 = vadd.f32 %v304_v6, %v255_v5  ;;  %350 = vst [vmem:[%s879_s2 + $0x40] sm:$0xff] %v784_v7  ;;  %v391_v3 = vmul.f32 %v784_v7, %v784_v7 }
  0xaa   :  { %343 = vst [vmem:[%s879_s2 + $0x8] sm:$0xff] %v305_v8  ;;  %v384_v34 = vmul.f32 %v305_v8, %v305_v8  ;;  %v359_v36 = vadd.f32 %v305_v8, %v303_v2 }
  0xac   :  { %v275_v9 = vpop.f32.mrf.mxu2  ;;  %v399_v43 = vadd.f32 %v384_v34, %v383_v35 }
  0xad   :  { %v324_v10 = vpop.f32.mrf.mxu3 }
  0xae   :  { %v258_v11 = vpop.f32.mrf.mxu0  ;;  %v793_v13 = vadd.f32 %v324_v10, %v275_v9 }
  0xaf   :  { %v307_v12 = vpop.f32.mrf.mxu1 }
  0xb0   :  { %v308_v14 = vadd.f32 %v307_v12, %v258_v11  ;;  %351 = vst [vmem:[%s879_s2 + $0x48] sm:$0xff] %v793_v13  ;;  %v392_v6 = vmul.f32 %v793_v13, %v793_v13 }
  0xb2   :  { %344 = vst [vmem:[%s879_s2 + $0x10] sm:$0xff] %v308_v14  ;;  %v385_v37 = vmul.f32 %v308_v14, %v308_v14  ;;  %v360_v44 = vadd.f32 %v359_v36, %v308_v14 }
  0xb4   :  { %v278_v15 = vpop.f32.mrf.mxu2  ;;  %v400_v47 = vadd.f32 %v399_v43, %v385_v37  ;;  %v382_v43 = vld [vmem:[%s881_s4] sm:$0x1] }
  0xb5   :  { %v327_v16 = vpop.f32.mrf.mxu3 }
  0xb6   :  { %v260_v17 = vpop.f32.mrf.mxu0  ;;  %v802_v19 = vadd.f32 %v327_v16, %v278_v15 }
  0xb7   :  { %v309_v18 = vpop.f32.mrf.mxu1 }
  0xb8   :  { %v310_v20 = vadd.f32 %v309_v18, %v260_v17  ;;  %352 = vst [vmem:[%s879_s2 + $0x50] sm:$0xff] %v802_v19  ;;  %v393_v14 = vmul.f32 %v802_v19, %v802_v19 }
  0xba   :  { %345 = vst [vmem:[%s879_s2 + $0x18] sm:$0xff] %v310_v20  ;;  %v386_v45 = vmul.f32 %v310_v20, %v310_v20  ;;  %v361_v48 = vadd.f32 %v360_v44, %v310_v20 }
  0xbc   :  { %v280_v21 = vpop.f32.mrf.mxu2  ;;  %v401_v50 = vadd.f32 %v400_v47, %v386_v45 }
  0xbd   :  { %v329_v22 = vpop.f32.mrf.mxu3 }
  0xbe   :  { %v263_v23 = vpop.f32.mrf.mxu0  ;;  %v811_v25 = vadd.f32 %v329_v22, %v280_v21 }
  0xbf   :  { %v312_v24 = vpop.f32.mrf.mxu1 }
  0xc0   :  { %v313_v26 = vadd.f32 %v312_v24, %v263_v23  ;;  %353 = vst [vmem:[%s879_s2 + $0x58] sm:$0xff] %v811_v25 }
  0xc2   :  { %346 = vst [vmem:[%s879_s2 + $0x20] sm:$0xff] %v313_v26  ;;  %v387_v49 = vmul.f32 %v313_v26, %v313_v26  ;;  %v362_v51 = vadd.f32 %v361_v48, %v313_v26 }
  0xc4   :  { %v283_v27 = vpop.f32.mrf.mxu2  ;;  %v402_v53 = vadd.f32 %v401_v50, %v387_v49 }
  0xc5   :  { %v332_v28 = vpop.f32.mrf.mxu3 }
  0xc6   :  { %v265_v29 = vpop.f32.mrf.mxu0  ;;  %v820_v31 = vadd.f32 %v332_v28, %v283_v27 }
  0xc7   :  { %v314_v30 = vpop.f32.mrf.mxu1 }
  0xc8   :  { %v315_v32 = vadd.f32 %v314_v30, %v265_v29  ;;  %354 = vst [vmem:[%s879_s2 + $0x60] sm:$0xff] %v820_v31  ;;  %v395_v18 = vmul.f32 %v820_v31, %v820_v31 }
  0xca   :  { %347 = vst [vmem:[%s879_s2 + $0x28] sm:$0xff] %v315_v32  ;;  %v388_v52 = vmul.f32 %v315_v32, %v315_v32  ;;  %v363_v54 = vadd.f32 %v362_v51, %v315_v32 }
  0xcc   :  { %v285_v38 = vpop.f32.mrf.mxu2  ;;  %v403_v61 = vadd.f32 %v402_v53, %v388_v52 }
  0xcd   :  { %v334_v39 = vpop.f32.mrf.mxu3 }
  0xce   :  { %v268_v40 = vpop.f32.mrf.mxu0  ;;  %v335_v42 = vadd.f32 %v334_v39, %v285_v38 }
  0xcf   :  { %v317_v41 = vpop.f32.mrf.mxu1 }
  0xd0   :  { %v318_v46 = vadd.f32 %v317_v41, %v268_v40  ;;  %355 = vst [vmem:[%s879_s2 + $0x68] sm:$0xff] %v335_v42  ;;  %v396_v22 = vmul.f32 %v335_v42, %v335_v42  ;;  %v358_v40 = vld [vmem:[%s880_s3] sm:$0x1] }
  0xd2   :  { %348 = vst [vmem:[%s879_s2 + $0x30] sm:$0xff] %v318_v46  ;;  %v389_v55 = vmul.f32 %v318_v46, %v318_v46  ;;  %v364_v62 = vadd.f32 %v363_v54, %v318_v46 }
  0xd4   :  { %v288_v56 = vpop.f32.mrf.mxu2  ;;  %v404_v0 = vadd.f32 %v403_v61, %v389_v55 }
  0xd5   :  { %v337_v57 = vpop.f32.mrf.mxu3 }
  0xd6   :  { %v270_v58 = vpop.f32.mrf.mxu0  ;;  %v338_v60 = vadd.f32 %v337_v57, %v288_v56 }
  0xd7   :  { %v319_v59 = vpop.f32.mrf.mxu1 }
  0xd8   :  { %v320_v63 = vadd.f32 %v319_v59, %v270_v58  ;;  %356 = vst [vmem:[%s879_s2 + $0x70] sm:$0xff] %v338_v60  ;;  %v397_v26 = vmul.f32 %v338_v60, %v338_v60 }
  0xda   :  { %349 = vst [vmem:[%s879_s2 + $0x38] sm:$0xff] %v320_v63  ;;  %v365_v1 = vadd.f32 %v364_v62, %v320_v63  ;;  %v390_v2 = vmul.f32 %v320_v63, %v320_v63 }
  0xdc   :  { %v366_v4 = vadd.f32 %v365_v1, %v784_v7  ;;  %v405_v5 = vadd.f32 %v404_v0, %v390_v2  ;;  %v290_v10 = vpop.f32.mrf.mxu2  ;;  %v394_v7 = vmul.f32 %v811_v25, %v811_v25 }
  0xdd   :  { %v339_v11 = vpop.f32.mrf.mxu3 }
  0xde   :  { %v367_v8 = vadd.f32 %v366_v4, %v793_v13  ;;  %v406_v9 = vadd.f32 %v405_v5, %v391_v3  ;;  %v340_v12 = vadd.f32 %v339_v11, %v290_v10 }
  0xe0   :  { %v368_v15 = vadd.f32 %v367_v8, %v802_v19  ;;  %v407_v16 = vadd.f32 %v406_v9, %v392_v6  ;;  %357 = vst [vmem:[%s879_s2 + $0x78] sm:$0xff] %v340_v12  ;;  %v398_v30 = vmul.f32 %v340_v12, %v340_v12 }
  0xe2   :  { %v408_v17 = vadd.f32 %v407_v16, %v393_v14  ;;  %v369_v13 = vadd.f32 %v368_v15, %v811_v25 }
  0xe4   :  { %v370_v20 = vadd.f32 %v369_v13, %v820_v31  ;;  %v409_v21 = vadd.f32 %v408_v17, %v394_v7 }
  0xe6   :  { %v371_v23 = vadd.f32 %v370_v20, %v335_v42  ;;  %v410_v19 = vadd.f32 %v409_v21, %v395_v18 }
  0xe8   :  { %v372_v24 = vadd.f32 %v371_v23, %v338_v60  ;;  %v411_v27 = vadd.f32 %v410_v19, %v396_v22 }
  0xea   :  { %v412_v28 = vadd.f32 %v411_v27, %v397_v26  ;;  %v373_v29 = vadd.f32 %v372_v24, %v340_v12 }
  0xec   :  { %v374_v32 = vrot.slane %v373_v29, 4  ;;  %v413_v33 = vadd.f32 %v412_v28, %v398_v30 }
  0xee   :  { %v375_v34 = vadd.f32 %v374_v32, %v373_v29  ;;  %v414_v35 = vrot.slane %v413_v33, 4 }
  0xf0   :  { %v376_v25 = vrot.slane %v375_v34, 2  ;;  %v415_v36 = vadd.f32 %v414_v35, %v413_v33 }
  0xf2   :  { %v377_v37 = vadd.f32 %v376_v25, %v375_v34  ;;  %v416_v38 = vrot.slane %v415_v36, 2 }
  0xf4   :  { %v378_v39 = vrot.slane %v377_v37, 1  ;;  %v417_v31 = vadd.f32 %v416_v38, %v415_v36 }
  0xf6   :  { %v379_v41 = vadd.f32 %v378_v39, %v377_v37  ;;  %v418_v42 = vrot.slane %v417_v31, 1 }
  0xf8   :  { %v380_v44 = vadd.f32 %v379_v41, %v358_v40  ;;  %v419_v45 = vadd.f32 %v418_v42, %v417_v31 }
  0xfa   :  { %381 = vst [vmem:[%s880_s3] sm:$0x1] %v380_v44  ;;  %v420_v46 = vadd.f32 %v419_v45, %v382_v43 }
  0xfc   :  { %421 = vst [vmem:[%s881_s4] sm:$0x1] %v420_v46 }

// kernel: discriminator_forward.12
= control target key start
LH: loop header
LB: loop body
LE: loop exit
PB: predicated region body
PF: predicated region fallthrough
CT: control target
= control target key end

     0   :  { %s340_s1 = inlined_call_operand.vmem [shape: f32[1,128], index: 1, kind: input, shape index: {}]   ;;  %s341_s2 = inlined_call_operand.vmem [shape: f32[1,128], index: 2, kind: input, shape index: {}]   ;;  %s342_s3 = inlined_call_operand.vmem [shape: f32[1,128], index: 3, kind: input, shape index: {}]   ;;  %s343_s0 = inlined_call_operand.vmem [shape: f32[128,128], index: 0, kind: input, shape index: {}]   ;;  %s344_s4 = inlined_call_operand.vmem [shape: f32[1,128], index: 4, kind: input, shape index: {}]   ;;  %s345_s5 = inlined_call_operand.vmem [shape: f32[128,128], index: 5, kind: output, shape index: {}]  }
   0x1   :  { %v20_v0 = vld [vmem:[%s340_s1] sm:$0x1]  ;;  %v43_v18 = vld [vmem:[%s343_s0 + $0x8] sm:$0xff]  ;;  %v44_v19 = vld [vmem:[%s343_s0 + $0x10] sm:$0xff] }
   0x2   :  { %v22_v1 = vld [vmem:[%s341_s2] sm:$0x1]  ;;  %v21_v2 = vmul.f32 0.0078125, %v20_v0  ;;  %v45_v20 = vld [vmem:[%s343_s0 + $0x18] sm:$0xff]  ;;  %v47_v24 = vld [vmem:[%s343_s0 + $0x28] sm:$0xff] }
   0x3   :  { %v23_v3 = vmul.f32 0.0078125, %v22_v1  ;;  %v37_v13 = vld [vmem:[%s342_s3] sm:$0x1]  ;;  %v48_v25 = vld [vmem:[%s343_s0 + $0x30] sm:$0xff]  ;;  %v49_v26 = vld [vmem:[%s343_s0 + $0x38] sm:$0xff] }
   0x4   :  { %v24_v4 = vmul.f32 %v21_v2, %v21_v2  ;;  %v39_v16 = vld [vmem:[%s344_s4] sm:$0x1]  ;;  %v51_v28 = vld [vmem:[%s343_s0 + $0x48] sm:$0xff]  ;;  %v52_v29 = vld [vmem:[%s343_s0 + $0x50] sm:$0xff] }
   0x5   :  { %v42_v17 = vld [vmem:[%s343_s0] sm:$0xff]  ;;  %v53_v34 = vld [vmem:[%s343_s0 + $0x58] sm:$0xff]  ;;  %v55_v36 = vld [vmem:[%s343_s0 + $0x68] sm:$0xff] }
   0x6   :  { %v25_v5 = vsub.f32 %v23_v3, %v24_v4  ;;  %v46_v21 = vld [vmem:[%s343_s0 + $0x20] sm:$0xff] }
   0x7   :  { %v50_v27 = vld [vmem:[%s343_s0 + $0x40] sm:$0xff] }
   0x8   :  { %v26_v6 = vadd.f32 1e-05, %v25_v5  ;;  %v54_v35 = vld [vmem:[%s343_s0 + $0x60] sm:$0xff] }
   0xa   :  { %164 = vrsqrt.f32 %v26_v6  ;;  %vm33_vm0 = vweird.f32 %v26_v6 }
  0x10   :  { %v165_v7 = vpop.eup %164 }
  0x11   :  { %v28_v8 = vmul.f32 %v165_v7, %v26_v6  ;;  %vm34_vm1 = vweird.f32 %v165_v7 }
  0x12   :  { %vm35_vm2 = vmor %vm33_vm0, %vm34_vm1 }
  0x13   :  { %v29_v9 = vmul.f32 %v165_v7, %v28_v8 }
  0x15   :  { %v30_v10 = vmul.f32 0.5, %v29_v9 }
  0x17   :  { %v31_v11 = vsub.f32 1.5, %v30_v10 }
  0x19   :  { %v32_v12 = vmul.f32 %v165_v7, %v31_v11 }
  0x1b   :  { %v36_v14 = vsel %vm35_vm2, %v165_v7, %v32_v12 }
  0x1c   :  { %v38_v15 = vmul.f32 %v37_v13, %v36_v14  ;;  %v56_v13 = vld [vmem:[%s343_s0 + $0x70] sm:$0xff] }
  0x1e   :  { %v40_v22 = vmul.f32 %v38_v15, %v21_v2  ;;  %v223_v23 = vperm.slane %v38_v15, 0 }
  0x20   :  { %v41_v30 = vsub.f32 %v39_v16, %v40_v22  ;;  %v61_v31 = vmul.f32 %v223_v23, %v42_v17  ;;  %v62_v32 = vmul.f32 %v223_v23, %v43_v18  ;;  %v63_v33 = vmul.f32 %v223_v23, %v44_v19  ;;  %v57_v16 = vld [vmem:[%s343_s0 + $0x78] sm:$0xff] }
  0x21   :  { %v64_v37 = vmul.f32 %v223_v23, %v45_v20  ;;  %v65_v38 = vmul.f32 %v223_v23, %v46_v21  ;;  %v66_v39 = vmul.f32 %v223_v23, %v47_v24  ;;  %v67_v40 = vmul.f32 %v223_v23, %v48_v25 }
  0x22   :  { %v259_v41 = vperm.slane %v41_v30, 0  ;;  %v68_v42 = vmul.f32 %v223_v23, %v49_v26  ;;  %v69_v43 = vmul.f32 %v223_v23, %v50_v27  ;;  %v70_v44 = vmul.f32 %v223_v23, %v51_v28 }
  0x23   :  { %v71_v45 = vmul.f32 %v223_v23, %v52_v29  ;;  %v72_v46 = vmul.f32 %v223_v23, %v53_v34  ;;  %v73_v47 = vmul.f32 %v223_v23, %v54_v35  ;;  %v74_v48 = vmul.f32 %v223_v23, %v55_v36 }
  0x24   :  { %v80_v49 = vadd.f32 %v259_v41, %v61_v31  ;;  %v81_v50 = vadd.f32 %v259_v41, %v62_v32  ;;  %v82_v51 = vadd.f32 %v259_v41, %v63_v33  ;;  %v83_v52 = vadd.f32 %v259_v41, %v64_v37 }
  0x25   :  { %v84_v53 = vadd.f32 %v259_v41, %v65_v38  ;;  %v85_v54 = vadd.f32 %v259_v41, %v66_v39  ;;  %v86_v55 = vadd.f32 %v259_v41, %v67_v40  ;;  %v87_v56 = vadd.f32 %v259_v41, %v68_v42 }
  0x26   :  { %vm96_vm3 = vcmp.gt.f32.partialorder %v80_v49, 0.0  ;;  %v112_v57 = vmul.f32 0.2, %v80_v49  ;;  %vm97_vm4 = vcmp.gt.f32.partialorder %v81_v50, 0.0  ;;  %v113_v58 = vmul.f32 0.2, %v81_v50 }
  0x27   :  { %vm98_vm5 = vcmp.gt.f32.partialorder %v82_v51, 0.0  ;;  %v114_v59 = vmul.f32 0.2, %v82_v51  ;;  %vm99_vm6 = vcmp.gt.f32.partialorder %v83_v52, 0.0  ;;  %v115_v60 = vmul.f32 0.2, %v83_v52 }
  0x28   :  { %v128_v61 = vsel %vm96_vm3, %v80_v49, %v112_v57  ;;  %v129_v62 = vsel %vm97_vm4, %v81_v50, %v113_v58  ;;  %vm100_vm7 = vcmp.gt.f32.partialorder %v84_v53, 0.0  ;;  %v116_v63 = vmul.f32 0.2, %v84_v53 }
  0x29   :  { %144 = vst [vmem:[%s345_s5] sm:$0xff] %v128_v61  ;;  %v130_v0 = vsel %vm98_vm5, %v82_v51, %v114_v59  ;;  %v131_v1 = vsel %vm99_vm6, %v83_v52, %v115_v60  ;;  %vm101_vm8 = vcmp.gt.f32.partialorder %v85_v54, 0.0  ;;  %v117_v2 = vmul.f32 0.2, %v85_v54 }
  0x2a   :  { %145 = vst [vmem:[%s345_s5 + $0x8] sm:$0xff] %v129_v62  ;;  %v132_v3 = vsel %vm100_vm7, %v84_v53, %v116_v63  ;;  %vm102_vm9 = vcmp.gt.f32.partialorder %v86_v55, 0.0  ;;  %v118_v4 = vmul.f32 0.2, %v86_v55  ;;  %vm103_vm10 = vcmp.gt.f32.partialorder %v87_v56, 0.0 }
  0x2b   :  { %146 = vst [vmem:[%s345_s5 + $0x10] sm:$0xff] %v130_v0  ;;  %v133_v5 = vsel %vm101_vm8, %v85_v54, %v117_v2  ;;  %v119_v6 = vmul.f32 0.2, %v87_v56  ;;  %v88_v7 = vadd.f32 %v259_v41, %v69_v43  ;;  %v89_v8 = vadd.f32 %v259_v41, %v70_v44 }
  0x2c   :  { %147 = vst [vmem:[%s345_s5 + $0x18] sm:$0xff] %v131_v1  ;;  %v134_v9 = vsel %vm102_vm9, %v86_v55, %v118_v4  ;;  %v90_v10 = vadd.f32 %v259_v41, %v71_v45  ;;  %v91_v11 = vadd.f32 %v259_v41, %v72_v46  ;;  %v92_v12 = vadd.f32 %v259_v41, %v73_v47 }
  0x2d   :  { %148 = vst [vmem:[%s345_s5 + $0x20] sm:$0xff] %v132_v3  ;;  %v135_v14 = vsel %vm103_vm10, %v87_v56, %v119_v6  ;;  %vm104_vm11 = vcmp.gt.f32.partialorder %v88_v7, 0.0  ;;  %v120_v15 = vmul.f32 0.2, %v88_v7  ;;  %vm105_vm12 = vcmp.gt.f32.partialorder %v89_v8, 0.0 }
  0x2e   :  { %149 = vst [vmem:[%s345_s5 + $0x28] sm:$0xff] %v133_v5  ;;  %v121_v17 = vmul.f32 0.2, %v89_v8  ;;  %vm106_vm13 = vcmp.gt.f32.partialorder %v90_v10, 0.0  ;;  %v122_v18 = vmul.f32 0.2, %v90_v10  ;;  %v93_v19 = vadd.f32 %v259_v41, %v74_v48 }
  0x2f   :  { %150 = vst [vmem:[%s345_s5 + $0x30] sm:$0xff] %v134_v9  ;;  %v136_v20 = vsel %vm104_vm11, %v88_v7, %v120_v15  ;;  %vm107_vm14 = vcmp.gt.f32.partialorder %v91_v11, 0.0  ;;  %v123_v21 = vmul.f32 0.2, %v91_v11  ;;  %vm108_vm15 = vcmp.gt.f32.partialorder %v92_v12, 0.0 }
  0x30   :  { %151 = vst [vmem:[%s345_s5 + $0x38] sm:$0xff] %v135_v14  ;;  %v137_v22 = vsel %vm105_vm12, %v89_v8, %v121_v17  ;;  %v138_v24 = vsel %vm106_vm13, %v90_v10, %v122_v18  ;;  %v124_v25 = vmul.f32 0.2, %v92_v12  ;;  %vm109_vm0 = vcmp.gt.f32.partialorder %v93_v19, 0.0 }
  0x31   :  { %152 = vst [vmem:[%s345_s5 + $0x40] sm:$0xff] %v136_v20  ;;  %v139_v26 = vsel %vm107_vm14, %v91_v11, %v123_v21  ;;  %v125_v27 = vmul.f32 0.2, %v93_v19  ;;  %v75_v28 = vmul.f32 %v223_v23, %v56_v13  ;;  %v76_v29 = vmul.f32 %v223_v23, %v57_v16 }
  0x32   :  { %153 = vst [vmem:[%s345_s5 + $0x48] sm:$0xff] %v137_v22  ;;  %v140_v30 = vsel %vm108_vm15, %v92_v12, %v124_v25 }
  0x33   :  { %154 = vst [vmem:[%s345_s5 + $0x50] sm:$0xff] %v138_v24  ;;  %v141_v31 = vsel %vm109_vm0, %v93_v19, %v125_v27  ;;  %v94_v32 = vadd.f32 %v259_v41, %v75_v28  ;;  %v95_v33 = vadd.f32 %v259_v41, %v76_v29 }
  0x34   :  { %155 = vst [vmem:[%s345_s5 + $0x58] sm:$0xff] %v139_v26 }
  0x35   :  { %156 = vst [vmem:[%s345_s5 + $0x60] sm:$0xff] %v140_v30  ;;  %vm110_vm1 = vcmp.gt.f32.partialorder %v94_v32, 0.0  ;;  %v126_v23 = vmul.f32 0.2, %v94_v32  ;;  %vm111_vm2 = vcmp.gt.f32.partialorder %v95_v33, 0.0 }
  0x36   :  { %157 = vst [vmem:[%s345_s5 + $0x68] sm:$0xff] %v141_v31  ;;  %v127_v34 = vmul.f32 0.2, %v95_v33 }
  0x37   :  { %v142_v35 = vsel %vm110_vm1, %v94_v32, %v126_v23 }
  0x38   :  { %158 = vst [vmem:[%s345_s5 + $0x70] sm:$0xff] %v142_v35  ;;  %v143_v36 = vsel %vm111_vm2, %v95_v33, %v127_v34 }
  0x39   :  { %159 = vst [vmem:[%s345_s5 + $0x78] sm:$0xff] %v143_v36 }

// kernel: discriminator_forward.14
= control target key start
LH: loop header
LB: loop body
LE: loop exit
PB: predicated region body
PF: predicated region fallthrough
CT: control target
= control target key end

     0   :  { %s148_s1 = inlined_call_operand.vmem [shape: f32[1,128], index: 1, kind: input, shape index: {}]   ;;  %s149_s2 = inlined_call_operand.vmem [shape: f32[1,128], index: 2, kind: input, shape index: {}]   ;;  %s150_s3 = inlined_call_operand.vmem [shape: f32[1,128], index: 3, kind: input, shape index: {}]   ;;  %s151_s4 = inlined_call_operand.vmem [shape: f32[1,128], index: 4, kind: input, shape index: {}]   ;;  %s152_s0 = inlined_call_operand.vmem [shape: f32[32,128], index: 0, kind: input, shape index: {}]   ;;  %s153_s5 = inlined_call_operand.vmem [shape: f32[32,128], index: 5, kind: output, shape index: {}]  }
   0x1   :  { %v20_v0 = vld [vmem:[%s148_s1] sm:$0x1]  ;;  %v43_v18 = vld [vmem:[%s152_s0 + $0x8] sm:$0xff]  ;;  %v44_v19 = vld [vmem:[%s152_s0 + $0x10] sm:$0xff] }
   0x2   :  { %v22_v1 = vld [vmem:[%s149_s2] sm:$0x1]  ;;  %v21_v2 = vmul.f32 0.03125, %v20_v0  ;;  %v45_v22 = vld [vmem:[%s152_s0 + $0x18] sm:$0xff] }
   0x3   :  { %v23_v3 = vmul.f32 0.03125, %v22_v1  ;;  %v37_v13 = vld [vmem:[%s150_s3] sm:$0x1] }
   0x4   :  { %v24_v4 = vmul.f32 %v21_v2, %v21_v2  ;;  %v39_v16 = vld [vmem:[%s151_s4] sm:$0x1] }
   0x5   :  { %v42_v17 = vld [vmem:[%s152_s0] sm:$0xff] }
   0x6   :  { %v25_v5 = vsub.f32 %v23_v3, %v24_v4 }
   0x8   :  { %v26_v6 = vadd.f32 1e-05, %v25_v5 }
   0xa   :  { %80 = vrsqrt.f32 %v26_v6  ;;  %vm33_vm0 = vweird.f32 %v26_v6 }
  0x10   :  { %v81_v7 = vpop.eup %80 }
  0x11   :  { %v28_v8 = vmul.f32 %v81_v7, %v26_v6  ;;  %vm34_vm1 = vweird.f32 %v81_v7 }
  0x12   :  { %vm35_vm2 = vmor %vm33_vm0, %vm34_vm1 }
  0x13   :  { %v29_v9 = vmul.f32 %v81_v7, %v28_v8 }
  0x15   :  { %v30_v10 = vmul.f32 0.5, %v29_v9 }
  0x17   :  { %v31_v11 = vsub.f32 1.5, %v30_v10 }
  0x19   :  { %v32_v12 = vmul.f32 %v81_v7, %v31_v11 }
  0x1b   :  { %v36_v14 = vsel %vm35_vm2, %v81_v7, %v32_v12 }
  0x1c   :  { %v38_v15 = vmul.f32 %v37_v13, %v36_v14 }
  0x1e   :  { %v40_v20 = vmul.f32 %v38_v15, %v21_v2  ;;  %v47_v21 = vperm.slane %v38_v15, 0 }
  0x20   :  { %v41_v23 = vsub.f32 %v39_v16, %v40_v20  ;;  %v49_v24 = vmul.f32 %v47_v21, %v42_v17  ;;  %v50_v25 = vmul.f32 %v47_v21, %v43_v18  ;;  %v51_v26 = vmul.f32 %v47_v21, %v44_v19 }
  0x21   :  { %v52_v27 = vmul.f32 %v47_v21, %v45_v22 }
  0x22   :  { %v54_v28 = vperm.slane %v41_v23, 0 }
  0x24   :  { %v56_v29 = vadd.f32 %v54_v28, %v49_v24  ;;  %v57_v30 = vadd.f32 %v54_v28, %v50_v25  ;;  %v58_v31 = vadd.f32 %v54_v28, %v51_v26  ;;  %v59_v32 = vadd.f32 %v54_v28, %v52_v27 }
  0x26   :  { %vm60_vm3 = vcmp.gt.f32.partialorder %v56_v29, 0.0  ;;  %v64_v33 = vmul.f32 0.2, %v56_v29  ;;  %vm61_vm4 = vcmp.gt.f32.partialorder %v57_v30, 0.0  ;;  %v65_v34 = vmul.f32 0.2, %v57_v30 }
  0x27   :  { %vm62_vm5 = vcmp.gt.f32.partialorder %v58_v31, 0.0  ;;  %v66_v35 = vmul.f32 0.2, %v58_v31  ;;  %vm63_vm6 = vcmp.gt.f32.partialorder %v59_v32, 0.0  ;;  %v67_v36 = vmul.f32 0.2, %v59_v32 }
  0x28   :  { %v68_v37 = vsel %vm60_vm3, %v56_v29, %v64_v33  ;;  %v69_v38 = vsel %vm61_vm4, %v57_v30, %v65_v34 }
  0x29   :  { %72 = vst [vmem:[%s153_s5] sm:$0xff] %v68_v37  ;;  %v70_v39 = vsel %vm62_vm5, %v58_v31, %v66_v35  ;;  %v71_v40 = vsel %vm63_vm6, %v59_v32, %v67_v36 }
  0x2a   :  { %73 = vst [vmem:[%s153_s5 + $0x8] sm:$0xff] %v69_v38 }
  0x2b   :  { %74 = vst [vmem:[%s153_s5 + $0x10] sm:$0xff] %v70_v39 }
  0x2c   :  { %75 = vst [vmem:[%s153_s5 + $0x18] sm:$0xff] %v71_v40 }

// kernel: discriminator_forward.13
= control target key start
LH: loop header
LB: loop body
LE: loop exit
PB: predicated region body
PF: predicated region fallthrough
CT: control target
= control target key end

     0   :  { %v645_v58 = vmov 0.0   ;;  %s845_s1 = inlined_call_operand.vmem [shape: bf16[512,128], index: 1, kind: input, shape index: {}]   ;;  %s846_s0 = inlined_call_operand.vmem [shape: bf16[32,512], index: 0, kind: input, shape index: {}]   ;;  %s847_s3 = inlined_call_operand.vmem [shape: f32[1,128], index: 3, kind: output, shape index: {1}]   ;;  %s848_s4 = inlined_call_operand.vmem [shape: f32[1,128], index: 4, kind: output, shape index: {2}]   ;;  %s849_s2 = inlined_call_operand.vmem [shape: f32[32,128], index: 2, kind: output, shape index: {0}]  }
   0x1   :  { %v619_v0 = vld [vmem:[%s845_s1 + $0x38] sm:$0xff]  ;;  %v618_v4 = vld [vmem:[%s845_s1 + $0x30] sm:$0xff]  ;;  %v617_v8 = vld [vmem:[%s845_s1 + $0x28] sm:$0xff]  ;;  %18 = vst [vmem:[%s847_s3] sm:$0x1] %v645_v58 }
   0x2   :  { %v627_v1 = vld [vmem:[%s845_s1 + $0x78] sm:$0xff]  ;;  %324 = vmatpush.bf16.msra.mxu0 %v619_v0  ;;  %v626_v5 = vld [vmem:[%s845_s1 + $0x70] sm:$0xff]  ;;  %v625_v9 = vld [vmem:[%s845_s1 + $0x68] sm:$0xff]  ;;  %19 = vst [vmem:[%s848_s4] sm:$0x1] %v645_v58 }
   0x3   :  { %v635_v2 = vld [vmem:[%s845_s1 + $0xb8] sm:$0xff]  ;;  %343 = vmatpush.bf16.msra.mxu1 %v627_v1  ;;  %v634_v6 = vld [vmem:[%s845_s1 + $0xb0] sm:$0xff]  ;;  %v633_v10 = vld [vmem:[%s845_s1 + $0xa8] sm:$0xff] }
   0x4   :  { %v643_v3 = vld [vmem:[%s845_s1 + $0xf8] sm:$0xff]  ;;  %362 = vmatpush.bf16.msra.mxu2 %v635_v2  ;;  %v642_v7 = vld [vmem:[%s845_s1 + $0xf0] sm:$0xff]  ;;  %v641_v11 = vld [vmem:[%s845_s1 + $0xe8] sm:$0xff] }
   0x5   :  { %381 = vmatpush.bf16.msra.mxu3 %v643_v3  ;;  %v616_v12 = vld [vmem:[%s845_s1 + $0x20] sm:$0xff]  ;;  %v615_v16 = vld [vmem:[%s845_s1 + $0x18] sm:$0xff]  ;;  %v614_v20 = vld [vmem:[%s845_s1 + $0x10] sm:$0xff] }
   0x6   :  { %325 = vmatpush.bf16.msra.mxu0 %v618_v4  ;;  %v624_v13 = vld [vmem:[%s845_s1 + $0x60] sm:$0xff]  ;;  %v623_v17 = vld [vmem:[%s845_s1 + $0x58] sm:$0xff]  ;;  %v622_v21 = vld [vmem:[%s845_s1 + $0x50] sm:$0xff] }
   0x7   :  { %344 = vmatpush.bf16.msra.mxu1 %v626_v5  ;;  %v632_v14 = vld [vmem:[%s845_s1 + $0xa0] sm:$0xff]  ;;  %v631_v18 = vld [vmem:[%s845_s1 + $0x98] sm:$0xff]  ;;  %v630_v22 = vld [vmem:[%s845_s1 + $0x90] sm:$0xff] }
   0x8   :  { %363 = vmatpush.bf16.msra.mxu2 %v634_v6  ;;  %v640_v15 = vld [vmem:[%s845_s1 + $0xe0] sm:$0xff]  ;;  %v639_v19 = vld [vmem:[%s845_s1 + $0xd8] sm:$0xff]  ;;  %v638_v23 = vld [vmem:[%s845_s1 + $0xd0] sm:$0xff] }
   0x9   :  { %382 = vmatpush.bf16.msra.mxu3 %v642_v7  ;;  %v613_v24 = vld [vmem:[%s845_s1 + $0x8] sm:$0xff]  ;;  %v612_v28 = vld [vmem:[%s845_s1] sm:$0xff]  ;;  %v606_v33 = vld [vmem:[%s846_s0 + $0xc] sm:$0xf0] }
   0xa   :  { %326 = vmatpush.bf16.msra.mxu0 %v617_v8  ;;  %v621_v25 = vld [vmem:[%s845_s1 + $0x48] sm:$0xff]  ;;  %v620_v29 = vld [vmem:[%s845_s1 + $0x40] sm:$0xff]  ;;  %v448_v35 = vld [vmem:[%s846_s0 + $0x10] sm:$0xf0] }
   0xb   :  { %345 = vmatpush.bf16.msra.mxu1 %v625_v9  ;;  %v629_v26 = vld [vmem:[%s845_s1 + $0x88] sm:$0xff]  ;;  %v628_v30 = vld [vmem:[%s845_s1 + $0x80] sm:$0xff]  ;;  %v607_v37 = vld [vmem:[%s846_s0 + $0x14] sm:$0xf0] }
   0xc   :  { %364 = vmatpush.bf16.msra.mxu2 %v633_v10  ;;  %v637_v27 = vld [vmem:[%s845_s1 + $0xc8] sm:$0xff]  ;;  %v636_v31 = vld [vmem:[%s845_s1 + $0xc0] sm:$0xff]  ;;  %v456_v39 = vld [vmem:[%s846_s0 + $0x18] sm:$0xf0] }
   0xd   :  { %383 = vmatpush.bf16.msra.mxu3 %v641_v11  ;;  %v446_v32 = vld [vmem:[%s846_s0] sm:$0xf]  ;;  %v604_v34 = vld [vmem:[%s846_s0 + $0x4] sm:$0xf]  ;;  %v454_v36 = vld [vmem:[%s846_s0 + $0x8] sm:$0xf] }
   0xe   :  { %327 = vmatpush.bf16.msra.mxu0 %v616_v12  ;;  %v605_v38 = vld [vmem:[%s846_s0 + $0xc] sm:$0xf]  ;;  %v447_v40 = vor.u32 %v606_v33, %v446_v32  ;;  %v451_v41 = vor.u32 %v604_v34, %v448_v35  ;;  %v455_v42 = vor.u32 %v607_v37, %v454_v36  ;;  %v462_v44 = vld [vmem:[%s846_s0 + $0x20] sm:$0xf]  ;;  %v610_v45 = vld [vmem:[%s846_s0 + $0x2c] sm:$0xf0] }
   0xf   :  { %346 = vmatpush.bf16.msra.mxu1 %v624_v13  ;;  %v459_v43 = vor.u32 %v605_v38, %v456_v39  ;;  %v608_v46 = vld [vmem:[%s846_s0 + $0x24] sm:$0xf]  ;;  %v464_v47 = vld [vmem:[%s846_s0 + $0x30] sm:$0xf0]  ;;  %v470_v48 = vld [vmem:[%s846_s0 + $0x28] sm:$0xf]  ;;  %v463_v52 = vor.u32 %v610_v45, %v462_v44 }
  0x10   :  { %365 = vmatpush.bf16.msra.mxu2 %v632_v14  ;;  %v611_v49 = vld [vmem:[%s846_s0 + $0x34] sm:$0xf0]  ;;  %v609_v50 = vld [vmem:[%s846_s0 + $0x2c] sm:$0xf]  ;;  %v472_v51 = vld [vmem:[%s846_s0 + $0x38] sm:$0xf0]  ;;  %v467_v53 = vor.u32 %v608_v46, %v464_v47 }
  0x11   :  { %384 = vmatpush.bf16.msra.mxu3 %v640_v15  ;;  %v471_v54 = vor.u32 %v611_v49, %v470_v48  ;;  %v475_v55 = vor.u32 %v609_v50, %v472_v51 }
  0x12   :  { %328 = vmatpush.bf16.msra.mxu0 %v615_v16 }
  0x13   :  { %347 = vmatpush.bf16.msra.mxu1 %v623_v17 }
  0x14   :  { %366 = vmatpush.bf16.msra.mxu2 %v631_v18 }
  0x15   :  { %385 = vmatpush.bf16.msra.mxu3 %v639_v19 }
  0x16   :  { %329 = vmatpush.bf16.msra.mxu0 %v614_v20 }
  0x17   :  { %348 = vmatpush.bf16.msra.mxu1 %v622_v21 }
  0x18   :  { %367 = vmatpush.bf16.msra.mxu2 %v630_v22 }
  0x19   :  { %386 = vmatpush.bf16.msra.mxu3 %v638_v23 }
  0x1a   :  { %330 = vmatpush.bf16.msra.mxu0 %v613_v24 }
  0x1b   :  { %349 = vmatpush.bf16.msra.mxu1 %v621_v25 }
  0x1c   :  { %368 = vmatpush.bf16.msra.mxu2 %v629_v26 }
  0x1d   :  { %387 = vmatpush.bf16.msra.mxu3 %v637_v27 }
  0x1e   :  { %331 = vmatpush.bf16.msra.mxu0 %v612_v28 }
  0x1f   :  { %350 = vmatpush.bf16.msra.mxu1 %v620_v29 }
  0x20   :  { %369 = vmatpush.bf16.msra.mxu2 %v628_v30 }
  0x21   :  { %388 = vmatpush.bf16.msra.mxu3 %v636_v31  ;;  %332 = vmatmul.bf16.vlgmr.msra.gmra.mxu0 %v447_v40  ;;  %v404_v40 = vld [vmem:[%s847_s3] sm:$0x1] }
  0x22   :  { %351 = vmatmul.bf16.vlgmr.msra.gmra.mxu1 %v451_v41 }
  0x23   :  { %370 = vmatmul.bf16.vlgmr.msra.gmra.mxu2 %v455_v42 }
  0x24   :  { %389 = vmatmul.bf16.vlgmr.msra.gmra.mxu3 %v459_v43  ;;  %v416_v43 = vld [vmem:[%s848_s4] sm:$0x1] }
  0x31   :  { %337 = vmatmul.bf16.gmra.mxu0 %v463_v52 }
  0x32   :  { %356 = vmatmul.bf16.gmra.mxu1 %v467_v53 }
  0x33   :  { %375 = vmatmul.bf16.gmra.mxu2 %v471_v54 }
  0x34   :  { %394 = vmatmul.bf16.gmra.mxu3 %v475_v55 }
  0x9e   :  { %v333_v56 = vpop.f32.mrf.mxu0 }
  0x9f   :  { %v352_v57 = vpop.f32.mrf.mxu1 }
  0xa0   :  { %v353_v59 = vadd.f32 %v352_v57, %v333_v56 }
  0xa6   :  { %v371_v60 = vpop.f32.mrf.mxu2  ;;  %v335_v63 = vpop.f32.mrf.mxu0 }
  0xa7   :  { %v390_v61 = vpop.f32.mrf.mxu3  ;;  %v372_v62 = vadd.f32 %v371_v60, %v353_v59  ;;  %v354_v0 = vpop.f32.mrf.mxu1 }
  0xa8   :  { %v355_v2 = vadd.f32 %v354_v0, %v335_v63 }
  0xa9   :  { %v391_v1 = vadd.f32 %v390_v61, %v372_v62 }
  0xab   :  { %400 = vst [vmem:[%s849_s2] sm:$0xff] %v391_v1  ;;  %v417_v19 = vmul.f32 %v391_v1, %v391_v1 }
  0xae   :  { %v373_v3 = vpop.f32.mrf.mxu2  ;;  %v338_v6 = vpop.f32.mrf.mxu0 }
  0xaf   :  { %v392_v4 = vpop.f32.mrf.mxu3  ;;  %v374_v5 = vadd.f32 %v373_v3, %v355_v2  ;;  %v357_v7 = vpop.f32.mrf.mxu1 }
  0xb0   :  { %v358_v9 = vadd.f32 %v357_v7, %v338_v6 }
  0xb1   :  { %v393_v8 = vadd.f32 %v392_v4, %v374_v5 }
  0xb3   :  { %401 = vst [vmem:[%s849_s2 + $0x8] sm:$0xff] %v393_v8  ;;  %v418_v16 = vmul.f32 %v393_v8, %v393_v8  ;;  %v405_v20 = vadd.f32 %v393_v8, %v391_v1 }
  0xb5   :  { %v421_v24 = vadd.f32 %v418_v16, %v417_v19 }
  0xb6   :  { %v376_v10 = vpop.f32.mrf.mxu2  ;;  %v340_v14 = vpop.f32.mrf.mxu0 }
  0xb7   :  { %v395_v11 = vpop.f32.mrf.mxu3  ;;  %v377_v12 = vadd.f32 %v376_v10, %v358_v9  ;;  %v359_v15 = vpop.f32.mrf.mxu1 }
  0xb8   :  { %v360_v17 = vadd.f32 %v359_v15, %v340_v14 }
  0xb9   :  { %v396_v13 = vadd.f32 %v395_v11, %v377_v12 }
  0xbb   :  { %402 = vst [vmem:[%s849_s2 + $0x10] sm:$0xff] %v396_v13  ;;  %v419_v21 = vmul.f32 %v396_v13, %v396_v13  ;;  %v406_v25 = vadd.f32 %v405_v20, %v396_v13 }
  0xbd   :  { %v422_v27 = vadd.f32 %v421_v24, %v419_v21 }
  0xbe   :  { %v378_v18 = vpop.f32.mrf.mxu2 }
  0xbf   :  { %v379_v22 = vadd.f32 %v378_v18, %v360_v17  ;;  %v397_v23 = vpop.f32.mrf.mxu3 }
  0xc1   :  { %v398_v26 = vadd.f32 %v397_v23, %v379_v22 }
  0xc3   :  { %403 = vst [vmem:[%s849_s2 + $0x18] sm:$0xff] %v398_v26  ;;  %v407_v28 = vadd.f32 %v406_v25, %v398_v26  ;;  %v420_v29 = vmul.f32 %v398_v26, %v398_v26 }
  0xc5   :  { %v408_v30 = vrot.slane %v407_v28, 4  ;;  %v423_v31 = vadd.f32 %v422_v27, %v420_v29 }
  0xc7   :  { %v409_v32 = vadd.f32 %v408_v30, %v407_v28  ;;  %v424_v33 = vrot.slane %v423_v31, 4 }
  0xc9   :  { %v410_v34 = vrot.slane %v409_v32, 2  ;;  %v425_v35 = vadd.f32 %v424_v33, %v423_v31 }
  0xcb   :  { %v411_v36 = vadd.f32 %v410_v34, %v409_v32  ;;  %v426_v37 = vrot.slane %v425_v35, 2 }
  0xcd   :  { %v412_v38 = vrot.slane %v411_v36, 1  ;;  %v427_v39 = vadd.f32 %v426_v37, %v425_v35 }
  0xcf   :  { %v413_v41 = vadd.f32 %v412_v38, %v411_v36  ;;  %v428_v42 = vrot.slane %v427_v39, 1 }
  0xd1   :  { %v414_v44 = vadd.f32 %v413_v41, %v404_v40  ;;  %v429_v45 = vadd.f32 %v428_v42, %v427_v39 }
  0xd3   :  { %415 = vst [vmem:[%s847_s3] sm:$0x1] %v414_v44  ;;  %v430_v46 = vadd.f32 %v429_v45, %v416_v43 }
  0xd5   :  { %431 = vst [vmem:[%s848_s4] sm:$0x1] %v430_v46 }

// kernel: discriminator_forward.15
= control target key start
LH: loop header
LB: loop body
LE: loop exit
PB: predicated region body
PF: predicated region fallthrough
CT: control target
= control target key end

     0   :  { %s1230_s1 = inlined_call_operand.vmem [shape: bf16[1024,128], index: 1, kind: input, shape index: {}]   ;;  %s1231_s0 = inlined_call_operand.vmem [shape: bf16[8,1024], index: 0, kind: input, shape index: {}]   ;;  %s1232_s2 = inlined_call_operand.vmem [shape: f32[8,128], index: 2, kind: output, shape index: {}]  }
   0x1   :  { %v947_v0 = vld [vmem:[%s1230_s1 + $0x38] sm:$0xff]  ;;  %v946_v4 = vld [vmem:[%s1230_s1 + $0x30] sm:$0xff]  ;;  %v945_v8 = vld [vmem:[%s1230_s1 + $0x28] sm:$0xff] }
   0x2   :  { %v955_v1 = vld [vmem:[%s1230_s1 + $0x78] sm:$0xff]  ;;  %555 = vmatpush.bf16.msra.mxu0 %v947_v0  ;;  %v954_v5 = vld [vmem:[%s1230_s1 + $0x70] sm:$0xff]  ;;  %v953_v9 = vld [vmem:[%s1230_s1 + $0x68] sm:$0xff] }
   0x3   :  { %v963_v2 = vld [vmem:[%s1230_s1 + $0xb8] sm:$0xff]  ;;  %568 = vmatpush.bf16.msra.mxu1 %v955_v1  ;;  %v962_v6 = vld [vmem:[%s1230_s1 + $0xb0] sm:$0xff]  ;;  %v961_v10 = vld [vmem:[%s1230_s1 + $0xa8] sm:$0xff] }
   0x4   :  { %v971_v3 = vld [vmem:[%s1230_s1 + $0xf8] sm:$0xff]  ;;  %581 = vmatpush.bf16.msra.mxu2 %v963_v2  ;;  %v970_v7 = vld [vmem:[%s1230_s1 + $0xf0] sm:$0xff]  ;;  %v969_v11 = vld [vmem:[%s1230_s1 + $0xe8] sm:$0xff] }
   0x5   :  { %594 = vmatpush.bf16.msra.mxu3 %v971_v3  ;;  %v944_v12 = vld [vmem:[%s1230_s1 + $0x20] sm:$0xff]  ;;  %v943_v16 = vld [vmem:[%s1230_s1 + $0x18] sm:$0xff]  ;;  %v942_v20 = vld [vmem:[%s1230_s1 + $0x10] sm:$0xff] }
   0x6   :  { %556 = vmatpush.bf16.msra.mxu0 %v946_v4  ;;  %v952_v13 = vld [vmem:[%s1230_s1 + $0x60] sm:$0xff]  ;;  %v951_v17 = vld [vmem:[%s1230_s1 + $0x58] sm:$0xff]  ;;  %v950_v21 = vld [vmem:[%s1230_s1 + $0x50] sm:$0xff] }
   0x7   :  { %569 = vmatpush.bf16.msra.mxu1 %v954_v5  ;;  %v960_v14 = vld [vmem:[%s1230_s1 + $0xa0] sm:$0xff]  ;;  %v959_v18 = vld [vmem:[%s1230_s1 + $0x98] sm:$0xff]  ;;  %v958_v22 = vld [vmem:[%s1230_s1 + $0x90] sm:$0xff] }
   0x8   :  { %582 = vmatpush.bf16.msra.mxu2 %v962_v6  ;;  %v968_v15 = vld [vmem:[%s1230_s1 + $0xe0] sm:$0xff]  ;;  %v967_v19 = vld [vmem:[%s1230_s1 + $0xd8] sm:$0xff]  ;;  %v966_v23 = vld [vmem:[%s1230_s1 + $0xd0] sm:$0xff] }
   0x9   :  { %595 = vmatpush.bf16.msra.mxu3 %v970_v7  ;;  %v941_v24 = vld [vmem:[%s1230_s1 + $0x8] sm:$0xff]  ;;  %v11_v29 = vld [vmem:[%s1231_s0] sm:$0xff]  ;;  %v979_v38 = vld [vmem:[%s1230_s1 + $0x138] sm:$0xff] }
   0xa   :  { %557 = vmatpush.bf16.msra.mxu0 %v945_v8  ;;  %v949_v25 = vld [vmem:[%s1230_s1 + $0x48] sm:$0xff]  ;;  %v940_v30 = vld [vmem:[%s1230_s1] sm:$0xff]  ;;  %v147_v33 = vunpack.c.l.b16 %v11_v29  ;;  %v148_v37 = vunpack.c.h.b16 %v11_v29  ;;  %v987_v39 = vld [vmem:[%s1230_s1 + $0x178] sm:$0xff] }
   0xb   :  { %570 = vmatpush.bf16.msra.mxu1 %v953_v9  ;;  %v957_v26 = vld [vmem:[%s1230_s1 + $0x88] sm:$0xff]  ;;  %v948_v31 = vld [vmem:[%s1230_s1 + $0x40] sm:$0xff]  ;;  %v995_v40 = vld [vmem:[%s1230_s1 + $0x1b8] sm:$0xff] }
   0xc   :  { %583 = vmatpush.bf16.msra.mxu2 %v961_v10  ;;  %v965_v27 = vld [vmem:[%s1230_s1 + $0xc8] sm:$0xff]  ;;  %v956_v34 = vld [vmem:[%s1230_s1 + $0x80] sm:$0xff]  ;;  %v1003_v41 = vld [vmem:[%s1230_s1 + $0x1f8] sm:$0xff]  ;;  %v155_v43 = vpack.c.b16 %v147_v33, %v147_v33  ;;  %v156_v45 = vpack.c.b16 %v148_v37, %v148_v37 }
   0xd   :  { %596 = vmatpush.bf16.msra.mxu3 %v969_v11  ;;  %v12_v28 = vld [vmem:[%s1231_s0 + $0x8] sm:$0xff]  ;;  %v964_v35 = vld [vmem:[%s1230_s1 + $0xc0] sm:$0xff]  ;;  %v978_v46 = vld [vmem:[%s1230_s1 + $0x130] sm:$0xff] }
   0xe   :  { %558 = vmatpush.bf16.msra.mxu0 %v944_v12  ;;  %v149_v32 = vunpack.c.l.b16 %v12_v28  ;;  %v150_v36 = vunpack.c.h.b16 %v12_v28  ;;  %v986_v47 = vld [vmem:[%s1230_s1 + $0x170] sm:$0xff]  ;;  %v977_v50 = vld [vmem:[%s1230_s1 + $0x128] sm:$0xff]  ;;  %v976_v54 = vld [vmem:[%s1230_s1 + $0x120] sm:$0xff] }
   0xf   :  { %571 = vmatpush.bf16.msra.mxu1 %v952_v13  ;;  %v994_v48 = vld [vmem:[%s1230_s1 + $0x1b0] sm:$0xff]  ;;  %v985_v51 = vld [vmem:[%s1230_s1 + $0x168] sm:$0xff]  ;;  %v984_v55 = vld [vmem:[%s1230_s1 + $0x160] sm:$0xff] }
  0x10   :  { %584 = vmatpush.bf16.msra.mxu2 %v960_v14  ;;  %v157_v42 = vpack.c.b16 %v149_v32, %v149_v32  ;;  %v158_v44 = vpack.c.b16 %v150_v36, %v150_v36  ;;  %v1002_v49 = vld [vmem:[%s1230_s1 + $0x1f0] sm:$0xff]  ;;  %v993_v52 = vld [vmem:[%s1230_s1 + $0x1a8] sm:$0xff]  ;;  %v992_v56 = vld [vmem:[%s1230_s1 + $0x1a0] sm:$0xff] }
  0x11   :  { %597 = vmatpush.bf16.msra.mxu3 %v968_v15  ;;  %v1001_v53 = vld [vmem:[%s1230_s1 + $0x1e8] sm:$0xff]  ;;  %v1000_v57 = vld [vmem:[%s1230_s1 + $0x1e0] sm:$0xff]  ;;  %v975_v58 = vld [vmem:[%s1230_s1 + $0x118] sm:$0xff] }
  0x12   :  { %559 = vmatpush.bf16.msra.mxu0 %v943_v16  ;;  %v983_v59 = vld [vmem:[%s1230_s1 + $0x158] sm:$0xff]  ;;  %v974_v62 = vld [vmem:[%s1230_s1 + $0x110] sm:$0xff]  ;;  %v973_v2 = vld [vmem:[%s1230_s1 + $0x108] sm:$0xff] }
  0x13   :  { %572 = vmatpush.bf16.msra.mxu1 %v951_v17  ;;  %v991_v60 = vld [vmem:[%s1230_s1 + $0x198] sm:$0xff]  ;;  %v982_v63 = vld [vmem:[%s1230_s1 + $0x150] sm:$0xff]  ;;  %v981_v3 = vld [vmem:[%s1230_s1 + $0x148] sm:$0xff] }
  0x14   :  { %585 = vmatpush.bf16.msra.mxu2 %v959_v18  ;;  %v999_v61 = vld [vmem:[%s1230_s1 + $0x1d8] sm:$0xff]  ;;  %v990_v0 = vld [vmem:[%s1230_s1 + $0x190] sm:$0xff]  ;;  %v989_v5 = vld [vmem:[%s1230_s1 + $0x188] sm:$0xff] }
  0x15   :  { %598 = vmatpush.bf16.msra.mxu3 %v967_v19  ;;  %v998_v1 = vld [vmem:[%s1230_s1 + $0x1d0] sm:$0xff]  ;;  %v997_v6 = vld [vmem:[%s1230_s1 + $0x1c8] sm:$0xff]  ;;  %v14_v7 = vld [vmem:[%s1231_s0 + $0x18] sm:$0xff] }
  0x16   :  { %560 = vmatpush.bf16.msra.mxu0 %v942_v20  ;;  %v13_v4 = vld [vmem:[%s1231_s0 + $0x10] sm:$0xff]  ;;  %v972_v10 = vld [vmem:[%s1230_s1 + $0x100] sm:$0xff]  ;;  %v153_v12 = vunpack.c.l.b16 %v14_v7  ;;  %v154_v13 = vunpack.c.h.b16 %v14_v7 }
  0x17   :  { %573 = vmatpush.bf16.msra.mxu1 %v950_v21  ;;  %v151_v8 = vunpack.c.l.b16 %v13_v4  ;;  %v152_v9 = vunpack.c.h.b16 %v13_v4  ;;  %v980_v11 = vld [vmem:[%s1230_s1 + $0x140] sm:$0xff] }
  0x18   :  { %586 = vmatpush.bf16.msra.mxu2 %v958_v22  ;;  %v988_v14 = vld [vmem:[%s1230_s1 + $0x180] sm:$0xff]  ;;  %v161_v18 = vpack.c.b16 %v153_v12, %v153_v12  ;;  %v162_v19 = vpack.c.b16 %v154_v13, %v154_v13 }
  0x19   :  { %599 = vmatpush.bf16.msra.mxu3 %v966_v23  ;;  %v996_v15 = vld [vmem:[%s1230_s1 + $0x1c0] sm:$0xff]  ;;  %v159_v16 = vpack.c.b16 %v151_v8, %v151_v8  ;;  %v160_v17 = vpack.c.b16 %v152_v9, %v152_v9 }
  0x1a   :  { %561 = vmatpush.bf16.msra.mxu0 %v941_v24 }
  0x1b   :  { %574 = vmatpush.bf16.msra.mxu1 %v949_v25 }
  0x1c   :  { %587 = vmatpush.bf16.msra.mxu2 %v957_v26 }
  0x1d   :  { %600 = vmatpush.bf16.msra.mxu3 %v965_v27 }
  0x1e   :  { %562 = vmatpush.bf16.msra.mxu0 %v940_v30 }
  0x1f   :  { %575 = vmatpush.bf16.msra.mxu1 %v948_v31 }
  0x20   :  { %588 = vmatpush.bf16.msra.mxu2 %v956_v34 }
  0x21   :  { %601 = vmatpush.bf16.msra.mxu3 %v964_v35  ;;  %563 = vmatmul.bf16.vlgmr.msra.gmra.mxu0 %v155_v43 }
  0x22   :  { %607 = vmatpush.bf16.msrb.mxu0 %v979_v38  ;;  %576 = vmatmul.bf16.vlgmr.msra.gmra.mxu1 %v156_v45 }
  0x23   :  { %620 = vmatpush.bf16.msrb.mxu1 %v987_v39  ;;  %589 = vmatmul.bf16.vlgmr.msra.gmra.mxu2 %v157_v42 }
  0x24   :  { %633 = vmatpush.bf16.msrb.mxu2 %v995_v40  ;;  %602 = vmatmul.bf16.vlgmr.msra.gmra.mxu3 %v158_v44 }
  0x25   :  { %646 = vmatpush.bf16.msrb.mxu3 %v1003_v41 }
  0x26   :  { %608 = vmatpush.bf16.msrb.mxu0 %v978_v46 }
  0x27   :  { %621 = vmatpush.bf16.msrb.mxu1 %v986_v47 }
  0x28   :  { %634 = vmatpush.bf16.msrb.mxu2 %v994_v48 }
  0x29   :  { %647 = vmatpush.bf16.msrb.mxu3 %v1002_v49 }
  0x2a   :  { %609 = vmatpush.bf16.msrb.mxu0 %v977_v50 }
  0x2b   :  { %622 = vmatpush.bf16.msrb.mxu1 %v985_v51 }
  0x2c   :  { %635 = vmatpush.bf16.msrb.mxu2 %v993_v52 }
  0x2d   :  { %648 = vmatpush.bf16.msrb.mxu3 %v1001_v53 }
  0x2e   :  { %610 = vmatpush.bf16.msrb.mxu0 %v976_v54 }
  0x2f   :  { %623 = vmatpush.bf16.msrb.mxu1 %v984_v55 }
  0x30   :  { %636 = vmatpush.bf16.msrb.mxu2 %v992_v56 }
  0x31   :  { %649 = vmatpush.bf16.msrb.mxu3 %v1000_v57 }
  0x32   :  { %611 = vmatpush.bf16.msrb.mxu0 %v975_v58 }
  0x33   :  { %624 = vmatpush.bf16.msrb.mxu1 %v983_v59 }
  0x34   :  { %637 = vmatpush.bf16.msrb.mxu2 %v991_v60 }
  0x35   :  { %650 = vmatpush.bf16.msrb.mxu3 %v999_v61 }
  0x36   :  { %612 = vmatpush.bf16.msrb.mxu0 %v974_v62 }
  0x37   :  { %625 = vmatpush.bf16.msrb.mxu1 %v982_v63 }
  0x38   :  { %638 = vmatpush.bf16.msrb.mxu2 %v990_v0 }
  0x39   :  { %651 = vmatpush.bf16.msrb.mxu3 %v998_v1 }
  0x3a   :  { %613 = vmatpush.bf16.msrb.mxu0 %v973_v2 }
  0x3b   :  { %626 = vmatpush.bf16.msrb.mxu1 %v981_v3 }
  0x3c   :  { %639 = vmatpush.bf16.msrb.mxu2 %v989_v5 }
  0x3d   :  { %652 = vmatpush.bf16.msrb.mxu3 %v997_v6 }
  0x3e   :  { %614 = vmatpush.bf16.msrb.mxu0 %v972_v10 }
  0x3f   :  { %627 = vmatpush.bf16.msrb.mxu1 %v980_v11 }
  0x40   :  { %640 = vmatpush.bf16.msrb.mxu2 %v988_v14 }
  0x41   :  { %653 = vmatpush.bf16.msrb.mxu3 %v996_v15  ;;  %615 = vmatmul.bf16.vlgmr.msrb.gmra.mxu0 %v159_v16 }
  0x42   :  { %628 = vmatmul.bf16.vlgmr.msrb.gmra.mxu1 %v160_v17 }
  0x43   :  { %641 = vmatmul.bf16.vlgmr.msrb.gmra.mxu2 %v161_v18 }
  0x44   :  { %654 = vmatmul.bf16.vlgmr.msrb.gmra.mxu3 %v162_v19 }
  0x9e   :  { %v564_v20 = vpop.f32.mrf.mxu0 }
  0x9f   :  { %v577_v21 = vpop.f32.mrf.mxu1 }
  0xa0   :  { %v578_v28 = vadd.f32 %v577_v21, %v564_v20 }
  0xa6   :  { %v590_v22 = vpop.f32.mrf.mxu2  ;;  %v566_v24 = vpop.f32.mrf.mxu0 }
  0xa7   :  { %v603_v23 = vpop.f32.mrf.mxu3  ;;  %v579_v25 = vpop.f32.mrf.mxu1  ;;  %v591_v29 = vadd.f32 %v590_v22, %v578_v28 }
  0xa9   :  { %v604_v30 = vadd.f32 %v603_v23, %v591_v29 }
  0xae   :  { %v592_v26 = vpop.f32.mrf.mxu2 }
  0xaf   :  { %v605_v27 = vpop.f32.mrf.mxu3 }
  0xbe   :  { %v616_v31 = vpop.f32.mrf.mxu0 }
  0xbf   :  { %v629_v32 = vpop.f32.mrf.mxu1  ;;  %v617_v33 = vadd.f32 %v616_v31, %v604_v30 }
  0xc1   :  { %v630_v34 = vadd.f32 %v629_v32, %v617_v33 }
  0xc6   :  { %v642_v35 = vpop.f32.mrf.mxu2  ;;  %v618_v38 = vpop.f32.mrf.mxu0 }
  0xc7   :  { %v655_v36 = vpop.f32.mrf.mxu3  ;;  %v643_v37 = vadd.f32 %v642_v35, %v630_v34  ;;  %v631_v39 = vpop.f32.mrf.mxu1 }
  0xc9   :  { %v656_v40 = vadd.f32 %v655_v36, %v643_v37 }
  0xcb   :  { %v939_v41 = vmul.f32 -1.442695, %v656_v40 }
  0xcd   :  { %1004 = vpow2.f32 %v939_v41 }
  0xce   :  { %v644_v42 = vpop.f32.mrf.mxu2 }
  0xcf   :  { %v657_v43 = vpop.f32.mrf.mxu3 }
  0xd3   :  { %v1005_v44 = vpop.eup %1004 }
  0xd4   :  { %v662_v45 = vadd.f32 1.0, %v1005_v44 }
  0xd6   :  { %1006 = vrcp.f32 %v662_v45  ;;  %v674_v49 = vand.u32 2147483648, %v662_v45  ;;  %v672_v51 = vand.u32 2147483647, %v662_v45  ;;  %vm668_vm1 = vweird.f32 %v662_v45 }
  0xd8   :  { %v675_v53 = vor.u32 1.1754944e-38, %v674_v49  ;;  %vm673_vm3 = vcmp.eq.f32.partialorder %v672_v51, 8.507059e+37 }
  0xdc   :  { %v1007_v46 = vpop.eup %1006 }
  0xdd   :  { %v664_v47 = vmul.f32 %v1007_v46, %v662_v45  ;;  %vm669_vm0 = vweird.f32 %v1007_v46 }
  0xde   :  { %vm670_vm2 = vmor %vm668_vm1, %vm669_vm0 }
  0xdf   :  { %v665_v48 = vsub.f32 1.0, %v664_v47 }
  0xe1   :  { %v666_v50 = vmul.f32 %v1007_v46, %v665_v48 }
  0xe3   :  { %v667_v52 = vadd.f32 %v1007_v46, %v666_v50 }
  0xe5   :  { %v671_v54 = vsel %vm670_vm2, %v1007_v46, %v667_v52 }
  0xe6   :  { %v676_v55 = vsel %vm673_vm3, %v675_v53, %v671_v54 }
  0xe7   :  { %678 = vst [vmem:[%s1232_s2] sm:$0xff] %v676_v55 }

</bundles_post_ra>
